<compile_context>
chip_gen: v7x
topology: tpu7x:2x2x1
jax: 0.10.0
libtpu: 0.0.40
codegen_flags: <defaults>
</compile_context>

<pallas_src>
import functools
import math

import numpy as np
import jax
import jax.numpy as jnp
from jax import lax
from jax.experimental import pallas as pl
from jax.experimental.pallas import tpu as pltpu


COUT_PAD = 128  # output channels padded to a full lane dimension


# ----------------------------------------------------------------------------
# Deterministic parameter construction (mirrors GaborFilter._create_gabor_filters)
# ----------------------------------------------------------------------------
def create_gabor_filters(in_channels=3, out_channels=16, kernel_size=15,
                         num_orientations=4, num_scales=2):
    del num_orientations  # unused in the reference implementation as well
    filters = np.zeros((out_channels, in_channels, kernel_size, kernel_size),
                       dtype=np.float32)
    filters_per_input = out_channels // in_channels
    orientations_per_scale = filters_per_input // num_scales
    center = kernel_size // 2
    y, x = np.meshgrid(np.arange(kernel_size) - center,
                       np.arange(kernel_size) - center, indexing="ij")
    x = x.astype(np.float32)
    y = y.astype(np.float32)
    sigmas = [3.0 + i * 2.0 for i in range(num_scales)]
    lambdas = [4.0 + i * 4.0 for i in range(num_scales)]
    gamma = 0.5
    psi = 0.0
    for in_channel in range(in_channels):
        for scale_idx in range(num_scales):
            sigma = sigmas[scale_idx]
            lam = lambdas[scale_idx]
            for ori_idx in range(orientations_per_scale):
                theta = ori_idx * math.pi / orientations_per_scale
                x_theta = x * math.cos(theta) + y * math.sin(theta)
                y_theta = -x * math.sin(theta) + y * math.cos(theta)
                gb = (np.exp(-0.5 * (x_theta ** 2 + gamma ** 2 * y_theta ** 2)
                             / sigma ** 2)
                      * np.cos(2.0 * math.pi * x_theta / lam + psi))
                gb = gb / np.abs(gb).sum()
                out_channel = (in_channel * filters_per_input
                               + scale_idx * orientations_per_scale + ori_idx)
                if out_channel < out_channels:
                    filters[out_channel, in_channel] = gb.astype(np.float32)
    return filters  # (Cout, Cin, KH, KW)  -- remaining channels stay zero


def _round_up(n, m):
    return ((n + m - 1) // m) * m


# ----------------------------------------------------------------------------
# Pallas kernel: per-kh accumulation of lane-dense MXU matmuls.
#   acc[M, COUT_PAD] += P_kh[M, K45p] @ W_kh[K45p, COUT_PAD]   (bf16 in, f32 acc)
# P_kh is a statically-offset contiguous row slice of the resident input block
# (the KH fold lives in-kernel; no reshape / transpose is required).
# ----------------------------------------------------------------------------
def _gabor_conv_kernel(x_ref, w_ref, o_ref, *, ipb, kh_taps, row_w, hw):
    # x_ref: (ipb, H_pad*W, K45p) bf16 -- Cin*KW im2col, rows flattened (h_pad, w)
    # w_ref: (KH,  K45p, COUT_PAD) bf16 -- per-kh weight slabs (stationary MXU RHS)
    # o_ref: (ipb, H*W,  COUT_PAD) f32  -- lane-dense output block
    for img in range(ipb):
        acc = jnp.dot(x_ref[img, 0:hw, :], w_ref[0],
                      preferred_element_type=jnp.float32)
        for r in range(1, kh_taps):
            start = r * row_w
            acc = acc + jnp.dot(x_ref[img, start:start + hw, :], w_ref[r],
                                preferred_element_type=jnp.float32)
        o_ref[img] = acc


def gabor_filter_forward(x_nchw, weight_oihw, *, mxu_dtype=jnp.bfloat16):
    """Equivalent of GaborFilter.forward: F.conv2d(x, weight, padding=K//2)."""
    N, Cin, H, W = x_nchw.shape
    Cout, Cin_w, KH, KW = weight_oihw.shape
    assert Cin == Cin_w
    assert KH == KW and KH % 2 == 1, "same-size output requires an odd kernel"
    assert Cout <= COUT_PAD
    pad = KH // 2
    H_pad = H + 2 * pad
    HW = H * W
    K45 = Cin * KW                      # per-kh contraction depth
    K45p = _round_up(K45, 16)           # bf16 sublane packing

    # ---- images-per-block: big M tiles, single grid step for small problems ----
    per_img_in = H_pad * W * 128 * 2          # lane-padded bf16 VMEM footprint
    per_img_out = HW * COUT_PAD * 4
    budget = 12 * 2**20                       # conservative (v7x has 64 MiB VMEM)
    max_by_vmem = max(1, budget // max(per_img_in + per_img_out, 1))
    max_by_rows = max(1, 8192 // max(HW, 1))  # keep M per step <= ~8192 rows
    ipb = max(1, min(N, 8, max_by_vmem, max_by_rows))
    n_pad = _round_up(N, ipb)
    grid = (n_pad // ipb,)

    # ---- wrapper-side layout glue (bf16, only a KW=15x expansion) -------------
    xb = x_nchw.astype(mxu_dtype)
    x_hw_pad = jnp.pad(xb, ((0, 0), (0, 0), (pad, pad), (pad, pad)))
    # x45[n, r, w, ci*KW + kw] = x_hw_pad[n, ci, r, w + kw]
    shifts = jnp.stack([x_hw_pad[..., kw:kw + W] for kw in range(KW)], axis=-1)
    x45 = shifts.transpose(0, 2, 3, 1, 4).reshape(N, H_pad, W, K45)
    x45 = jnp.pad(x45, ((0, n_pad - N), (0, 0), (0, 0), (0, K45p - K45)))
    x45 = x45.reshape(n_pad, H_pad * W, K45p)

    # weights as per-kh stationary RHS slabs: w_t[kh, ci*KW+kw, co]
    w_t = weight_oihw.astype(jnp.float32).transpose(2, 1, 3, 0).reshape(KH, K45, Cout)
    w_t = jnp.pad(w_t, ((0, 0), (0, K45p - K45), (0, COUT_PAD - Cout)))
    w_t = w_t.astype(mxu_dtype)

    kernel = functools.partial(_gabor_conv_kernel,
                               ipb=ipb, kh_taps=KH, row_w=W, hw=HW)

    flops = 2 * N * HW * Cout * Cin * KH * KW
    bytes_accessed = (x45.size * x45.dtype.itemsize
                      + w_t.size * w_t.dtype.itemsize
                      + n_pad * HW * COUT_PAD * 4)
    cost = pl.CostEstimate(flops=int(flops), transcendentals=0,
                           bytes_accessed=int(bytes_accessed))

    block_bytes = ipb * (per_img_in + per_img_out) + KH * K45p * COUT_PAD * 2
    vmem_limit = int(min(56 * 2**20, max(32 * 2**20, 2 * block_bytes + (4 << 20))))

    out = pl.pallas_call(
        kernel,
        out_shape=jax.ShapeDtypeStruct((n_pad, HW, COUT_PAD), jnp.float32),
        grid=grid,
        in_specs=[
            # one image-group block of KW-expanded rows (KH halo is the H padding)
            pl.BlockSpec((ipb, H_pad * W, K45p), lambda i: (i, 0, 0)),
            # full filter bank resident in VMEM (same block every step)
            pl.BlockSpec((KH, K45p, COUT_PAD), lambda i: (0, 0, 0)),
        ],
        out_specs=pl.BlockSpec((ipb, HW, COUT_PAD), lambda i: (i, 0, 0)),
        compiler_params=pltpu.CompilerParams(
            dimension_semantics=("parallel",),
            vmem_limit_bytes=vmem_limit),
        cost_estimate=cost,
    )(x45, w_t)

    # (n_pad, H*W, COUT_PAD) -> (N, Cout, H, W)
    out = out[:N, :, :Cout].reshape(N, H, W, Cout).transpose(0, 3, 1, 2)
    return out


# ----------------------------------------------------------------------------
# Reference (pure JAX, f32) for verification
# ----------------------------------------------------------------------------
def gabor_filter_reference(x_nchw, weight_oihw):
    pad = weight_oihw.shape[-1] // 2
    return lax.conv_general_dilated(
        x_nchw.astype(jnp.float32), weight_oihw.astype(jnp.float32),
        window_strides=(1, 1), padding=[(pad, pad), (pad, pad)],
        dimension_numbers=("NCHW", "OIHW", "NCHW"))


if __name__ == "__main__":
    # Module defaults: in_channels=3, out_channels=16, kernel_size=15.
    N, Cin, Hin, Win = 2, 3, 16, 16
    weight = jnp.asarray(create_gabor_filters(in_channels=Cin, out_channels=16,
                                              kernel_size=15,
                                              num_orientations=4, num_scales=2))

    key = jax.random.PRNGKey(0)
    x = jax.random.normal(key, (N, Cin, Hin, Win), dtype=jnp.float32)

    out = jax.block_until_ready(gabor_filter_forward(x, weight))
    ref = jax.block_until_ready(gabor_filter_reference(x, weight))

    assert out.shape == (N, 16, Hin, Win), out.shape
    # bf16 MXU inputs with f32 accumulation vs. f32 reference: weights are
    # L1-normalized, so the absolute error stays well below 2e-2.
    np.testing.assert_allclose(np.asarray(out), np.asarray(ref),
                               rtol=2e-2, atol=2e-2)

    print("KERNEL_OK")
</pallas_src>

<mosaic_0001>
module attributes {stable_mosaic.version = 11 : i64} {
  func.func @_gabor_conv_kernel(%arg0: i32, %arg1: memref<2x480x48xbf16, #tpu.memory_space<vmem>>, %arg2: memref<15x48x128xbf16, #tpu.memory_space<vmem>>, %arg3: memref<2x256x128xf32, #tpu.memory_space<vmem>>) attributes {dimension_semantics = [#tpu.dimension_semantics<parallel>], iteration_bounds = array<i64: 1>, scalar_prefetch = 0 : i64, scratch_operands = 0 : i64, tpu.core_type = #tpu.core_type<tc>, window_params = [{transform_indices = @transform_0, window_bounds = array<i64: 2, 480, 48>}, {pipeline_mode = #tpu.pipeline_mode<synchronous>, transform_indices = @transform_1, window_bounds = array<i64: 15, 48, 128>}, {transform_indices = @transform_2, window_bounds = array<i64: 2, 256, 128>}]} {
    %c0 = arith.constant 0 : index
    %c0_0 = arith.constant 0 : index
    %c0_1 = arith.constant 0 : index
    %0 = vector.load %arg1[%c0, %c0_0, %c0_1] : memref<2x480x48xbf16, #tpu.memory_space<vmem>>, vector<1x256x48xbf16>
    %1 = vector.shape_cast %0 : vector<1x256x48xbf16> to vector<256x48xbf16>
    %c0_2 = arith.constant 0 : index
    %c0_3 = arith.constant 0 : index
    %c0_4 = arith.constant 0 : index
    %2 = vector.load %arg2[%c0_2, %c0_3, %c0_4] : memref<15x48x128xbf16, #tpu.memory_space<vmem>>, vector<1x48x128xbf16>
    %3 = vector.shape_cast %2 : vector<1x48x128xbf16> to vector<48x128xbf16>
    %cst = arith.constant dense<0.000000e+00> : vector<256x128xf32>
    %4 = tpu.matmul %1, %3, %cst {dimension_numbers = #tpu.dot_dimension_numbers<[1], [0], [0], [1], [0, 0, 1, 1], [], []>} : vector<256x48xbf16>, vector<48x128xbf16>, vector<256x128xf32> -> vector<256x128xf32>
    %c0_5 = arith.constant 0 : index
    %c16 = arith.constant 16 : index
    %c0_6 = arith.constant 0 : index
    %5 = vector.load %arg1[%c0_5, %c16, %c0_6] : memref<2x480x48xbf16, #tpu.memory_space<vmem>>, vector<1x256x48xbf16>
    %6 = vector.shape_cast %5 : vector<1x256x48xbf16> to vector<256x48xbf16>
    %c1 = arith.constant 1 : index
    %c0_7 = arith.constant 0 : index
    %c0_8 = arith.constant 0 : index
    %7 = vector.load %arg2[%c1, %c0_7, %c0_8] : memref<15x48x128xbf16, #tpu.memory_space<vmem>>, vector<1x48x128xbf16>
    %8 = vector.shape_cast %7 : vector<1x48x128xbf16> to vector<48x128xbf16>
    %cst_9 = arith.constant dense<0.000000e+00> : vector<256x128xf32>
    %9 = tpu.matmul %6, %8, %cst_9 {dimension_numbers = #tpu.dot_dimension_numbers<[1], [0], [0], [1], [0, 0, 1, 1], [], []>} : vector<256x48xbf16>, vector<48x128xbf16>, vector<256x128xf32> -> vector<256x128xf32>
    %10 = arith.addf %4, %9 : vector<256x128xf32>
    %c0_10 = arith.constant 0 : index
    %c32 = arith.constant 32 : index
    %c0_11 = arith.constant 0 : index
    %11 = vector.load %arg1[%c0_10, %c32, %c0_11] : memref<2x480x48xbf16, #tpu.memory_space<vmem>>, vector<1x256x48xbf16>
    %12 = vector.shape_cast %11 : vector<1x256x48xbf16> to vector<256x48xbf16>
    %c2 = arith.constant 2 : index
    %c0_12 = arith.constant 0 : index
    %c0_13 = arith.constant 0 : index
    %13 = vector.load %arg2[%c2, %c0_12, %c0_13] : memref<15x48x128xbf16, #tpu.memory_space<vmem>>, vector<1x48x128xbf16>
    %14 = vector.shape_cast %13 : vector<1x48x128xbf16> to vector<48x128xbf16>
    %cst_14 = arith.constant dense<0.000000e+00> : vector<256x128xf32>
    %15 = tpu.matmul %12, %14, %cst_14 {dimension_numbers = #tpu.dot_dimension_numbers<[1], [0], [0], [1], [0, 0, 1, 1], [], []>} : vector<256x48xbf16>, vector<48x128xbf16>, vector<256x128xf32> -> vector<256x128xf32>
    %16 = arith.addf %10, %15 : vector<256x128xf32>
    %c0_15 = arith.constant 0 : index
    %c48 = arith.constant 48 : index
    %c0_16 = arith.constant 0 : index
    %17 = vector.load %arg1[%c0_15, %c48, %c0_16] : memref<2x480x48xbf16, #tpu.memory_space<vmem>>, vector<1x256x48xbf16>
    %18 = vector.shape_cast %17 : vector<1x256x48xbf16> to vector<256x48xbf16>
    %c3 = arith.constant 3 : index
    %c0_17 = arith.constant 0 : index
    %c0_18 = arith.constant 0 : index
    %19 = vector.load %arg2[%c3, %c0_17, %c0_18] : memref<15x48x128xbf16, #tpu.memory_space<vmem>>, vector<1x48x128xbf16>
    %20 = vector.shape_cast %19 : vector<1x48x128xbf16> to vector<48x128xbf16>
    %cst_19 = arith.constant dense<0.000000e+00> : vector<256x128xf32>
    %21 = tpu.matmul %18, %20, %cst_19 {dimension_numbers = #tpu.dot_dimension_numbers<[1], [0], [0], [1], [0, 0, 1, 1], [], []>} : vector<256x48xbf16>, vector<48x128xbf16>, vector<256x128xf32> -> vector<256x128xf32>
    %22 = arith.addf %16, %21 : vector<256x128xf32>
    %c0_20 = arith.constant 0 : index
    %c64 = arith.constant 64 : index
    %c0_21 = arith.constant 0 : index
    %23 = vector.load %arg1[%c0_20, %c64, %c0_21] : memref<2x480x48xbf16, #tpu.memory_space<vmem>>, vector<1x256x48xbf16>
    %24 = vector.shape_cast %23 : vector<1x256x48xbf16> to vector<256x48xbf16>
    %c4 = arith.constant 4 : index
    %c0_22 = arith.constant 0 : index
    %c0_23 = arith.constant 0 : index
    %25 = vector.load %arg2[%c4, %c0_22, %c0_23] : memref<15x48x128xbf16, #tpu.memory_space<vmem>>, vector<1x48x128xbf16>
    %26 = vector.shape_cast %25 : vector<1x48x128xbf16> to vector<48x128xbf16>
    %cst_24 = arith.constant dense<0.000000e+00> : vector<256x128xf32>
    %27 = tpu.matmul %24, %26, %cst_24 {dimension_numbers = #tpu.dot_dimension_numbers<[1], [0], [0], [1], [0, 0, 1, 1], [], []>} : vector<256x48xbf16>, vector<48x128xbf16>, vector<256x128xf32> -> vector<256x128xf32>
    %28 = arith.addf %22, %27 : vector<256x128xf32>
    %c0_25 = arith.constant 0 : index
    %c80 = arith.constant 80 : index
    %c0_26 = arith.constant 0 : index
    %29 = vector.load %arg1[%c0_25, %c80, %c0_26] : memref<2x480x48xbf16, #tpu.memory_space<vmem>>, vector<1x256x48xbf16>
    %30 = vector.shape_cast %29 : vector<1x256x48xbf16> to vector<256x48xbf16>
    %c5 = arith.constant 5 : index
    %c0_27 = arith.constant 0 : index
    %c0_28 = arith.constant 0 : index
    %31 = vector.load %arg2[%c5, %c0_27, %c0_28] : memref<15x48x128xbf16, #tpu.memory_space<vmem>>, vector<1x48x128xbf16>
    %32 = vector.shape_cast %31 : vector<1x48x128xbf16> to vector<48x128xbf16>
    %cst_29 = arith.constant dense<0.000000e+00> : vector<256x128xf32>
    %33 = tpu.matmul %30, %32, %cst_29 {dimension_numbers = #tpu.dot_dimension_numbers<[1], [0], [0], [1], [0, 0, 1, 1], [], []>} : vector<256x48xbf16>, vector<48x128xbf16>, vector<256x128xf32> -> vector<256x128xf32>
    %34 = arith.addf %28, %33 : vector<256x128xf32>
    %c0_30 = arith.constant 0 : index
    %c96 = arith.constant 96 : index
    %c0_31 = arith.constant 0 : index
    %35 = vector.load %arg1[%c0_30, %c96, %c0_31] : memref<2x480x48xbf16, #tpu.memory_space<vmem>>, vector<1x256x48xbf16>
    %36 = vector.shape_cast %35 : vector<1x256x48xbf16> to vector<256x48xbf16>
    %c6 = arith.constant 6 : index
    %c0_32 = arith.constant 0 : index
    %c0_33 = arith.constant 0 : index
    %37 = vector.load %arg2[%c6, %c0_32, %c0_33] : memref<15x48x128xbf16, #tpu.memory_space<vmem>>, vector<1x48x128xbf16>
    %38 = vector.shape_cast %37 : vector<1x48x128xbf16> to vector<48x128xbf16>
    %cst_34 = arith.constant dense<0.000000e+00> : vector<256x128xf32>
    %39 = tpu.matmul %36, %38, %cst_34 {dimension_numbers = #tpu.dot_dimension_numbers<[1], [0], [0], [1], [0, 0, 1, 1], [], []>} : vector<256x48xbf16>, vector<48x128xbf16>, vector<256x128xf32> -> vector<256x128xf32>
    %40 = arith.addf %34, %39 : vector<256x128xf32>
    %c0_35 = arith.constant 0 : index
    %c112 = arith.constant 112 : index
    %c0_36 = arith.constant 0 : index
    %41 = vector.load %arg1[%c0_35, %c112, %c0_36] : memref<2x480x48xbf16, #tpu.memory_space<vmem>>, vector<1x256x48xbf16>
    %42 = vector.shape_cast %41 : vector<1x256x48xbf16> to vector<256x48xbf16>
    %c7 = arith.constant 7 : index
    %c0_37 = arith.constant 0 : index
    %c0_38 = arith.constant 0 : index
    %43 = vector.load %arg2[%c7, %c0_37, %c0_38] : memref<15x48x128xbf16, #tpu.memory_space<vmem>>, vector<1x48x128xbf16>
    %44 = vector.shape_cast %43 : vector<1x48x128xbf16> to vector<48x128xbf16>
    %cst_39 = arith.constant dense<0.000000e+00> : vector<256x128xf32>
    %45 = tpu.matmul %42, %44, %cst_39 {dimension_numbers = #tpu.dot_dimension_numbers<[1], [0], [0], [1], [0, 0, 1, 1], [], []>} : vector<256x48xbf16>, vector<48x128xbf16>, vector<256x128xf32> -> vector<256x128xf32>
    %46 = arith.addf %40, %45 : vector<256x128xf32>
    %c0_40 = arith.constant 0 : index
    %c128 = arith.constant 128 : index
    %c0_41 = arith.constant 0 : index
    %47 = vector.load %arg1[%c0_40, %c128, %c0_41] : memref<2x480x48xbf16, #tpu.memory_space<vmem>>, vector<1x256x48xbf16>
    %48 = vector.shape_cast %47 : vector<1x256x48xbf16> to vector<256x48xbf16>
    %c8 = arith.constant 8 : index
    %c0_42 = arith.constant 0 : index
    %c0_43 = arith.constant 0 : index
    %49 = vector.load %arg2[%c8, %c0_42, %c0_43] : memref<15x48x128xbf16, #tpu.memory_space<vmem>>, vector<1x48x128xbf16>
    %50 = vector.shape_cast %49 : vector<1x48x128xbf16> to vector<48x128xbf16>
    %cst_44 = arith.constant dense<0.000000e+00> : vector<256x128xf32>
    %51 = tpu.matmul %48, %50, %cst_44 {dimension_numbers = #tpu.dot_dimension_numbers<[1], [0], [0], [1], [0, 0, 1, 1], [], []>} : vector<256x48xbf16>, vector<48x128xbf16>, vector<256x128xf32> -> vector<256x128xf32>
    %52 = arith.addf %46, %51 : vector<256x128xf32>
    %c0_45 = arith.constant 0 : index
    %c144 = arith.constant 144 : index
    %c0_46 = arith.constant 0 : index
    %53 = vector.load %arg1[%c0_45, %c144, %c0_46] : memref<2x480x48xbf16, #tpu.memory_space<vmem>>, vector<1x256x48xbf16>
    %54 = vector.shape_cast %53 : vector<1x256x48xbf16> to vector<256x48xbf16>
    %c9 = arith.constant 9 : index
    %c0_47 = arith.constant 0 : index
    %c0_48 = arith.constant 0 : index
    %55 = vector.load %arg2[%c9, %c0_47, %c0_48] : memref<15x48x128xbf16, #tpu.memory_space<vmem>>, vector<1x48x128xbf16>
    %56 = vector.shape_cast %55 : vector<1x48x128xbf16> to vector<48x128xbf16>
    %cst_49 = arith.constant dense<0.000000e+00> : vector<256x128xf32>
    %57 = tpu.matmul %54, %56, %cst_49 {dimension_numbers = #tpu.dot_dimension_numbers<[1], [0], [0], [1], [0, 0, 1, 1], [], []>} : vector<256x48xbf16>, vector<48x128xbf16>, vector<256x128xf32> -> vector<256x128xf32>
    %58 = arith.addf %52, %57 : vector<256x128xf32>
    %c0_50 = arith.constant 0 : index
    %c160 = arith.constant 160 : index
    %c0_51 = arith.constant 0 : index
    %59 = vector.load %arg1[%c0_50, %c160, %c0_51] : memref<2x480x48xbf16, #tpu.memory_space<vmem>>, vector<1x256x48xbf16>
    %60 = vector.shape_cast %59 : vector<1x256x48xbf16> to vector<256x48xbf16>
    %c10 = arith.constant 10 : index
    %c0_52 = arith.constant 0 : index
    %c0_53 = arith.constant 0 : index
    %61 = vector.load %arg2[%c10, %c0_52, %c0_53] : memref<15x48x128xbf16, #tpu.memory_space<vmem>>, vector<1x48x128xbf16>
    %62 = vector.shape_cast %61 : vector<1x48x128xbf16> to vector<48x128xbf16>
    %cst_54 = arith.constant dense<0.000000e+00> : vector<256x128xf32>
    %63 = tpu.matmul %60, %62, %cst_54 {dimension_numbers = #tpu.dot_dimension_numbers<[1], [0], [0], [1], [0, 0, 1, 1], [], []>} : vector<256x48xbf16>, vector<48x128xbf16>, vector<256x128xf32> -> vector<256x128xf32>
    %64 = arith.addf %58, %63 : vector<256x128xf32>
    %c0_55 = arith.constant 0 : index
    %c176 = arith.constant 176 : index
    %c0_56 = arith.constant 0 : index
    %65 = vector.load %arg1[%c0_55, %c176, %c0_56] : memref<2x480x48xbf16, #tpu.memory_space<vmem>>, vector<1x256x48xbf16>
    %66 = vector.shape_cast %65 : vector<1x256x48xbf16> to vector<256x48xbf16>
    %c11 = arith.constant 11 : index
    %c0_57 = arith.constant 0 : index
    %c0_58 = arith.constant 0 : index
    %67 = vector.load %arg2[%c11, %c0_57, %c0_58] : memref<15x48x128xbf16, #tpu.memory_space<vmem>>, vector<1x48x128xbf16>
    %68 = vector.shape_cast %67 : vector<1x48x128xbf16> to vector<48x128xbf16>
    %cst_59 = arith.constant dense<0.000000e+00> : vector<256x128xf32>
    %69 = tpu.matmul %66, %68, %cst_59 {dimension_numbers = #tpu.dot_dimension_numbers<[1], [0], [0], [1], [0, 0, 1, 1], [], []>} : vector<256x48xbf16>, vector<48x128xbf16>, vector<256x128xf32> -> vector<256x128xf32>
    %70 = arith.addf %64, %69 : vector<256x128xf32>
    %c0_60 = arith.constant 0 : index
    %c192 = arith.constant 192 : index
    %c0_61 = arith.constant 0 : index
    %71 = vector.load %arg1[%c0_60, %c192, %c0_61] : memref<2x480x48xbf16, #tpu.memory_space<vmem>>, vector<1x256x48xbf16>
    %72 = vector.shape_cast %71 : vector<1x256x48xbf16> to vector<256x48xbf16>
    %c12 = arith.constant 12 : index
    %c0_62 = arith.constant 0 : index
    %c0_63 = arith.constant 0 : index
    %73 = vector.load %arg2[%c12, %c0_62, %c0_63] : memref<15x48x128xbf16, #tpu.memory_space<vmem>>, vector<1x48x128xbf16>
    %74 = vector.shape_cast %73 : vector<1x48x128xbf16> to vector<48x128xbf16>
    %cst_64 = arith.constant dense<0.000000e+00> : vector<256x128xf32>
    %75 = tpu.matmul %72, %74, %cst_64 {dimension_numbers = #tpu.dot_dimension_numbers<[1], [0], [0], [1], [0, 0, 1, 1], [], []>} : vector<256x48xbf16>, vector<48x128xbf16>, vector<256x128xf32> -> vector<256x128xf32>
    %76 = arith.addf %70, %75 : vector<256x128xf32>
    %c0_65 = arith.constant 0 : index
    %c208 = arith.constant 208 : index
    %c0_66 = arith.constant 0 : index
    %77 = vector.load %arg1[%c0_65, %c208, %c0_66] : memref<2x480x48xbf16, #tpu.memory_space<vmem>>, vector<1x256x48xbf16>
    %78 = vector.shape_cast %77 : vector<1x256x48xbf16> to vector<256x48xbf16>
    %c13 = arith.constant 13 : index
    %c0_67 = arith.constant 0 : index
    %c0_68 = arith.constant 0 : index
    %79 = vector.load %arg2[%c13, %c0_67, %c0_68] : memref<15x48x128xbf16, #tpu.memory_space<vmem>>, vector<1x48x128xbf16>
    %80 = vector.shape_cast %79 : vector<1x48x128xbf16> to vector<48x128xbf16>
    %cst_69 = arith.constant dense<0.000000e+00> : vector<256x128xf32>
    %81 = tpu.matmul %78, %80, %cst_69 {dimension_numbers = #tpu.dot_dimension_numbers<[1], [0], [0], [1], [0, 0, 1, 1], [], []>} : vector<256x48xbf16>, vector<48x128xbf16>, vector<256x128xf32> -> vector<256x128xf32>
    %82 = arith.addf %76, %81 : vector<256x128xf32>
    %c0_70 = arith.constant 0 : index
    %c224 = arith.constant 224 : index
    %c0_71 = arith.constant 0 : index
    %83 = vector.load %arg1[%c0_70, %c224, %c0_71] : memref<2x480x48xbf16, #tpu.memory_space<vmem>>, vector<1x256x48xbf16>
    %84 = vector.shape_cast %83 : vector<1x256x48xbf16> to vector<256x48xbf16>
    %c14 = arith.constant 14 : index
    %c0_72 = arith.constant 0 : index
    %c0_73 = arith.constant 0 : index
    %85 = vector.load %arg2[%c14, %c0_72, %c0_73] : memref<15x48x128xbf16, #tpu.memory_space<vmem>>, vector<1x48x128xbf16>
    %86 = vector.shape_cast %85 : vector<1x48x128xbf16> to vector<48x128xbf16>
    %cst_74 = arith.constant dense<0.000000e+00> : vector<256x128xf32>
    %87 = tpu.matmul %84, %86, %cst_74 {dimension_numbers = #tpu.dot_dimension_numbers<[1], [0], [0], [1], [0, 0, 1, 1], [], []>} : vector<256x48xbf16>, vector<48x128xbf16>, vector<256x128xf32> -> vector<256x128xf32>
    %88 = arith.addf %82, %87 : vector<256x128xf32>
    %c0_75 = arith.constant 0 : index
    %c0_76 = arith.constant 0 : index
    %c0_77 = arith.constant 0 : index
    %89 = vector.load %arg3[%c0_75, %c0_76, %c0_77] : memref<2x256x128xf32, #tpu.memory_space<vmem>>, vector<1x256x128xf32>
    %90 = vector.shape_cast %89 : vector<1x256x128xf32> to vector<256x128xf32>
    %91 = vector.shape_cast %88 : vector<256x128xf32> to vector<1x256x128xf32>
    tpu.vector_store %arg3[%c0_75, %c0_76, %c0_77], %91 {strides = array<i32>} : memref<2x256x128xf32, #tpu.memory_space<vmem>>, vector<1x256x128xf32>,
    %c1_78 = arith.constant 1 : index
    %c0_79 = arith.constant 0 : index
    %c0_80 = arith.constant 0 : index
    %92 = vector.load %arg1[%c1_78, %c0_79, %c0_80] : memref<2x480x48xbf16, #tpu.memory_space<vmem>>, vector<1x256x48xbf16>
    %93 = vector.shape_cast %92 : vector<1x256x48xbf16> to vector<256x48xbf16>
    %c0_81 = arith.constant 0 : index
    %c0_82 = arith.constant 0 : index
    %c0_83 = arith.constant 0 : index
    %94 = vector.load %arg2[%c0_81, %c0_82, %c0_83] : memref<15x48x128xbf16, #tpu.memory_space<vmem>>, vector<1x48x128xbf16>
    %95 = vector.shape_cast %94 : vector<1x48x128xbf16> to vector<48x128xbf16>
    %cst_84 = arith.constant dense<0.000000e+00> : vector<256x128xf32>
    %96 = tpu.matmul %93, %95, %cst_84 {dimension_numbers = #tpu.dot_dimension_numbers<[1], [0], [0], [1], [0, 0, 1, 1], [], []>} : vector<256x48xbf16>, vector<48x128xbf16>, vector<256x128xf32> -> vector<256x128xf32>
    %c1_85 = arith.constant 1 : index
    %c16_86 = arith.constant 16 : index
    %c0_87 = arith.constant 0 : index
    %97 = vector.load %arg1[%c1_85, %c16_86, %c0_87] : memref<2x480x48xbf16, #tpu.memory_space<vmem>>, vector<1x256x48xbf16>
    %98 = vector.shape_cast %97 : vector<1x256x48xbf16> to vector<256x48xbf16>
    %c1_88 = arith.constant 1 : index
    %c0_89 = arith.constant 0 : index
    %c0_90 = arith.constant 0 : index
    %99 = vector.load %arg2[%c1_88, %c0_89, %c0_90] : memref<15x48x128xbf16, #tpu.memory_space<vmem>>, vector<1x48x128xbf16>
    %100 = vector.shape_cast %99 : vector<1x48x128xbf16> to vector<48x128xbf16>
    %cst_91 = arith.constant dense<0.000000e+00> : vector<256x128xf32>
    %101 = tpu.matmul %98, %100, %cst_91 {dimension_numbers = #tpu.dot_dimension_numbers<[1], [0], [0], [1], [0, 0, 1, 1], [], []>} : vector<256x48xbf16>, vector<48x128xbf16>, vector<256x128xf32> -> vector<256x128xf32>
    %102 = arith.addf %96, %101 : vector<256x128xf32>
    %c1_92 = arith.constant 1 : index
    %c32_93 = arith.constant 32 : index
    %c0_94 = arith.constant 0 : index
    %103 = vector.load %arg1[%c1_92, %c32_93, %c0_94] : memref<2x480x48xbf16, #tpu.memory_space<vmem>>, vector<1x256x48xbf16>
    %104 = vector.shape_cast %103 : vector<1x256x48xbf16> to vector<256x48xbf16>
    %c2_95 = arith.constant 2 : index
    %c0_96 = arith.constant 0 : index
    %c0_97 = arith.constant 0 : index
    %105 = vector.load %arg2[%c2_95, %c0_96, %c0_97] : memref<15x48x128xbf16, #tpu.memory_space<vmem>>, vector<1x48x128xbf16>
    %106 = vector.shape_cast %105 : vector<1x48x128xbf16> to vector<48x128xbf16>
    %cst_98 = arith.constant dense<0.000000e+00> : vector<256x128xf32>
    %107 = tpu.matmul %104, %106, %cst_98 {dimension_numbers = #tpu.dot_dimension_numbers<[1], [0], [0], [1], [0, 0, 1, 1], [], []>} : vector<256x48xbf16>, vector<48x128xbf16>, vector<256x128xf32> -> vector<256x128xf32>
    %108 = arith.addf %102, %107 : vector<256x128xf32>
    %c1_99 = arith.constant 1 : index
    %c48_100 = arith.constant 48 : index
    %c0_101 = arith.constant 0 : index
    %109 = vector.load %arg1[%c1_99, %c48_100, %c0_101] : memref<2x480x48xbf16, #tpu.memory_space<vmem>>, vector<1x256x48xbf16>
    %110 = vector.shape_cast %109 : vector<1x256x48xbf16> to vector<256x48xbf16>
    %c3_102 = arith.constant 3 : index
    %c0_103 = arith.constant 0 : index
    %c0_104 = arith.constant 0 : index
    %111 = vector.load %arg2[%c3_102, %c0_103, %c0_104] : memref<15x48x128xbf16, #tpu.memory_space<vmem>>, vector<1x48x128xbf16>
    %112 = vector.shape_cast %111 : vector<1x48x128xbf16> to vector<48x128xbf16>
    %cst_105 = arith.constant dense<0.000000e+00> : vector<256x128xf32>
    %113 = tpu.matmul %110, %112, %cst_105 {dimension_numbers = #tpu.dot_dimension_numbers<[1], [0], [0], [1], [0, 0, 1, 1], [], []>} : vector<256x48xbf16>, vector<48x128xbf16>, vector<256x128xf32> -> vector<256x128xf32>
    %114 = arith.addf %108, %113 : vector<256x128xf32>
    %c1_106 = arith.constant 1 : index
    %c64_107 = arith.constant 64 : index
    %c0_108 = arith.constant 0 : index
    %115 = vector.load %arg1[%c1_106, %c64_107, %c0_108] : memref<2x480x48xbf16, #tpu.memory_space<vmem>>, vector<1x256x48xbf16>
    %116 = vector.shape_cast %115 : vector<1x256x48xbf16> to vector<256x48xbf16>
    %c4_109 = arith.constant 4 : index
    %c0_110 = arith.constant 0 : index
    %c0_111 = arith.constant 0 : index
    %117 = vector.load %arg2[%c4_109, %c0_110, %c0_111] : memref<15x48x128xbf16, #tpu.memory_space<vmem>>, vector<1x48x128xbf16>
    %118 = vector.shape_cast %117 : vector<1x48x128xbf16> to vector<48x128xbf16>
    %cst_112 = arith.constant dense<0.000000e+00> : vector<256x128xf32>
    %119 = tpu.matmul %116, %118, %cst_112 {dimension_numbers = #tpu.dot_dimension_numbers<[1], [0], [0], [1], [0, 0, 1, 1], [], []>} : vector<256x48xbf16>, vector<48x128xbf16>, vector<256x128xf32> -> vector<256x128xf32>
    %120 = arith.addf %114, %119 : vector<256x128xf32>
    %c1_113 = arith.constant 1 : index
    %c80_114 = arith.constant 80 : index
    %c0_115 = arith.constant 0 : index
    %121 = vector.load %arg1[%c1_113, %c80_114, %c0_115] : memref<2x480x48xbf16, #tpu.memory_space<vmem>>, vector<1x256x48xbf16>
    %122 = vector.shape_cast %121 : vector<1x256x48xbf16> to vector<256x48xbf16>
    %c5_116 = arith.constant 5 : index
    %c0_117 = arith.constant 0 : index
    %c0_118 = arith.constant 0 : index
    %123 = vector.load %arg2[%c5_116, %c0_117, %c0_118] : memref<15x48x128xbf16, #tpu.memory_space<vmem>>, vector<1x48x128xbf16>
    %124 = vector.shape_cast %123 : vector<1x48x128xbf16> to vector<48x128xbf16>
    %cst_119 = arith.constant dense<0.000000e+00> : vector<256x128xf32>
    %125 = tpu.matmul %122, %124, %cst_119 {dimension_numbers = #tpu.dot_dimension_numbers<[1], [0], [0], [1], [0, 0, 1, 1], [], []>} : vector<256x48xbf16>, vector<48x128xbf16>, vector<256x128xf32> -> vector<256x128xf32>
    %126 = arith.addf %120, %125 : vector<256x128xf32>
    %c1_120 = arith.constant 1 : index
    %c96_121 = arith.constant 96 : index
    %c0_122 = arith.constant 0 : index
    %127 = vector.load %arg1[%c1_120, %c96_121, %c0_122] : memref<2x480x48xbf16, #tpu.memory_space<vmem>>, vector<1x256x48xbf16>
    %128 = vector.shape_cast %127 : vector<1x256x48xbf16> to vector<256x48xbf16>
    %c6_123 = arith.constant 6 : index
    %c0_124 = arith.constant 0 : index
    %c0_125 = arith.constant 0 : index
    %129 = vector.load %arg2[%c6_123, %c0_124, %c0_125] : memref<15x48x128xbf16, #tpu.memory_space<vmem>>, vector<1x48x128xbf16>
    %130 = vector.shape_cast %129 : vector<1x48x128xbf16> to vector<48x128xbf16>
    %cst_126 = arith.constant dense<0.000000e+00> : vector<256x128xf32>
    %131 = tpu.matmul %128, %130, %cst_126 {dimension_numbers = #tpu.dot_dimension_numbers<[1], [0], [0], [1], [0, 0, 1, 1], [], []>} : vector<256x48xbf16>, vector<48x128xbf16>, vector<256x128xf32> -> vector<256x128xf32>
    %132 = arith.addf %126, %131 : vector<256x128xf32>
    %c1_127 = arith.constant 1 : index
    %c112_128 = arith.constant 112 : index
    %c0_129 = arith.constant 0 : index
    %133 = vector.load %arg1[%c1_127, %c112_128, %c0_129] : memref<2x480x48xbf16, #tpu.memory_space<vmem>>, vector<1x256x48xbf16>
    %134 = vector.shape_cast %133 : vector<1x256x48xbf16> to vector<256x48xbf16>
    %c7_130 = arith.constant 7 : index
    %c0_131 = arith.constant 0 : index
    %c0_132 = arith.constant 0 : index
    %135 = vector.load %arg2[%c7_130, %c0_131, %c0_132] : memref<15x48x128xbf16, #tpu.memory_space<vmem>>, vector<1x48x128xbf16>
    %136 = vector.shape_cast %135 : vector<1x48x128xbf16> to vector<48x128xbf16>
    %cst_133 = arith.constant dense<0.000000e+00> : vector<256x128xf32>
    %137 = tpu.matmul %134, %136, %cst_133 {dimension_numbers = #tpu.dot_dimension_numbers<[1], [0], [0], [1], [0, 0, 1, 1], [], []>} : vector<256x48xbf16>, vector<48x128xbf16>, vector<256x128xf32> -> vector<256x128xf32>
    %138 = arith.addf %132, %137 : vector<256x128xf32>
    %c1_134 = arith.constant 1 : index
    %c128_135 = arith.constant 128 : index
    %c0_136 = arith.constant 0 : index
    %139 = vector.load %arg1[%c1_134, %c128_135, %c0_136] : memref<2x480x48xbf16, #tpu.memory_space<vmem>>, vector<1x256x48xbf16>
    %140 = vector.shape_cast %139 : vector<1x256x48xbf16> to vector<256x48xbf16>
    %c8_137 = arith.constant 8 : index
    %c0_138 = arith.constant 0 : index
    %c0_139 = arith.constant 0 : index
    %141 = vector.load %arg2[%c8_137, %c0_138, %c0_139] : memref<15x48x128xbf16, #tpu.memory_space<vmem>>, vector<1x48x128xbf16>
    %142 = vector.shape_cast %141 : vector<1x48x128xbf16> to vector<48x128xbf16>
    %cst_140 = arith.constant dense<0.000000e+00> : vector<256x128xf32>
    %143 = tpu.matmul %140, %142, %cst_140 {dimension_numbers = #tpu.dot_dimension_numbers<[1], [0], [0], [1], [0, 0, 1, 1], [], []>} : vector<256x48xbf16>, vector<48x128xbf16>, vector<256x128xf32> -> vector<256x128xf32>
    %144 = arith.addf %138, %143 : vector<256x128xf32>
    %c1_141 = arith.constant 1 : index
    %c144_142 = arith.constant 144 : index
    %c0_143 = arith.constant 0 : index
    %145 = vector.load %arg1[%c1_141, %c144_142, %c0_143] : memref<2x480x48xbf16, #tpu.memory_space<vmem>>, vector<1x256x48xbf16>
    %146 = vector.shape_cast %145 : vector<1x256x48xbf16> to vector<256x48xbf16>
    %c9_144 = arith.constant 9 : index
    %c0_145 = arith.constant 0 : index
    %c0_146 = arith.constant 0 : index
    %147 = vector.load %arg2[%c9_144, %c0_145, %c0_146] : memref<15x48x128xbf16, #tpu.memory_space<vmem>>, vector<1x48x128xbf16>
    %148 = vector.shape_cast %147 : vector<1x48x128xbf16> to vector<48x128xbf16>
    %cst_147 = arith.constant dense<0.000000e+00> : vector<256x128xf32>
    %149 = tpu.matmul %146, %148, %cst_147 {dimension_numbers = #tpu.dot_dimension_numbers<[1], [0], [0], [1], [0, 0, 1, 1], [], []>} : vector<256x48xbf16>, vector<48x128xbf16>, vector<256x128xf32> -> vector<256x128xf32>
    %150 = arith.addf %144, %149 : vector<256x128xf32>
    %c1_148 = arith.constant 1 : index
    %c160_149 = arith.constant 160 : index
    %c0_150 = arith.constant 0 : index
    %151 = vector.load %arg1[%c1_148, %c160_149, %c0_150] : memref<2x480x48xbf16, #tpu.memory_space<vmem>>, vector<1x256x48xbf16>
    %152 = vector.shape_cast %151 : vector<1x256x48xbf16> to vector<256x48xbf16>
    %c10_151 = arith.constant 10 : index
    %c0_152 = arith.constant 0 : index
    %c0_153 = arith.constant 0 : index
    %153 = vector.load %arg2[%c10_151, %c0_152, %c0_153] : memref<15x48x128xbf16, #tpu.memory_space<vmem>>, vector<1x48x128xbf16>
    %154 = vector.shape_cast %153 : vector<1x48x128xbf16> to vector<48x128xbf16>
    %cst_154 = arith.constant dense<0.000000e+00> : vector<256x128xf32>
    %155 = tpu.matmul %152, %154, %cst_154 {dimension_numbers = #tpu.dot_dimension_numbers<[1], [0], [0], [1], [0, 0, 1, 1], [], []>} : vector<256x48xbf16>, vector<48x128xbf16>, vector<256x128xf32> -> vector<256x128xf32>
    %156 = arith.addf %150, %155 : vector<256x128xf32>
    %c1_155 = arith.constant 1 : index
    %c176_156 = arith.constant 176 : index
    %c0_157 = arith.constant 0 : index
    %157 = vector.load %arg1[%c1_155, %c176_156, %c0_157] : memref<2x480x48xbf16, #tpu.memory_space<vmem>>, vector<1x256x48xbf16>
    %158 = vector.shape_cast %157 : vector<1x256x48xbf16> to vector<256x48xbf16>
    %c11_158 = arith.constant 11 : index
    %c0_159 = arith.constant 0 : index
    %c0_160 = arith.constant 0 : index
    %159 = vector.load %arg2[%c11_158, %c0_159, %c0_160] : memref<15x48x128xbf16, #tpu.memory_space<vmem>>, vector<1x48x128xbf16>
    %160 = vector.shape_cast %159 : vector<1x48x128xbf16> to vector<48x128xbf16>
    %cst_161 = arith.constant dense<0.000000e+00> : vector<256x128xf32>
    %161 = tpu.matmul %158, %160, %cst_161 {dimension_numbers = #tpu.dot_dimension_numbers<[1], [0], [0], [1], [0, 0, 1, 1], [], []>} : vector<256x48xbf16>, vector<48x128xbf16>, vector<256x128xf32> -> vector<256x128xf32>
    %162 = arith.addf %156, %161 : vector<256x128xf32>
    %c1_162 = arith.constant 1 : index
    %c192_163 = arith.constant 192 : index
    %c0_164 = arith.constant 0 : index
    %163 = vector.load %arg1[%c1_162, %c192_163, %c0_164] : memref<2x480x48xbf16, #tpu.memory_space<vmem>>, vector<1x256x48xbf16>
    %164 = vector.shape_cast %163 : vector<1x256x48xbf16> to vector<256x48xbf16>
    %c12_165 = arith.constant 12 : index
    %c0_166 = arith.constant 0 : index
    %c0_167 = arith.constant 0 : index
    %165 = vector.load %arg2[%c12_165, %c0_166, %c0_167] : memref<15x48x128xbf16, #tpu.memory_space<vmem>>, vector<1x48x128xbf16>
    %166 = vector.shape_cast %165 : vector<1x48x128xbf16> to vector<48x128xbf16>
    %cst_168 = arith.constant dense<0.000000e+00> : vector<256x128xf32>
    %167 = tpu.matmul %164, %166, %cst_168 {dimension_numbers = #tpu.dot_dimension_numbers<[1], [0], [0], [1], [0, 0, 1, 1], [], []>} : vector<256x48xbf16>, vector<48x128xbf16>, vector<256x128xf32> -> vector<256x128xf32>
    %168 = arith.addf %162, %167 : vector<256x128xf32>
    %c1_169 = arith.constant 1 : index
    %c208_170 = arith.constant 208 : index
    %c0_171 = arith.constant 0 : index
    %169 = vector.load %arg1[%c1_169, %c208_170, %c0_171] : memref<2x480x48xbf16, #tpu.memory_space<vmem>>, vector<1x256x48xbf16>
    %170 = vector.shape_cast %169 : vector<1x256x48xbf16> to vector<256x48xbf16>
    %c13_172 = arith.constant 13 : index
    %c0_173 = arith.constant 0 : index
    %c0_174 = arith.constant 0 : index
    %171 = vector.load %arg2[%c13_172, %c0_173, %c0_174] : memref<15x48x128xbf16, #tpu.memory_space<vmem>>, vector<1x48x128xbf16>
    %172 = vector.shape_cast %171 : vector<1x48x128xbf16> to vector<48x128xbf16>
    %cst_175 = arith.constant dense<0.000000e+00> : vector<256x128xf32>
    %173 = tpu.matmul %170, %172, %cst_175 {dimension_numbers = #tpu.dot_dimension_numbers<[1], [0], [0], [1], [0, 0, 1, 1], [], []>} : vector<256x48xbf16>, vector<48x128xbf16>, vector<256x128xf32> -> vector<256x128xf32>
    %174 = arith.addf %168, %173 : vector<256x128xf32>
    %c1_176 = arith.constant 1 : index
    %c224_177 = arith.constant 224 : index
    %c0_178 = arith.constant 0 : index
    %175 = vector.load %arg1[%c1_176, %c224_177, %c0_178] : memref<2x480x48xbf16, #tpu.memory_space<vmem>>, vector<1x256x48xbf16>
    %176 = vector.shape_cast %175 : vector<1x256x48xbf16> to vector<256x48xbf16>
    %c14_179 = arith.constant 14 : index
    %c0_180 = arith.constant 0 : index
    %c0_181 = arith.constant 0 : index
    %177 = vector.load %arg2[%c14_179, %c0_180, %c0_181] : memref<15x48x128xbf16, #tpu.memory_space<vmem>>, vector<1x48x128xbf16>
    %178 = vector.shape_cast %177 : vector<1x48x128xbf16> to vector<48x128xbf16>
    %cst_182 = arith.constant dense<0.000000e+00> : vector<256x128xf32>
    %179 = tpu.matmul %176, %178, %cst_182 {dimension_numbers = #tpu.dot_dimension_numbers<[1], [0], [0], [1], [0, 0, 1, 1], [], []>} : vector<256x48xbf16>, vector<48x128xbf16>, vector<256x128xf32> -> vector<256x128xf32>
    %180 = arith.addf %174, %179 : vector<256x128xf32>
    %c1_183 = arith.constant 1 : index
    %c0_184 = arith.constant 0 : index
    %c0_185 = arith.constant 0 : index
    %181 = vector.load %arg3[%c1_183, %c0_184, %c0_185] : memref<2x256x128xf32, #tpu.memory_space<vmem>>, vector<1x256x128xf32>
    %182 = vector.shape_cast %181 : vector<1x256x128xf32> to vector<256x128xf32>
    %183 = vector.shape_cast %180 : vector<256x128xf32> to vector<1x256x128xf32>
    tpu.vector_store %arg3[%c1_183, %c0_184, %c0_185], %183 {strides = array<i32>} : memref<2x256x128xf32, #tpu.memory_space<vmem>>, vector<1x256x128xf32>,
    return
  }
  func.func @transform_0(%arg0: i32) -> (i32, i32, i32) {
    %c0_i32 = arith.constant 0 : i32
    %c0_i32_0 = arith.constant 0 : i32
    %c0_i32_1 = arith.constant 0 : i32
    return %arg0, %c0_i32, %c0_i32_0 : i32, i32, i32
  }
  func.func @transform_1(%arg0: i32) -> (i32, i32, i32) {
    %c0_i32 = arith.constant 0 : i32
    %c0_i32_0 = arith.constant 0 : i32
    %c0_i32_1 = arith.constant 0 : i32
    %c0_i32_2 = arith.constant 0 : i32
    return %c0_i32, %c0_i32_0, %c0_i32_1 : i32, i32, i32
  }
  func.func @transform_2(%arg0: i32) -> (i32, i32, i32) {
    %c0_i32 = arith.constant 0 : i32
    %c0_i32_0 = arith.constant 0 : i32
    %c0_i32_1 = arith.constant 0 : i32
    return %arg0, %c0_i32, %c0_i32_0 : i32, i32, i32
  }
}

</mosaic_0001>

<bundles_post_ra>
// kernel: tpu_custom_call.1
= control target key start
LH: loop header
LB: loop body
LE: loop exit
PB: predicated region body
PF: predicated region fallthrough
CT: control target
= control target key end

     0   :  { %vm158_vm0 = vcmask 392192   ;;  %s18125_s0 = inlined_call_operand.vmem [shape: bf16[2,480,48], index: 0, kind: input, shape index: {}]   ;;  %s18126_s1 = inlined_call_operand.vmem [shape: bf16[15,48,128], index: 1, kind: input, shape index: {}]   ;;  %s18127_s2 = inlined_call_operand.hbm [shape: f32[2,256,128], index: 2, kind: output, shape index: {}]  }
   0x1   :  { %v15239_v0 = vld [vmem:[%s18126_s1 + $0x18] sm:$0xff]   ;;  %v15241_v2 = vld [vmem:[%s18126_s1 + $0x20] sm:$0xff]   ;;  %v15243_v4 = vld [vmem:[%s18126_s1 + $0x28] sm:$0xff]  }
   0x2   :  { %v15240_v1 = vld [vmem:[%s18126_s1 + $0x18] sm:$0xff]   ;;  %13200 = vmatprep.subr.bf16.mxu0 %v15239_v0  ;;  %v15242_v3 = vld [vmem:[%s18126_s1 + $0x20] sm:$0xff]   ;;  %v15244_v5 = vld [vmem:[%s18126_s1 + $0x28] sm:$0xff]  }
   0x3   :  { %13770 = vmatprep.subr.bf16.mxu1 %v15240_v1  ;;  %13201 = vmatpush3.bf16.msra.mxu0 %v15239_v0  ;;  %v15842_v6 = vld [vmem:[%s18125_s0 + $0x8] sm:$0xff]   ;;  %v15847_v7 = vld [vmem:[%s18125_s0 + $0xf8] sm:$0xff]   ;;  %v15852_v8 = vld [vmem:[%s18125_s0 + $0x10] sm:$0xff]  }
   0x4   :  { %13771 = vmatpush3.bf16.msra.mxu1 %v15240_v1  ;;  %13202 = vmatprep.subr.bf16.mxu0 %v15241_v2  ;;  %v15248_v9 = vld [vmem:[%s18126_s1] sm:$0xff]   ;;  %v15872_v12 = vld [vmem:[%s18125_s0 + $0x18] sm:$0xff]   ;;  %v15877_v13 = vld [vmem:[%s18125_s0 + $0x108] sm:$0xff]  }
   0x5   :  { %13772 = vmatprep.subr.bf16.mxu1 %v15242_v3  ;;  %13206 = vmatprep.mubr.msk.bf16.mxu0 %vm158_vm0, %v15842_v6  ;;  %v15864_v10 = vld [vmem:[%s18125_s0 + $0x100] sm:$0xff]   ;;  %v15895_v15 = vld [vmem:[%s18125_s0 + $0x110] sm:$0xff]   ;;  %v15900_v16 = vld [vmem:[%s18125_s0 + $0x28] sm:$0xff]  }
   0x6   :  { %13776 = vmatprep.mubr.msk.bf16.mxu1 %vm158_vm0, %v15847_v7  ;;  %v15250_v11 = vld [vmem:[%s18126_s1] sm:$0xff]   ;;  %v15905_v17 = vld [vmem:[%s18125_s0 + $0x118] sm:$0xff]   ;;  %v15259_v18 = vld [vmem:[%s18126_s1 + $0x8] sm:$0xff]  }
   0x7   :  { %13203 = vmatpush3.bf16.msra.mxu0 %v15241_v2  ;;  %v15888_v14 = vld [vmem:[%s18125_s0 + $0x20] sm:$0xff]   ;;  %v15260_v19 = vld [vmem:[%s18126_s1 + $0x8] sm:$0xff]   ;;  %v15924_v20 = vld [vmem:[%s18125_s0 + $0x30] sm:$0xff]  }
   0x8   :  { %13773 = vmatpush3.bf16.msra.mxu1 %v15242_v3  ;;  %13204 = vmatprep.subr.bf16.mxu0 %v15243_v4  ;;  %v15929_v21 = vld [vmem:[%s18125_s0 + $0x120] sm:$0xff]   ;;  %v15934_v22 = vld [vmem:[%s18125_s0 + $0x38] sm:$0xff]   ;;  %v15939_v23 = vld [vmem:[%s18125_s0 + $0x128] sm:$0xff]  }
   0x9   :  { %13774 = vmatprep.subr.bf16.mxu1 %v15244_v5  ;;  %v15952_v24 = vld [vmem:[%s18125_s0 + $0x40] sm:$0xff]   ;;  %v15957_v25 = vld [vmem:[%s18125_s0 + $0x130] sm:$0xff]   ;;  %v15962_v26 = vld [vmem:[%s18125_s0 + $0x48] sm:$0xff]  }
   0xa   :  { %v15273_v27 = vld [vmem:[%s18126_s1 + $0x10] sm:$0xff]   ;;  %v15973_v29 = vld [vmem:[%s18125_s0 + $0x138] sm:$0xff]   ;;  %v15991_v31 = vld [vmem:[%s18125_s0 + $0x140] sm:$0xff]  }
   0xb   :  { %13205 = vmatpush3.bf16.msra.mxu0 %v15243_v4  ;;  %v15274_v28 = vld [vmem:[%s18126_s1 + $0x10] sm:$0xff]   ;;  %v15996_v32 = vld [vmem:[%s18125_s0 + $0x58] sm:$0xff]   ;;  %v16001_v33 = vld [vmem:[%s18125_s0 + $0x148] sm:$0xff]  }
   0xc   :  { %13775 = vmatpush3.bf16.msra.mxu1 %v15244_v5  ;;  %13238 = vmatprep.subr.bf16.mxu0 %v15248_v9  ;;  %v15986_v30 = vld [vmem:[%s18125_s0 + $0x50] sm:$0xff]   ;;  %v16020_v36 = vld [vmem:[%s18125_s0 + $0x60] sm:$0xff]   ;;  %v16030_v38 = vld [vmem:[%s18125_s0 + $0x68] sm:$0xff]  }
   0xd   :  { %13808 = vmatprep.subr.bf16.mxu1 %v15250_v11  ;;  %v15285_v34 = vld [vmem:[%s18126_s1 + $0x30] sm:$0xff]   ;;  %v16035_v39 = vld [vmem:[%s18125_s0 + $0x158] sm:$0xff]   ;;  %v15278_v41 = vld [vmem:[%s18125_s0 + $0x160] sm:$0xff]  }
   0xe   :  { %13207 = vmatmul.mubr.msk.bf16.vlgmr.msra.gmra.mrb[0].mxu0 %vm158_vm0, %v15852_v8  ;;  %v15286_v35 = vld [vmem:[%s18126_s1 + $0x30] sm:$0xff]   ;;  %v15279_v42 = vld [vmem:[%s18125_s0 + $0x78] sm:$0xff]   ;;  %v15280_v43 = vld [vmem:[%s18125_s0 + $0x168] sm:$0xff]  }
   0xf   :  { %13777 = vmatmul.mubr.msk.bf16.vlgmr.msra.gmra.mrb[0].mxu1 %vm158_vm0, %v15864_v10  ;;  %13239 = vmatpush3.bf16.msra.mxu0 %v15248_v9  ;;  %v16025_v37 = vld [vmem:[%s18125_s0 + $0x150] sm:$0xff]   ;;  %v15281_v44 = vld [vmem:[%s18125_s0 + $0x80] sm:$0xff]   ;;  %v15287_v48 = vld [vmem:[%s18126_s1 + $0x38] sm:$0xff]  }
  0x10   :  { %13809 = vmatpush3.bf16.msra.mxu1 %v15250_v11  ;;  %13210 = vmatprep.mubr.msk.bf16.mxu0 %vm158_vm0, %v15872_v12  ;;  %v15277_v40 = vld [vmem:[%s18125_s0 + $0x70] sm:$0xff]   ;;  %v15283_v46 = vld [vmem:[%s18125_s0] sm:$0xff]   ;;  %v15288_v49 = vld [vmem:[%s18126_s1 + $0x38] sm:$0xff]  }
  0x11   :  { %13780 = vmatprep.mubr.msk.bf16.mxu1 %vm158_vm0, %v15877_v13  ;;  %13240 = vmatprep.subr.bf16.mxu0 %v15259_v18  ;;  %v15282_v45 = vld [vmem:[%s18125_s0 + $0x170] sm:$0xff]   ;;  %v15289_v50 = vld [vmem:[%s18126_s1 + $0x40] sm:$0xff]   ;;  %v15294_v52 = vld [vmem:[%s18126_s1 + $0x48] sm:$0xff]  }
  0x12   :  { %13810 = vmatprep.subr.bf16.mxu1 %v15260_v19  ;;  %v15284_v47 = vld [vmem:[%s18125_s0 + $0xf0] sm:$0xff]   ;;  %v15290_v51 = vld [vmem:[%s18126_s1 + $0x40] sm:$0xff]   ;;  %v15296_v53 = vld [vmem:[%s18126_s1 + $0x48] sm:$0xff]  }
  0x13   :  { %13241 = vmatpush3.bf16.msra.mxu0 %v15259_v18  ;;  %v15291_v54 = vld [vmem:[%s18125_s0 + $0x10] sm:$0xff]   ;;  %v15292_v55 = vld [vmem:[%s18125_s0 + $0x100] sm:$0xff]   ;;  %v15293_v56 = vld [vmem:[%s18125_s0 + $0x18] sm:$0xff]  }
  0x14   :  { %13811 = vmatpush3.bf16.msra.mxu1 %v15260_v19  ;;  %13242 = vmatprep.subr.bf16.mxu0 %v15273_v27  ;;  %v15295_v57 = vld [vmem:[%s18125_s0 + $0x108] sm:$0xff]   ;;  %v15297_v58 = vld [vmem:[%s18125_s0 + $0x20] sm:$0xff]   ;;  %v15298_v59 = vld [vmem:[%s18125_s0 + $0x110] sm:$0xff]  }
  0x15   :  { %13812 = vmatprep.subr.bf16.mxu1 %v15274_v28  ;;  %v15305_v60 = vld [vmem:[%s18126_s1 + $0x50] sm:$0xff]   ;;  %v15299_v62 = vld [vmem:[%s18125_s0 + $0x28] sm:$0xff]   ;;  %v15319_v63 = vld [vmem:[%s18126_s1 + $0x58] sm:$0xff]  }
  0x16   :  { %13211 = vmatmul.mubr.msk.bf16.gmra.mrb[4].mxu0 %vm158_vm0, %v15888_v14  ;;  %v15306_v61 = vld [vmem:[%s18126_s1 + $0x50] sm:$0xff]   ;;  %v15300_v0 = vld [vmem:[%s18125_s0 + $0x118] sm:$0xff]   ;;  %v15302_v3 = vld [vmem:[%s18125_s0 + $0x120] sm:$0xff]  }
  0x17   :  { %13781 = vmatmul.mubr.msk.bf16.gmra.mrb[4].mxu1 %vm158_vm0, %v15895_v15  ;;  %13214 = vmatprep.mubr.msk.bf16.mxu0 %vm158_vm0, %v15900_v16  ;;  %v15301_v1 = vld [vmem:[%s18125_s0 + $0x30] sm:$0xff]   ;;  %v15320_v2 = vld [vmem:[%s18126_s1 + $0x58] sm:$0xff]   ;;  %v16202_v4 = vld [vmem:[%s18126_s1 + $0x60] sm:$0xff]  }
  0x18   :  { %13784 = vmatprep.mubr.msk.bf16.mxu1 %vm158_vm0, %v15905_v17  ;;  %13243 = vmatpush3.bf16.msra.mxu0 %v15273_v27  ;;  %v16207_v5 = vld [vmem:[%s18126_s1 + $0x60] sm:$0xff]   ;;  %v15308_v9 = vld [vmem:[%s18125_s0 + $0x130] sm:$0xff]   ;;  %v15310_v11 = vld [vmem:[%s18125_s0 + $0x138] sm:$0xff]  }
  0x19   :  { %13813 = vmatpush3.bf16.msra.mxu1 %v15274_v28  ;;  %13276 = vmatprep.subr.bf16.mxu0 %v15285_v34  ;;  %v15317_v18 = vld [vmem:[%s18125_s0 + $0x68] sm:$0xff]   ;;  %v15318_v19 = vld [vmem:[%s18125_s0 + $0x158] sm:$0xff]  }
  0x1a   :  { %13846 = vmatprep.subr.bf16.mxu1 %v15286_v35  ;;  %v15328_v27 = vld [vmem:[%s18125_s0 + $0x178] sm:$0xff]  }
  0x1b   :  { %v15329_v28 = vld [vmem:[%s18125_s0 + $0x18] sm:$0xff]  }
  0x1e   :  { %13215 = vmatmul.mubr.msk.bf16.gmra.mrb[8].mxu0 %vm158_vm0, %v15924_v20 }
  0x1f   :  { %13785 = vmatmul.mubr.msk.bf16.gmra.mrb[8].mxu1 %vm158_vm0, %v15929_v21  ;;  %13218 = vmatprep.mubr.msk.bf16.mxu0 %vm158_vm0, %v15934_v22 }
  0x20   :  { %13788 = vmatprep.mubr.msk.bf16.mxu1 %vm158_vm0, %v15939_v23 }
  0x26   :  { %13219 = vmatmul.mubr.msk.bf16.gmra.mrb[12].mxu0 %vm158_vm0, %v15952_v24 }
  0x27   :  { %13789 = vmatmul.mubr.msk.bf16.gmra.mrb[12].mxu1 %vm158_vm0, %v15957_v25  ;;  %13222 = vmatprep.mubr.msk.bf16.mxu0 %vm158_vm0, %v15962_v26 }
  0x28   :  { %13792 = vmatprep.mubr.msk.bf16.mxu1 %vm158_vm0, %v15973_v29 }
  0x2e   :  { %13223 = vmatmul.mubr.msk.bf16.gmra.mrb[16].mxu0 %vm158_vm0, %v15986_v30 }
  0x2f   :  { %13793 = vmatmul.mubr.msk.bf16.gmra.mrb[16].mxu1 %vm158_vm0, %v15991_v31  ;;  %13226 = vmatprep.mubr.msk.bf16.mxu0 %vm158_vm0, %v15996_v32 }
  0x30   :  { %13796 = vmatprep.mubr.msk.bf16.mxu1 %vm158_vm0, %v16001_v33 }
  0x36   :  { %13227 = vmatmul.mubr.msk.bf16.gmra.mrb[20].mxu0 %vm158_vm0, %v16020_v36 }
  0x37   :  { %13797 = vmatmul.mubr.msk.bf16.gmra.mrb[20].mxu1 %vm158_vm0, %v16025_v37  ;;  %13230 = vmatprep.mubr.msk.bf16.mxu0 %vm158_vm0, %v16030_v38 }
  0x38   :  { %13800 = vmatprep.mubr.msk.bf16.mxu1 %vm158_vm0, %v16035_v39 }
  0x3e   :  { %13231 = vmatmul.mubr.msk.bf16.gmra.mrb[24].mxu0 %vm158_vm0, %v15277_v40 }
  0x3f   :  { %13801 = vmatmul.mubr.msk.bf16.gmra.mrb[24].mxu1 %vm158_vm0, %v15278_v41  ;;  %13234 = vmatprep.mubr.msk.bf16.mxu0 %vm158_vm0, %v15279_v42 }
  0x40   :  { %13804 = vmatprep.mubr.msk.bf16.mxu1 %vm158_vm0, %v15280_v43 }
  0x46   :  { %13235 = vmatmul.mubr.msk.bf16.gmra.mrb[28].mxu0 %vm158_vm0, %v15281_v44  ;;  %v15341_v44 = vld [vmem:[%s18125_s0 + $0x40] sm:$0xff]  }
  0x47   :  { %13805 = vmatmul.mubr.msk.bf16.gmra.mrb[28].mxu1 %vm158_vm0, %v15282_v45  ;;  %13244 = vmatprep.mubr.msk.bf16.mxu0 %vm158_vm0, %v15283_v46  ;;  %v15342_v45 = vld [vmem:[%s18125_s0 + $0x130] sm:$0xff]   ;;  %v15345_v46 = vld [vmem:[%s18125_s0 + $0x48] sm:$0xff]  }
  0x48   :  { %13814 = vmatprep.mubr.msk.bf16.mxu1 %vm158_vm0, %v15284_v47  ;;  %v15346_v47 = vld [vmem:[%s18125_s0 + $0x138] sm:$0xff]  }
  0x4e   :  { %13245 = vmatmul.mubr.msk.bf16.vlgmr.msra.gmra.mrb[0].mxu0 %vm158_vm0, %v15842_v6  ;;  %v15303_v6 = vld [vmem:[%s18125_s0 + $0x38] sm:$0xff]  }
  0x4f   :  { %13815 = vmatmul.mubr.msk.bf16.vlgmr.msra.gmra.mrb[0].mxu1 %vm158_vm0, %v15847_v7  ;;  %13277 = vmatpush3.bf16.msra.mxu0 %v15285_v34  ;;  %v15304_v7 = vld [vmem:[%s18125_s0 + $0x128] sm:$0xff]  }
  0x50   :  { %13847 = vmatpush3.bf16.msra.mxu1 %v15286_v35  ;;  %13248 = vmatprep.mubr.msk.bf16.mxu0 %vm158_vm0, %v15852_v8  ;;  %v15307_v8 = vld [vmem:[%s18125_s0 + $0x40] sm:$0xff]   ;;  %v15343_v34 = vld [vmem:[%s18126_s1 + $0x68] sm:$0xff]  }
  0x51   :  { %13818 = vmatprep.mubr.msk.bf16.mxu1 %vm158_vm0, %v15864_v10  ;;  %13278 = vmatprep.subr.bf16.mxu0 %v15287_v48  ;;  %v15309_v10 = vld [vmem:[%s18125_s0 + $0x48] sm:$0xff]  }
  0x52   :  { %13848 = vmatprep.subr.bf16.mxu1 %v15288_v49  ;;  %v15344_v35 = vld [vmem:[%s18126_s1 + $0x68] sm:$0xff]  }
  0x53   :  { %13279 = vmatpush3.bf16.msra.mxu0 %v15287_v48  ;;  %v15347_v48 = vld [vmem:[%s18125_s0 + $0x50] sm:$0xff]  }
  0x54   :  { %13849 = vmatpush3.bf16.msra.mxu1 %v15288_v49  ;;  %13280 = vmatprep.subr.bf16.mxu0 %v15289_v50  ;;  %v15348_v49 = vld [vmem:[%s18125_s0 + $0x140] sm:$0xff]  }
  0x55   :  { %13850 = vmatprep.subr.bf16.mxu1 %v15290_v51 }
  0x56   :  { %13249 = vmatmul.mubr.msk.bf16.gmra.mrb[4].mxu0 %vm158_vm0, %v15872_v12  ;;  %v15311_v12 = vld [vmem:[%s18125_s0 + $0x50] sm:$0xff]  }
  0x57   :  { %13819 = vmatmul.mubr.msk.bf16.gmra.mrb[4].mxu1 %vm158_vm0, %v15877_v13  ;;  %13252 = vmatprep.mubr.msk.bf16.mxu0 %vm158_vm0, %v15888_v14  ;;  %v15312_v13 = vld [vmem:[%s18125_s0 + $0x140] sm:$0xff]   ;;  %v15313_v14 = vld [vmem:[%s18125_s0 + $0x58] sm:$0xff]  }
  0x58   :  { %13822 = vmatprep.mubr.msk.bf16.mxu1 %vm158_vm0, %v15895_v15  ;;  %13281 = vmatpush3.bf16.msra.mxu0 %v15289_v50  ;;  %v15314_v15 = vld [vmem:[%s18125_s0 + $0x148] sm:$0xff]   ;;  %v15349_v50 = vld [vmem:[%s18125_s0 + $0x58] sm:$0xff]  }
  0x59   :  { %13851 = vmatpush3.bf16.msra.mxu1 %v15290_v51  ;;  %13314 = vmatprep.subr.bf16.mxu0 %v15294_v52  ;;  %v15350_v51 = vld [vmem:[%s18125_s0 + $0x148] sm:$0xff]  }
  0x5a   :  { %13884 = vmatprep.subr.bf16.mxu1 %v15296_v53 }
  0x5e   :  { %13253 = vmatmul.mubr.msk.bf16.gmra.mrb[8].mxu0 %vm158_vm0, %v15900_v16  ;;  %v15315_v16 = vld [vmem:[%s18125_s0 + $0x60] sm:$0xff]  }
  0x5f   :  { %13823 = vmatmul.mubr.msk.bf16.gmra.mrb[8].mxu1 %vm158_vm0, %v15905_v17  ;;  %13256 = vmatprep.mubr.msk.bf16.mxu0 %vm158_vm0, %v15924_v20  ;;  %v15316_v17 = vld [vmem:[%s18125_s0 + $0x150] sm:$0xff]  }
  0x60   :  { %13826 = vmatprep.mubr.msk.bf16.mxu1 %vm158_vm0, %v15929_v21  ;;  %v15321_v20 = vld [vmem:[%s18125_s0 + $0x70] sm:$0xff]   ;;  %v15322_v21 = vld [vmem:[%s18125_s0 + $0x160] sm:$0xff]  }
  0x66   :  { %13257 = vmatmul.mubr.msk.bf16.gmra.mrb[12].mxu0 %vm158_vm0, %v15934_v22  ;;  %v15323_v22 = vld [vmem:[%s18125_s0 + $0x78] sm:$0xff]  }
  0x67   :  { %13827 = vmatmul.mubr.msk.bf16.gmra.mrb[12].mxu1 %vm158_vm0, %v15939_v23  ;;  %13260 = vmatprep.mubr.msk.bf16.mxu0 %vm158_vm0, %v15952_v24  ;;  %v15324_v23 = vld [vmem:[%s18125_s0 + $0x168] sm:$0xff]   ;;  %v15325_v24 = vld [vmem:[%s18125_s0 + $0x80] sm:$0xff]  }
  0x68   :  { %13830 = vmatprep.mubr.msk.bf16.mxu1 %vm158_vm0, %v15957_v25  ;;  %v15326_v25 = vld [vmem:[%s18125_s0 + $0x170] sm:$0xff]  }
  0x6e   :  { %13261 = vmatmul.mubr.msk.bf16.gmra.mrb[16].mxu0 %vm158_vm0, %v15962_v26  ;;  %v15327_v26 = vld [vmem:[%s18125_s0 + $0x88] sm:$0xff]  }
  0x6f   :  { %13831 = vmatmul.mubr.msk.bf16.gmra.mrb[16].mxu1 %vm158_vm0, %v15973_v29  ;;  %13264 = vmatprep.mubr.msk.bf16.mxu0 %vm158_vm0, %v15986_v30  ;;  %v15330_v29 = vld [vmem:[%s18125_s0 + $0x108] sm:$0xff]   ;;  %v15331_v30 = vld [vmem:[%s18125_s0 + $0x20] sm:$0xff]  }
  0x70   :  { %13834 = vmatprep.mubr.msk.bf16.mxu1 %vm158_vm0, %v15991_v31  ;;  %v15333_v31 = vld [vmem:[%s18125_s0 + $0x110] sm:$0xff]  }
  0x76   :  { %13265 = vmatmul.mubr.msk.bf16.gmra.mrb[20].mxu0 %vm158_vm0, %v15996_v32  ;;  %v15335_v32 = vld [vmem:[%s18125_s0 + $0x28] sm:$0xff]  }
  0x77   :  { %13835 = vmatmul.mubr.msk.bf16.gmra.mrb[20].mxu1 %vm158_vm0, %v16001_v33  ;;  %13268 = vmatprep.mubr.msk.bf16.mxu0 %vm158_vm0, %v16020_v36  ;;  %v15336_v33 = vld [vmem:[%s18125_s0 + $0x118] sm:$0xff]   ;;  %v15337_v36 = vld [vmem:[%s18125_s0 + $0x30] sm:$0xff]  }
  0x78   :  { %13838 = vmatprep.mubr.msk.bf16.mxu1 %vm158_vm0, %v16025_v37  ;;  %v15357_v37 = vld [vmem:[%s18126_s1 + $0x70] sm:$0xff]  }
  0x7e   :  { %13269 = vmatmul.mubr.msk.bf16.gmra.mrb[24].mxu0 %vm158_vm0, %v16030_v38  ;;  %v15338_v38 = vld [vmem:[%s18125_s0 + $0x120] sm:$0xff]  }
  0x7f   :  { %13839 = vmatmul.mubr.msk.bf16.gmra.mrb[24].mxu1 %vm158_vm0, %v16035_v39  ;;  %13272 = vmatprep.mubr.msk.bf16.mxu0 %vm158_vm0, %v15277_v40  ;;  %v15339_v39 = vld [vmem:[%s18125_s0 + $0x38] sm:$0xff]   ;;  %v15358_v40 = vld [vmem:[%s18126_s1 + $0x70] sm:$0xff]  }
  0x80   :  { %13842 = vmatprep.mubr.msk.bf16.mxu1 %vm158_vm0, %v15278_v41  ;;  %v15340_v41 = vld [vmem:[%s18125_s0 + $0x128] sm:$0xff]  }
  0x86   :  { %13273 = vmatmul.mubr.msk.bf16.gmra.mrb[28].mxu0 %vm158_vm0, %v15279_v42  ;;  %v16356_v42 = vld [vmem:[%s18126_s1 + $0x78] sm:$0xff]  }
  0x87   :  { %13843 = vmatmul.mubr.msk.bf16.gmra.mrb[28].mxu1 %vm158_vm0, %v15280_v43  ;;  %13282 = vmatprep.mubr.msk.bf16.mxu0 %vm158_vm0, %v15291_v54  ;;  %v16361_v43 = vld [vmem:[%s18126_s1 + $0x78] sm:$0xff]   ;;  %v15353_v54 = vld [vmem:[%s18125_s0 + $0x68] sm:$0xff]  }
  0x88   :  { %13852 = vmatprep.mubr.msk.bf16.mxu1 %vm158_vm0, %v15292_v55  ;;  %v15354_v55 = vld [vmem:[%s18125_s0 + $0x158] sm:$0xff]  }
  0x8e   :  { %13283 = vmatmul.mubr.msk.bf16.vlgmr.msra.gmra.mrb[0].mxu0 %vm158_vm0, %v15293_v56  ;;  %v15355_v56 = vld [vmem:[%s18125_s0 + $0x70] sm:$0xff]  }
  0x8f   :  { %13853 = vmatmul.mubr.msk.bf16.vlgmr.msra.gmra.mrb[0].mxu1 %vm158_vm0, %v15295_v57  ;;  %13315 = vmatpush3.bf16.msra.mxu0 %v15294_v52  ;;  %v15351_v52 = vld [vmem:[%s18125_s0 + $0x60] sm:$0xff]  }
  0x90   :  { %13885 = vmatpush3.bf16.msra.mxu1 %v15296_v53  ;;  %13286 = vmatprep.mubr.msk.bf16.mxu0 %vm158_vm0, %v15297_v58  ;;  %v15352_v53 = vld [vmem:[%s18125_s0 + $0x150] sm:$0xff]   ;;  %v15356_v57 = vld [vmem:[%s18125_s0 + $0x160] sm:$0xff]   ;;  %v15359_v58 = vld [vmem:[%s18125_s0 + $0x78] sm:$0xff]  }
  0x91   :  { %13856 = vmatprep.mubr.msk.bf16.mxu1 %vm158_vm0, %v15298_v59  ;;  %13316 = vmatprep.subr.bf16.mxu0 %v15305_v60  ;;  %v15360_v59 = vld [vmem:[%s18125_s0 + $0x168] sm:$0xff]  }
  0x92   :  { %13886 = vmatprep.subr.bf16.mxu1 %v15306_v61 }
  0x93   :  { %13317 = vmatpush3.bf16.msra.mxu0 %v15305_v60  ;;  %v15361_v60 = vld [vmem:[%s18125_s0 + $0x80] sm:$0xff]  }
  0x94   :  { %13887 = vmatpush3.bf16.msra.mxu1 %v15306_v61  ;;  %13318 = vmatprep.subr.bf16.mxu0 %v15319_v63  ;;  %v15362_v61 = vld [vmem:[%s18125_s0 + $0x170] sm:$0xff]  }
  0x95   :  { %13888 = vmatprep.subr.bf16.mxu1 %v15320_v2 }
  0x96   :  { %13287 = vmatmul.mubr.msk.bf16.gmra.mrb[4].mxu0 %vm158_vm0, %v15299_v62  ;;  %v15363_v62 = vld [vmem:[%s18125_s0 + $0x88] sm:$0xff]  }
  0x97   :  { %13857 = vmatmul.mubr.msk.bf16.gmra.mrb[4].mxu1 %vm158_vm0, %v15300_v0  ;;  %13290 = vmatprep.mubr.msk.bf16.mxu0 %vm158_vm0, %v15301_v1  ;;  %v15365_v0 = vld [vmem:[%s18125_s0 + $0x90] sm:$0xff]   ;;  %v15366_v1 = vld [vmem:[%s18125_s0 + $0x180] sm:$0xff]  }
  0x98   :  { %13860 = vmatprep.mubr.msk.bf16.mxu1 %vm158_vm0, %v15302_v3  ;;  %13319 = vmatpush3.bf16.msra.mxu0 %v15319_v63  ;;  %v15364_v63 = vld [vmem:[%s18125_s0 + $0x178] sm:$0xff]   ;;  %v15368_v3 = vld [vmem:[%s18125_s0 + $0x110] sm:$0xff]  }
  0x99   :  { %13889 = vmatpush3.bf16.msra.mxu1 %v15320_v2  ;;  %13352 = vmatprep.subr.bf16.mxu0 %v16202_v4  ;;  %v15367_v2 = vld [vmem:[%s18125_s0 + $0x20] sm:$0xff]  }
  0x9a   :  { %13922 = vmatprep.subr.bf16.mxu1 %v16207_v5 }
  0x9e   :  { %13291 = vmatmul.mubr.msk.bf16.gmra.mrb[8].mxu0 %vm158_vm0, %v15303_v6  ;;  %v15373_v6 = vld [vmem:[%s18125_s0 + $0x30] sm:$0xff]  }
  0x9f   :  { %13861 = vmatmul.mubr.msk.bf16.gmra.mrb[8].mxu1 %vm158_vm0, %v15304_v7  ;;  %13294 = vmatprep.mubr.msk.bf16.mxu0 %vm158_vm0, %v15307_v8  ;;  %v15374_v7 = vld [vmem:[%s18125_s0 + $0x120] sm:$0xff]  }
  0xa0   :  { %13864 = vmatprep.mubr.msk.bf16.mxu1 %vm158_vm0, %v15308_v9  ;;  %v15381_v8 = vld [vmem:[%s18126_s1 + $0x80] sm:$0xff]  }
  0xa1   :  { %v15382_v9 = vld [vmem:[%s18126_s1 + $0x80] sm:$0xff]  }
  0xa6   :  { %13295 = vmatmul.mubr.msk.bf16.gmra.mrb[12].mxu0 %vm158_vm0, %v15309_v10  ;;  %v15375_v10 = vld [vmem:[%s18125_s0 + $0x38] sm:$0xff]  }
  0xa7   :  { %13865 = vmatmul.mubr.msk.bf16.gmra.mrb[12].mxu1 %vm158_vm0, %v15310_v11  ;;  %13298 = vmatprep.mubr.msk.bf16.mxu0 %vm158_vm0, %v15311_v12  ;;  %v15395_v11 = vld [vmem:[%s18126_s1 + $0x88] sm:$0xff]  }
  0xa8   :  { %13868 = vmatprep.mubr.msk.bf16.mxu1 %vm158_vm0, %v15312_v13  ;;  %v15376_v12 = vld [vmem:[%s18125_s0 + $0x128] sm:$0xff]   ;;  %v15377_v13 = vld [vmem:[%s18125_s0 + $0x40] sm:$0xff]  }
  0xae   :  { %13299 = vmatmul.mubr.msk.bf16.gmra.mrb[16].mxu0 %vm158_vm0, %v15313_v14  ;;  %v15396_v14 = vld [vmem:[%s18126_s1 + $0x88] sm:$0xff]  }
  0xaf   :  { %13869 = vmatmul.mubr.msk.bf16.gmra.mrb[16].mxu1 %vm158_vm0, %v15314_v15  ;;  %13302 = vmatprep.mubr.msk.bf16.mxu0 %vm158_vm0, %v15315_v16  ;;  %v15378_v15 = vld [vmem:[%s18125_s0 + $0x130] sm:$0xff]  }
  0xb0   :  { %13872 = vmatprep.mubr.msk.bf16.mxu1 %vm158_vm0, %v15316_v17  ;;  %v16510_v16 = vld [vmem:[%s18126_s1 + $0x90] sm:$0xff]  }
  0xb1   :  { %v16515_v17 = vld [vmem:[%s18126_s1 + $0x90] sm:$0xff]  }
  0xb6   :  { %13303 = vmatmul.mubr.msk.bf16.gmra.mrb[20].mxu0 %vm158_vm0, %v15317_v18  ;;  %v15379_v18 = vld [vmem:[%s18125_s0 + $0x48] sm:$0xff]  }
  0xb7   :  { %13873 = vmatmul.mubr.msk.bf16.gmra.mrb[20].mxu1 %vm158_vm0, %v15318_v19  ;;  %13306 = vmatprep.mubr.msk.bf16.mxu0 %vm158_vm0, %v15321_v20  ;;  %v15380_v19 = vld [vmem:[%s18125_s0 + $0x138] sm:$0xff]   ;;  %v15383_v20 = vld [vmem:[%s18125_s0 + $0x50] sm:$0xff]  }
  0xb8   :  { %13876 = vmatprep.mubr.msk.bf16.mxu1 %vm158_vm0, %v15322_v21  ;;  %v15384_v21 = vld [vmem:[%s18125_s0 + $0x140] sm:$0xff]  }
  0xbe   :  { %13307 = vmatmul.mubr.msk.bf16.gmra.mrb[24].mxu0 %vm158_vm0, %v15323_v22  ;;  %v15385_v22 = vld [vmem:[%s18125_s0 + $0x58] sm:$0xff]  }
  0xbf   :  { %13877 = vmatmul.mubr.msk.bf16.gmra.mrb[24].mxu1 %vm158_vm0, %v15324_v23  ;;  %13310 = vmatprep.mubr.msk.bf16.mxu0 %vm158_vm0, %v15325_v24  ;;  %v15386_v23 = vld [vmem:[%s18125_s0 + $0x148] sm:$0xff]   ;;  %v15387_v24 = vld [vmem:[%s18125_s0 + $0x60] sm:$0xff]  }
  0xc0   :  { %13880 = vmatprep.mubr.msk.bf16.mxu1 %vm158_vm0, %v15326_v25  ;;  %v15388_v25 = vld [vmem:[%s18125_s0 + $0x150] sm:$0xff]  }
  0xc6   :  { %13311 = vmatmul.mubr.msk.bf16.gmra.mrb[28].mxu0 %vm158_vm0, %v15327_v26  ;;  %v15389_v26 = vld [vmem:[%s18125_s0 + $0x68] sm:$0xff]  }
  0xc7   :  { %13881 = vmatmul.mubr.msk.bf16.gmra.mrb[28].mxu1 %vm158_vm0, %v15328_v27  ;;  %13320 = vmatprep.mubr.msk.bf16.mxu0 %vm158_vm0, %v15329_v28  ;;  %v15390_v27 = vld [vmem:[%s18125_s0 + $0x158] sm:$0xff]   ;;  %v15391_v28 = vld [vmem:[%s18125_s0 + $0x70] sm:$0xff]  }
  0xc8   :  { %13890 = vmatprep.mubr.msk.bf16.mxu1 %vm158_vm0, %v15330_v29  ;;  %v15392_v29 = vld [vmem:[%s18125_s0 + $0x160] sm:$0xff]  }
  0xce   :  { %13321 = vmatmul.mubr.msk.bf16.vlgmr.msra.gmra.mrb[0].mxu0 %vm158_vm0, %v15331_v30  ;;  %v15393_v30 = vld [vmem:[%s18125_s0 + $0x78] sm:$0xff]  }
  0xcf   :  { %13891 = vmatmul.mubr.msk.bf16.vlgmr.msra.gmra.mrb[0].mxu1 %vm158_vm0, %v15333_v31  ;;  %13353 = vmatpush3.bf16.msra.mxu0 %v16202_v4  ;;  %v15369_v4 = vld [vmem:[%s18125_s0 + $0x28] sm:$0xff]  }
  0xd0   :  { %13923 = vmatpush3.bf16.msra.mxu1 %v16207_v5  ;;  %13324 = vmatprep.mubr.msk.bf16.mxu0 %vm158_vm0, %v15335_v32  ;;  %v15371_v5 = vld [vmem:[%s18125_s0 + $0x118] sm:$0xff]   ;;  %v15394_v31 = vld [vmem:[%s18125_s0 + $0x168] sm:$0xff]   ;;  %v15397_v32 = vld [vmem:[%s18125_s0 + $0x80] sm:$0xff]  }
  0xd1   :  { %13894 = vmatprep.mubr.msk.bf16.mxu1 %vm158_vm0, %v15336_v33  ;;  %13354 = vmatprep.subr.bf16.mxu0 %v15343_v34  ;;  %v15398_v33 = vld [vmem:[%s18125_s0 + $0x170] sm:$0xff]  }
  0xd2   :  { %13924 = vmatprep.subr.bf16.mxu1 %v15344_v35 }
  0xd3   :  { %13355 = vmatpush3.bf16.msra.mxu0 %v15343_v34  ;;  %v15399_v34 = vld [vmem:[%s18125_s0 + $0x88] sm:$0xff]  }
  0xd4   :  { %13925 = vmatpush3.bf16.msra.mxu1 %v15344_v35  ;;  %13356 = vmatprep.subr.bf16.mxu0 %v15357_v37  ;;  %v15400_v35 = vld [vmem:[%s18125_s0 + $0x178] sm:$0xff]  }
  0xd5   :  { %13926 = vmatprep.subr.bf16.mxu1 %v15358_v40 }
  0xd6   :  { %13325 = vmatmul.mubr.msk.bf16.gmra.mrb[4].mxu0 %vm158_vm0, %v15337_v36  ;;  %v15401_v36 = vld [vmem:[%s18125_s0 + $0x90] sm:$0xff]  }
  0xd7   :  { %13895 = vmatmul.mubr.msk.bf16.gmra.mrb[4].mxu1 %vm158_vm0, %v15338_v38  ;;  %13328 = vmatprep.mubr.msk.bf16.mxu0 %vm158_vm0, %v15339_v39  ;;  %v15403_v38 = vld [vmem:[%s18125_s0 + $0x98] sm:$0xff]   ;;  %v15404_v39 = vld [vmem:[%s18125_s0 + $0x188] sm:$0xff]  }
  0xd8   :  { %13898 = vmatprep.mubr.msk.bf16.mxu1 %vm158_vm0, %v15340_v41  ;;  %13357 = vmatpush3.bf16.msra.mxu0 %v15357_v37  ;;  %v15402_v37 = vld [vmem:[%s18125_s0 + $0x180] sm:$0xff]   ;;  %v15406_v41 = vld [vmem:[%s18125_s0 + $0x118] sm:$0xff]  }
  0xd9   :  { %13927 = vmatpush3.bf16.msra.mxu1 %v15358_v40  ;;  %13390 = vmatprep.subr.bf16.mxu0 %v16356_v42  ;;  %v15405_v40 = vld [vmem:[%s18125_s0 + $0x28] sm:$0xff]  }
  0xda   :  { %13960 = vmatprep.subr.bf16.mxu1 %v16361_v43 }
  0xde   :  { %13329 = vmatmul.mubr.msk.bf16.gmra.mrb[8].mxu0 %vm158_vm0, %v15341_v44  ;;  %v15411_v44 = vld [vmem:[%s18125_s0 + $0x38] sm:$0xff]  }
  0xdf   :  { %13899 = vmatmul.mubr.msk.bf16.gmra.mrb[8].mxu1 %vm158_vm0, %v15342_v45  ;;  %13332 = vmatprep.mubr.msk.bf16.mxu0 %vm158_vm0, %v15345_v46  ;;  %v15412_v45 = vld [vmem:[%s18125_s0 + $0x128] sm:$0xff]   ;;  %v15419_v46 = vld [vmem:[%s18126_s1 + $0x98] sm:$0xff]  }
  0xe0   :  { %13902 = vmatprep.mubr.msk.bf16.mxu1 %vm158_vm0, %v15346_v47  ;;  %v15420_v47 = vld [vmem:[%s18126_s1 + $0x98] sm:$0xff]  }
  0xe6   :  { %13333 = vmatmul.mubr.msk.bf16.gmra.mrb[12].mxu0 %vm158_vm0, %v15347_v48  ;;  %v15413_v48 = vld [vmem:[%s18125_s0 + $0x40] sm:$0xff]  }
  0xe7   :  { %13903 = vmatmul.mubr.msk.bf16.gmra.mrb[12].mxu1 %vm158_vm0, %v15348_v49  ;;  %13336 = vmatprep.mubr.msk.bf16.mxu0 %vm158_vm0, %v15349_v50  ;;  %v15433_v49 = vld [vmem:[%s18126_s1 + $0xa0] sm:$0xff]   ;;  %v15414_v50 = vld [vmem:[%s18125_s0 + $0x130] sm:$0xff]  }
  0xe8   :  { %13906 = vmatprep.mubr.msk.bf16.mxu1 %vm158_vm0, %v15350_v51  ;;  %v15415_v51 = vld [vmem:[%s18125_s0 + $0x48] sm:$0xff]  }
  0xee   :  { %13337 = vmatmul.mubr.msk.bf16.gmra.mrb[16].mxu0 %vm158_vm0, %v15351_v52  ;;  %v15434_v52 = vld [vmem:[%s18126_s1 + $0xa0] sm:$0xff]  }
  0xef   :  { %13907 = vmatmul.mubr.msk.bf16.gmra.mrb[16].mxu1 %vm158_vm0, %v15352_v53  ;;  %13340 = vmatprep.mubr.msk.bf16.mxu0 %vm158_vm0, %v15353_v54  ;;  %v15416_v53 = vld [vmem:[%s18125_s0 + $0x138] sm:$0xff]   ;;  %v16664_v54 = vld [vmem:[%s18126_s1 + $0xa8] sm:$0xff]  }
  0xf0   :  { %13910 = vmatprep.mubr.msk.bf16.mxu1 %vm158_vm0, %v15354_v55  ;;  %v16669_v55 = vld [vmem:[%s18126_s1 + $0xa8] sm:$0xff]  }
  0xf6   :  { %13341 = vmatmul.mubr.msk.bf16.gmra.mrb[20].mxu0 %vm158_vm0, %v15355_v56  ;;  %v15417_v56 = vld [vmem:[%s18125_s0 + $0x50] sm:$0xff]  }
  0xf7   :  { %13911 = vmatmul.mubr.msk.bf16.gmra.mrb[20].mxu1 %vm158_vm0, %v15356_v57  ;;  %13344 = vmatprep.mubr.msk.bf16.mxu0 %vm158_vm0, %v15359_v58  ;;  %v15418_v57 = vld [vmem:[%s18125_s0 + $0x140] sm:$0xff]   ;;  %v15421_v58 = vld [vmem:[%s18125_s0 + $0x58] sm:$0xff]  }
  0xf8   :  { %13914 = vmatprep.mubr.msk.bf16.mxu1 %vm158_vm0, %v15360_v59  ;;  %v15422_v59 = vld [vmem:[%s18125_s0 + $0x148] sm:$0xff]  }
  0xfe   :  { %13345 = vmatmul.mubr.msk.bf16.gmra.mrb[24].mxu0 %vm158_vm0, %v15361_v60  ;;  %v15423_v60 = vld [vmem:[%s18125_s0 + $0x60] sm:$0xff]  }
  0xff   :  { %13915 = vmatmul.mubr.msk.bf16.gmra.mrb[24].mxu1 %vm158_vm0, %v15362_v61  ;;  %13348 = vmatprep.mubr.msk.bf16.mxu0 %vm158_vm0, %v15363_v62  ;;  %v15424_v61 = vld [vmem:[%s18125_s0 + $0x150] sm:$0xff]   ;;  %v15425_v62 = vld [vmem:[%s18125_s0 + $0x68] sm:$0xff]  }
 0x100   :  { %13918 = vmatprep.mubr.msk.bf16.mxu1 %vm158_vm0, %v15364_v63  ;;  %v15426_v63 = vld [vmem:[%s18125_s0 + $0x158] sm:$0xff]  }
 0x106   :  { %13349 = vmatmul.mubr.msk.bf16.gmra.mrb[28].mxu0 %vm158_vm0, %v15365_v0  ;;  %v15427_v0 = vld [vmem:[%s18125_s0 + $0x70] sm:$0xff]  }
 0x107   :  { %13919 = vmatmul.mubr.msk.bf16.gmra.mrb[28].mxu1 %vm158_vm0, %v15366_v1  ;;  %13358 = vmatprep.mubr.msk.bf16.mxu0 %vm158_vm0, %v15367_v2  ;;  %v15428_v1 = vld [vmem:[%s18125_s0 + $0x160] sm:$0xff]   ;;  %v15429_v2 = vld [vmem:[%s18125_s0 + $0x78] sm:$0xff]  }
 0x108   :  { %13928 = vmatprep.mubr.msk.bf16.mxu1 %vm158_vm0, %v15368_v3  ;;  %v15430_v3 = vld [vmem:[%s18125_s0 + $0x168] sm:$0xff]  }
 0x10e   :  { %13359 = vmatmul.mubr.msk.bf16.vlgmr.msra.gmra.mrb[0].mxu0 %vm158_vm0, %v15369_v4  ;;  %v15431_v4 = vld [vmem:[%s18125_s0 + $0x80] sm:$0xff]  }
 0x10f   :  { %13929 = vmatmul.mubr.msk.bf16.vlgmr.msra.gmra.mrb[0].mxu1 %vm158_vm0, %v15371_v5  ;;  %13391 = vmatpush3.bf16.msra.mxu0 %v16356_v42  ;;  %v15407_v42 = vld [vmem:[%s18125_s0 + $0x30] sm:$0xff]  }
 0x110   :  { %13961 = vmatpush3.bf16.msra.mxu1 %v16361_v43  ;;  %13362 = vmatprep.mubr.msk.bf16.mxu0 %vm158_vm0, %v15373_v6  ;;  %v15409_v43 = vld [vmem:[%s18125_s0 + $0x120] sm:$0xff]   ;;  %v15432_v5 = vld [vmem:[%s18125_s0 + $0x170] sm:$0xff]   ;;  %v15435_v6 = vld [vmem:[%s18125_s0 + $0x88] sm:$0xff]  }
 0x111   :  { %13932 = vmatprep.mubr.msk.bf16.mxu1 %vm158_vm0, %v15374_v7  ;;  %13392 = vmatprep.subr.bf16.mxu0 %v15381_v8  ;;  %v15436_v7 = vld [vmem:[%s18125_s0 + $0x178] sm:$0xff]  }
 0x112   :  { %13962 = vmatprep.subr.bf16.mxu1 %v15382_v9 }
 0x113   :  { %13393 = vmatpush3.bf16.msra.mxu0 %v15381_v8  ;;  %v15437_v8 = vld [vmem:[%s18125_s0 + $0x90] sm:$0xff]  }
 0x114   :  { %13963 = vmatpush3.bf16.msra.mxu1 %v15382_v9  ;;  %13394 = vmatprep.subr.bf16.mxu0 %v15395_v11  ;;  %v15438_v9 = vld [vmem:[%s18125_s0 + $0x180] sm:$0xff]  }
 0x115   :  { %13964 = vmatprep.subr.bf16.mxu1 %v15396_v14 }
 0x116   :  { %13363 = vmatmul.mubr.msk.bf16.gmra.mrb[4].mxu0 %vm158_vm0, %v15375_v10  ;;  %v15439_v10 = vld [vmem:[%s18125_s0 + $0x98] sm:$0xff]  }
 0x117   :  { %13933 = vmatmul.mubr.msk.bf16.gmra.mrb[4].mxu1 %vm158_vm0, %v15376_v12  ;;  %13366 = vmatprep.mubr.msk.bf16.mxu0 %vm158_vm0, %v15377_v13  ;;  %v15441_v12 = vld [vmem:[%s18125_s0 + $0xa0] sm:$0xff]   ;;  %v15442_v13 = vld [vmem:[%s18125_s0 + $0x190] sm:$0xff]  }
 0x118   :  { %13936 = vmatprep.mubr.msk.bf16.mxu1 %vm158_vm0, %v15378_v15  ;;  %13395 = vmatpush3.bf16.msra.mxu0 %v15395_v11  ;;  %v15440_v11 = vld [vmem:[%s18125_s0 + $0x188] sm:$0xff]   ;;  %v15444_v15 = vld [vmem:[%s18125_s0 + $0x120] sm:$0xff]  }
 0x119   :  { %13965 = vmatpush3.bf16.msra.mxu1 %v15396_v14  ;;  %13428 = vmatprep.subr.bf16.mxu0 %v16510_v16  ;;  %v15443_v14 = vld [vmem:[%s18125_s0 + $0x30] sm:$0xff]  }
 0x11a   :  { %13998 = vmatprep.subr.bf16.mxu1 %v16515_v17 }
 0x11e   :  { %13367 = vmatmul.mubr.msk.bf16.gmra.mrb[8].mxu0 %vm158_vm0, %v15379_v18  ;;  %v15449_v18 = vld [vmem:[%s18125_s0 + $0x40] sm:$0xff]  }
 0x11f   :  { %13937 = vmatmul.mubr.msk.bf16.gmra.mrb[8].mxu1 %vm158_vm0, %v15380_v19  ;;  %13370 = vmatprep.mubr.msk.bf16.mxu0 %vm158_vm0, %v15383_v20  ;;  %v15450_v19 = vld [vmem:[%s18125_s0 + $0x130] sm:$0xff]  }
 0x120   :  { %13940 = vmatprep.mubr.msk.bf16.mxu1 %vm158_vm0, %v15384_v21  ;;  %v15457_v20 = vld [vmem:[%s18126_s1 + $0xb0] sm:$0xff]  }
 0x121   :  { %v15458_v21 = vld [vmem:[%s18126_s1 + $0xb0] sm:$0xff]  }
 0x126   :  { %13371 = vmatmul.mubr.msk.bf16.gmra.mrb[12].mxu0 %vm158_vm0, %v15385_v22  ;;  %v15451_v22 = vld [vmem:[%s18125_s0 + $0x48] sm:$0xff]  }
 0x127   :  { %13941 = vmatmul.mubr.msk.bf16.gmra.mrb[12].mxu1 %vm158_vm0, %v15386_v23  ;;  %13374 = vmatprep.mubr.msk.bf16.mxu0 %vm158_vm0, %v15387_v24  ;;  %v15471_v23 = vld [vmem:[%s18126_s1 + $0xb8] sm:$0xff]  }
 0x128   :  { %13944 = vmatprep.mubr.msk.bf16.mxu1 %vm158_vm0, %v15388_v25  ;;  %v15452_v24 = vld [vmem:[%s18125_s0 + $0x138] sm:$0xff]   ;;  %v15453_v25 = vld [vmem:[%s18125_s0 + $0x50] sm:$0xff]  }
 0x12e   :  { %13375 = vmatmul.mubr.msk.bf16.gmra.mrb[16].mxu0 %vm158_vm0, %v15389_v26  ;;  %v15472_v26 = vld [vmem:[%s18126_s1 + $0xb8] sm:$0xff]  }
 0x12f   :  { %13945 = vmatmul.mubr.msk.bf16.gmra.mrb[16].mxu1 %vm158_vm0, %v15390_v27  ;;  %13378 = vmatprep.mubr.msk.bf16.mxu0 %vm158_vm0, %v15391_v28  ;;  %v15454_v27 = vld [vmem:[%s18125_s0 + $0x140] sm:$0xff]  }
 0x130   :  { %13948 = vmatprep.mubr.msk.bf16.mxu1 %vm158_vm0, %v15392_v29  ;;  %v16818_v28 = vld [vmem:[%s18126_s1 + $0xc0] sm:$0xff]  }
 0x131   :  { %v16823_v29 = vld [vmem:[%s18126_s1 + $0xc0] sm:$0xff]  }
 0x136   :  { %13379 = vmatmul.mubr.msk.bf16.gmra.mrb[20].mxu0 %vm158_vm0, %v15393_v30  ;;  %v15455_v30 = vld [vmem:[%s18125_s0 + $0x58] sm:$0xff]  }
 0x137   :  { %13949 = vmatmul.mubr.msk.bf16.gmra.mrb[20].mxu1 %vm158_vm0, %v15394_v31  ;;  %13382 = vmatprep.mubr.msk.bf16.mxu0 %vm158_vm0, %v15397_v32  ;;  %v15456_v31 = vld [vmem:[%s18125_s0 + $0x148] sm:$0xff]   ;;  %v15459_v32 = vld [vmem:[%s18125_s0 + $0x60] sm:$0xff]  }
 0x138   :  { %13952 = vmatprep.mubr.msk.bf16.mxu1 %vm158_vm0, %v15398_v33  ;;  %v15460_v33 = vld [vmem:[%s18125_s0 + $0x150] sm:$0xff]  }
 0x13e   :  { %13383 = vmatmul.mubr.msk.bf16.gmra.mrb[24].mxu0 %vm158_vm0, %v15399_v34  ;;  %v15461_v34 = vld [vmem:[%s18125_s0 + $0x68] sm:$0xff]  }
 0x13f   :  { %13953 = vmatmul.mubr.msk.bf16.gmra.mrb[24].mxu1 %vm158_vm0, %v15400_v35  ;;  %13386 = vmatprep.mubr.msk.bf16.mxu0 %vm158_vm0, %v15401_v36  ;;  %v15462_v35 = vld [vmem:[%s18125_s0 + $0x158] sm:$0xff]   ;;  %v15463_v36 = vld [vmem:[%s18125_s0 + $0x70] sm:$0xff]  }
 0x140   :  { %13956 = vmatprep.mubr.msk.bf16.mxu1 %vm158_vm0, %v15402_v37  ;;  %v15464_v37 = vld [vmem:[%s18125_s0 + $0x160] sm:$0xff]  }
 0x146   :  { %13387 = vmatmul.mubr.msk.bf16.gmra.mrb[28].mxu0 %vm158_vm0, %v15403_v38  ;;  %v15465_v38 = vld [vmem:[%s18125_s0 + $0x78] sm:$0xff]  }
 0x147   :  { %13957 = vmatmul.mubr.msk.bf16.gmra.mrb[28].mxu1 %vm158_vm0, %v15404_v39  ;;  %13396 = vmatprep.mubr.msk.bf16.mxu0 %vm158_vm0, %v15405_v40  ;;  %v15466_v39 = vld [vmem:[%s18125_s0 + $0x168] sm:$0xff]   ;;  %v15467_v40 = vld [vmem:[%s18125_s0 + $0x80] sm:$0xff]  }
 0x148   :  { %13966 = vmatprep.mubr.msk.bf16.mxu1 %vm158_vm0, %v15406_v41  ;;  %v15468_v41 = vld [vmem:[%s18125_s0 + $0x170] sm:$0xff]  }
 0x14e   :  { %13397 = vmatmul.mubr.msk.bf16.vlgmr.msra.gmra.mrb[0].mxu0 %vm158_vm0, %v15407_v42  ;;  %v15469_v42 = vld [vmem:[%s18125_s0 + $0x88] sm:$0xff]  }
 0x14f   :  { %13967 = vmatmul.mubr.msk.bf16.vlgmr.msra.gmra.mrb[0].mxu1 %vm158_vm0, %v15409_v43  ;;  %13429 = vmatpush3.bf16.msra.mxu0 %v16510_v16  ;;  %v15445_v16 = vld [vmem:[%s18125_s0 + $0x38] sm:$0xff]  }
 0x150   :  { %13999 = vmatpush3.bf16.msra.mxu1 %v16515_v17  ;;  %13400 = vmatprep.mubr.msk.bf16.mxu0 %vm158_vm0, %v15411_v44  ;;  %v15447_v17 = vld [vmem:[%s18125_s0 + $0x128] sm:$0xff]   ;;  %v15470_v43 = vld [vmem:[%s18125_s0 + $0x178] sm:$0xff]   ;;  %v15473_v44 = vld [vmem:[%s18125_s0 + $0x90] sm:$0xff]  }
 0x151   :  { %13970 = vmatprep.mubr.msk.bf16.mxu1 %vm158_vm0, %v15412_v45  ;;  %13430 = vmatprep.subr.bf16.mxu0 %v15419_v46  ;;  %v15474_v45 = vld [vmem:[%s18125_s0 + $0x180] sm:$0xff]  }
 0x152   :  { %14000 = vmatprep.subr.bf16.mxu1 %v15420_v47 }
 0x153   :  { %13431 = vmatpush3.bf16.msra.mxu0 %v15419_v46  ;;  %v15475_v46 = vld [vmem:[%s18125_s0 + $0x98] sm:$0xff]  }
 0x154   :  { %14001 = vmatpush3.bf16.msra.mxu1 %v15420_v47  ;;  %13432 = vmatprep.subr.bf16.mxu0 %v15433_v49  ;;  %v15476_v47 = vld [vmem:[%s18125_s0 + $0x188] sm:$0xff]  }
 0x155   :  { %14002 = vmatprep.subr.bf16.mxu1 %v15434_v52 }
 0x156   :  { %13401 = vmatmul.mubr.msk.bf16.gmra.mrb[4].mxu0 %vm158_vm0, %v15413_v48  ;;  %v15477_v48 = vld [vmem:[%s18125_s0 + $0xa0] sm:$0xff]  }
 0x157   :  { %13971 = vmatmul.mubr.msk.bf16.gmra.mrb[4].mxu1 %vm158_vm0, %v15414_v50  ;;  %13404 = vmatprep.mubr.msk.bf16.mxu0 %vm158_vm0, %v15415_v51  ;;  %v15479_v50 = vld [vmem:[%s18125_s0 + $0xa8] sm:$0xff]   ;;  %v15480_v51 = vld [vmem:[%s18125_s0 + $0x198] sm:$0xff]  }
 0x158   :  { %13974 = vmatprep.mubr.msk.bf16.mxu1 %vm158_vm0, %v15416_v53  ;;  %13433 = vmatpush3.bf16.msra.mxu0 %v15433_v49  ;;  %v15478_v49 = vld [vmem:[%s18125_s0 + $0x190] sm:$0xff]   ;;  %v15482_v53 = vld [vmem:[%s18125_s0 + $0x128] sm:$0xff]  }
 0x159   :  { %14003 = vmatpush3.bf16.msra.mxu1 %v15434_v52  ;;  %13466 = vmatprep.subr.bf16.mxu0 %v16664_v54  ;;  %v15481_v52 = vld [vmem:[%s18125_s0 + $0x38] sm:$0xff]  }
 0x15a   :  { %14036 = vmatprep.subr.bf16.mxu1 %v16669_v55 }
 0x15e   :  { %13405 = vmatmul.mubr.msk.bf16.gmra.mrb[8].mxu0 %vm158_vm0, %v15417_v56  ;;  %v15487_v56 = vld [vmem:[%s18125_s0 + $0x48] sm:$0xff]  }
 0x15f   :  { %13975 = vmatmul.mubr.msk.bf16.gmra.mrb[8].mxu1 %vm158_vm0, %v15418_v57  ;;  %13408 = vmatprep.mubr.msk.bf16.mxu0 %vm158_vm0, %v15421_v58  ;;  %v15488_v57 = vld [vmem:[%s18125_s0 + $0x138] sm:$0xff]   ;;  %v15495_v58 = vld [vmem:[%s18126_s1 + $0xc8] sm:$0xff]  }
 0x160   :  { %13978 = vmatprep.mubr.msk.bf16.mxu1 %vm158_vm0, %v15422_v59  ;;  %v15496_v59 = vld [vmem:[%s18126_s1 + $0xc8] sm:$0xff]  }
 0x166   :  { %13409 = vmatmul.mubr.msk.bf16.gmra.mrb[12].mxu0 %vm158_vm0, %v15423_v60  ;;  %v15489_v60 = vld [vmem:[%s18125_s0 + $0x50] sm:$0xff]  }
 0x167   :  { %13979 = vmatmul.mubr.msk.bf16.gmra.mrb[12].mxu1 %vm158_vm0, %v15424_v61  ;;  %13412 = vmatprep.mubr.msk.bf16.mxu0 %vm158_vm0, %v15425_v62  ;;  %v15509_v61 = vld [vmem:[%s18126_s1 + $0xd0] sm:$0xff]   ;;  %v15490_v62 = vld [vmem:[%s18125_s0 + $0x140] sm:$0xff]  }
 0x168   :  { %13982 = vmatprep.mubr.msk.bf16.mxu1 %vm158_vm0, %v15426_v63  ;;  %v15491_v63 = vld [vmem:[%s18125_s0 + $0x58] sm:$0xff]  }
 0x16e   :  { %13413 = vmatmul.mubr.msk.bf16.gmra.mrb[16].mxu0 %vm158_vm0, %v15427_v0  ;;  %v15510_v0 = vld [vmem:[%s18126_s1 + $0xd0] sm:$0xff]  }
 0x16f   :  { %13983 = vmatmul.mubr.msk.bf16.gmra.mrb[16].mxu1 %vm158_vm0, %v15428_v1  ;;  %13416 = vmatprep.mubr.msk.bf16.mxu0 %vm158_vm0, %v15429_v2  ;;  %v15492_v1 = vld [vmem:[%s18125_s0 + $0x148] sm:$0xff]   ;;  %v16972_v2 = vld [vmem:[%s18126_s1 + $0xd8] sm:$0xff]  }
 0x170   :  { %13986 = vmatprep.mubr.msk.bf16.mxu1 %vm158_vm0, %v15430_v3 }
 0x176   :  { %13417 = vmatmul.mubr.msk.bf16.gmra.mrb[20].mxu0 %vm158_vm0, %v15431_v4 }
 0x177   :  { %13987 = vmatmul.mubr.msk.bf16.gmra.mrb[20].mxu1 %vm158_vm0, %v15432_v5  ;;  %13420 = vmatprep.mubr.msk.bf16.mxu0 %vm158_vm0, %v15435_v6 }
 0x178   :  { %13990 = vmatprep.mubr.msk.bf16.mxu1 %vm158_vm0, %v15436_v7 }
 0x17e   :  { %13421 = vmatmul.mubr.msk.bf16.gmra.mrb[24].mxu0 %vm158_vm0, %v15437_v8 }
 0x17f   :  { %13991 = vmatmul.mubr.msk.bf16.gmra.mrb[24].mxu1 %vm158_vm0, %v15438_v9  ;;  %13424 = vmatprep.mubr.msk.bf16.mxu0 %vm158_vm0, %v15439_v10 }
 0x180   :  { %13994 = vmatprep.mubr.msk.bf16.mxu1 %vm158_vm0, %v15440_v11 }
 0x186   :  { %13425 = vmatmul.mubr.msk.bf16.gmra.mrb[28].mxu0 %vm158_vm0, %v15441_v12 }
 0x187   :  { %13995 = vmatmul.mubr.msk.bf16.gmra.mrb[28].mxu1 %vm158_vm0, %v15442_v13  ;;  %13434 = vmatprep.mubr.msk.bf16.mxu0 %vm158_vm0, %v15443_v14 }
 0x188   :  { %14004 = vmatprep.mubr.msk.bf16.mxu1 %vm158_vm0, %v15444_v15 }
 0x18e   :  { %13435 = vmatmul.mubr.msk.bf16.vlgmr.msra.gmra.mrb[0].mxu0 %vm158_vm0, %v15445_v16 }
 0x18f   :  { %14005 = vmatmul.mubr.msk.bf16.vlgmr.msra.gmra.mrb[0].mxu1 %vm158_vm0, %v15447_v17  ;;  %13467 = vmatpush3.bf16.msra.mxu0 %v16664_v54  ;;  %v15483_v54 = vld [vmem:[%s18125_s0 + $0x40] sm:$0xff]  }
 0x190   :  { %14037 = vmatpush3.bf16.msra.mxu1 %v16669_v55  ;;  %13438 = vmatprep.mubr.msk.bf16.mxu0 %vm158_vm0, %v15449_v18  ;;  %v15485_v55 = vld [vmem:[%s18125_s0 + $0x130] sm:$0xff]  }
 0x191   :  { %14008 = vmatprep.mubr.msk.bf16.mxu1 %vm158_vm0, %v15450_v19  ;;  %13468 = vmatprep.subr.bf16.mxu0 %v15457_v20 }
 0x192   :  { %14038 = vmatprep.subr.bf16.mxu1 %v15458_v21 }
 0x193   :  { %13469 = vmatpush3.bf16.msra.mxu0 %v15457_v20 }
 0x194   :  { %14039 = vmatpush3.bf16.msra.mxu1 %v15458_v21  ;;  %13470 = vmatprep.subr.bf16.mxu0 %v15471_v23 }
 0x195   :  { %14040 = vmatprep.subr.bf16.mxu1 %v15472_v26 }
 0x196   :  { %13439 = vmatmul.mubr.msk.bf16.gmra.mrb[4].mxu0 %vm158_vm0, %v15451_v22 }
 0x197   :  { %14009 = vmatmul.mubr.msk.bf16.gmra.mrb[4].mxu1 %vm158_vm0, %v15452_v24  ;;  %13442 = vmatprep.mubr.msk.bf16.mxu0 %vm158_vm0, %v15453_v25 }
 0x198   :  { %14012 = vmatprep.mubr.msk.bf16.mxu1 %vm158_vm0, %v15454_v27  ;;  %13471 = vmatpush3.bf16.msra.mxu0 %v15471_v23 }
 0x199   :  { %14041 = vmatpush3.bf16.msra.mxu1 %v15472_v26  ;;  %13504 = vmatprep.subr.bf16.mxu0 %v16818_v28 }
 0x19a   :  { %14074 = vmatprep.subr.bf16.mxu1 %v16823_v29 }
 0x19e   :  { %13443 = vmatmul.mubr.msk.bf16.gmra.mrb[8].mxu0 %vm158_vm0, %v15455_v30 }
 0x19f   :  { %14013 = vmatmul.mubr.msk.bf16.gmra.mrb[8].mxu1 %vm158_vm0, %v15456_v31  ;;  %13446 = vmatprep.mubr.msk.bf16.mxu0 %vm158_vm0, %v15459_v32 }
 0x1a0   :  { %14016 = vmatprep.mubr.msk.bf16.mxu1 %vm158_vm0, %v15460_v33 }
 0x1a6   :  { %13447 = vmatmul.mubr.msk.bf16.gmra.mrb[12].mxu0 %vm158_vm0, %v15461_v34 }
 0x1a7   :  { %14017 = vmatmul.mubr.msk.bf16.gmra.mrb[12].mxu1 %vm158_vm0, %v15462_v35  ;;  %13450 = vmatprep.mubr.msk.bf16.mxu0 %vm158_vm0, %v15463_v36 }
 0x1a8   :  { %14020 = vmatprep.mubr.msk.bf16.mxu1 %vm158_vm0, %v15464_v37 }
 0x1ae   :  { %13451 = vmatmul.mubr.msk.bf16.gmra.mrb[16].mxu0 %vm158_vm0, %v15465_v38 }
 0x1af   :  { %14021 = vmatmul.mubr.msk.bf16.gmra.mrb[16].mxu1 %vm158_vm0, %v15466_v39  ;;  %13454 = vmatprep.mubr.msk.bf16.mxu0 %vm158_vm0, %v15467_v40 }
 0x1b0   :  { %14024 = vmatprep.mubr.msk.bf16.mxu1 %vm158_vm0, %v15468_v41 }
 0x1b6   :  { %13455 = vmatmul.mubr.msk.bf16.gmra.mrb[20].mxu0 %vm158_vm0, %v15469_v42 }
 0x1b7   :  { %14025 = vmatmul.mubr.msk.bf16.gmra.mrb[20].mxu1 %vm158_vm0, %v15470_v43  ;;  %13458 = vmatprep.mubr.msk.bf16.mxu0 %vm158_vm0, %v15473_v44 }
 0x1b8   :  { %14028 = vmatprep.mubr.msk.bf16.mxu1 %vm158_vm0, %v15474_v45 }
 0x1be   :  { %13459 = vmatmul.mubr.msk.bf16.gmra.mrb[24].mxu0 %vm158_vm0, %v15475_v46 }
 0x1bf   :  { %14029 = vmatmul.mubr.msk.bf16.gmra.mrb[24].mxu1 %vm158_vm0, %v15476_v47  ;;  %13462 = vmatprep.mubr.msk.bf16.mxu0 %vm158_vm0, %v15477_v48 }
 0x1c0   :  { %14032 = vmatprep.mubr.msk.bf16.mxu1 %vm158_vm0, %v15478_v49 }
 0x1c6   :  { %13463 = vmatmul.mubr.msk.bf16.gmra.mrb[28].mxu0 %vm158_vm0, %v15479_v50 }
 0x1c7   :  { %14033 = vmatmul.mubr.msk.bf16.gmra.mrb[28].mxu1 %vm158_vm0, %v15480_v51  ;;  %13472 = vmatprep.mubr.msk.bf16.mxu0 %vm158_vm0, %v15481_v52 }
 0x1c8   :  { %14042 = vmatprep.mubr.msk.bf16.mxu1 %vm158_vm0, %v15482_v53 }
 0x1ce   :  { %13473 = vmatmul.mubr.msk.bf16.vlgmr.msra.gmra.mrb[0].mxu0 %vm158_vm0, %v15483_v54 }
 0x1cf   :  { %14043 = vmatmul.mubr.msk.bf16.vlgmr.msra.gmra.mrb[0].mxu1 %vm158_vm0, %v15485_v55  ;;  %13505 = vmatpush3.bf16.msra.mxu0 %v16818_v28 }
 0x1d0   :  { %14075 = vmatpush3.bf16.msra.mxu1 %v16823_v29  ;;  %13476 = vmatprep.mubr.msk.bf16.mxu0 %vm158_vm0, %v15487_v56 }
 0x1d1   :  { %14046 = vmatprep.mubr.msk.bf16.mxu1 %vm158_vm0, %v15488_v57  ;;  %13506 = vmatprep.subr.bf16.mxu0 %v15495_v58 }
 0x1d2   :  { %14076 = vmatprep.subr.bf16.mxu1 %v15496_v59 }
 0x1d3   :  { %13507 = vmatpush3.bf16.msra.mxu0 %v15495_v58 }
 0x1d4   :  { %14077 = vmatpush3.bf16.msra.mxu1 %v15496_v59  ;;  %13508 = vmatprep.subr.bf16.mxu0 %v15509_v61 }
 0x1d5   :  { %14078 = vmatprep.subr.bf16.mxu1 %v15510_v0 }
 0x1d6   :  { %7 = vsyncpa [#allocation3], 0  ;;  %13477 = vmatmul.mubr.msk.bf16.gmra.mrb[4].mxu0 %vm158_vm0, %v15489_v60  ;;  %v16978_v3 = vld [vmem:[%s18126_s1 + $0xd8] sm:$0xff]   ;;  %v15493_v4 = vld [vmem:[%s18125_s0 + $0x60] sm:$0xff]  }
 0x1d7   :  { %14047 = vmatmul.mubr.msk.bf16.gmra.mrb[4].mxu1 %vm158_vm0, %v15490_v62  ;;  %13480 = vmatprep.mubr.msk.bf16.mxu0 %vm158_vm0, %v15491_v63  ;;  %v15494_v5 = vld [vmem:[%s18125_s0 + $0x150] sm:$0xff]   ;;  %v15497_v6 = vld [vmem:[%s18125_s0 + $0x68] sm:$0xff]   ;;  %v15498_v7 = vld [vmem:[%s18125_s0 + $0x158] sm:$0xff]  }
 0x1d8   :  { %14050 = vmatprep.mubr.msk.bf16.mxu1 %vm158_vm0, %v15492_v1  ;;  %13509 = vmatpush3.bf16.msra.mxu0 %v15509_v61  ;;  %v15499_v8 = vld [vmem:[%s18125_s0 + $0x70] sm:$0xff]   ;;  %v15500_v9 = vld [vmem:[%s18125_s0 + $0x160] sm:$0xff]   ;;  %v15501_v10 = vld [vmem:[%s18125_s0 + $0x78] sm:$0xff]  }
 0x1d9   :  { %14079 = vmatpush3.bf16.msra.mxu1 %v15510_v0  ;;  %13542 = vmatprep.subr.bf16.mxu0 %v16972_v2  ;;  %v15502_v11 = vld [vmem:[%s18125_s0 + $0x168] sm:$0xff]   ;;  %v15503_v12 = vld [vmem:[%s18125_s0 + $0x80] sm:$0xff]   ;;  %v15504_v13 = vld [vmem:[%s18125_s0 + $0x170] sm:$0xff]  }
 0x1da   :  { %14112 = vmatprep.subr.bf16.mxu1 %v16978_v3  ;;  %v15505_v14 = vld [vmem:[%s18125_s0 + $0x88] sm:$0xff]   ;;  %v15506_v15 = vld [vmem:[%s18125_s0 + $0x178] sm:$0xff]   ;;  %v15507_v16 = vld [vmem:[%s18125_s0 + $0x90] sm:$0xff]  }
 0x1db   :  { %v15508_v17 = vld [vmem:[%s18125_s0 + $0x180] sm:$0xff]   ;;  %v15511_v18 = vld [vmem:[%s18125_s0 + $0x98] sm:$0xff]   ;;  %v15512_v19 = vld [vmem:[%s18125_s0 + $0x188] sm:$0xff]  }
 0x1dc   :  { %v15513_v20 = vld [vmem:[%s18125_s0 + $0xa0] sm:$0xff]   ;;  %v15514_v21 = vld [vmem:[%s18125_s0 + $0x190] sm:$0xff]   ;;  %v15515_v22 = vld [vmem:[%s18125_s0 + $0xa8] sm:$0xff]  }
 0x1dd   :  { %v15516_v23 = vld [vmem:[%s18125_s0 + $0x198] sm:$0xff]   ;;  %v15517_v24 = vld [vmem:[%s18125_s0 + $0xb0] sm:$0xff]   ;;  %v15518_v25 = vld [vmem:[%s18125_s0 + $0x1a0] sm:$0xff]  }
 0x1de   :  { %13481 = vmatmul.mubr.msk.bf16.gmra.mrb[8].mxu0 %vm158_vm0, %v15493_v4  ;;  %v15519_v26 = vld [vmem:[%s18125_s0 + $0x40] sm:$0xff]   ;;  %v15520_v27 = vld [vmem:[%s18125_s0 + $0x130] sm:$0xff]   ;;  %v15521_v28 = vld [vmem:[%s18125_s0 + $0x48] sm:$0xff]  }
 0x1df   :  { %14051 = vmatmul.mubr.msk.bf16.gmra.mrb[8].mxu1 %vm158_vm0, %v15494_v5  ;;  %13484 = vmatprep.mubr.msk.bf16.mxu0 %vm158_vm0, %v15497_v6  ;;  %v15523_v29 = vld [vmem:[%s18125_s0 + $0x138] sm:$0xff]   ;;  %v15525_v30 = vld [vmem:[%s18125_s0 + $0x50] sm:$0xff]   ;;  %v15526_v31 = vld [vmem:[%s18125_s0 + $0x140] sm:$0xff]  }
 0x1e0   :  { %14054 = vmatprep.mubr.msk.bf16.mxu1 %vm158_vm0, %v15498_v7  ;;  %v15533_v32 = vld [vmem:[%s18126_s1 + $0xe0] sm:$0xff]   ;;  %v15547_v34 = vld [vmem:[%s18126_s1 + $0xe8] sm:$0xff]   ;;  %v15527_v36 = vld [vmem:[%s18125_s0 + $0x58] sm:$0xff]  }
 0x1e1   :  { %v15534_v33 = vld [vmem:[%s18126_s1 + $0xe0] sm:$0xff]   ;;  %v15548_v35 = vld [vmem:[%s18126_s1 + $0xe8] sm:$0xff]   ;;  %v15530_v39 = vld [vmem:[%s18125_s0 + $0x150] sm:$0xff]  }
 0x1e2   :  { %v15528_v37 = vld [vmem:[%s18125_s0 + $0x148] sm:$0xff]   ;;  %v15529_v38 = vld [vmem:[%s18125_s0 + $0x60] sm:$0xff]   ;;  %v17126_v40 = vld [vmem:[%s18126_s1 + $0xf0] sm:$0xff]  }
 0x1e3   :  { %v17132_v41 = vld [vmem:[%s18126_s1 + $0xf0] sm:$0xff]   ;;  %v15531_v42 = vld [vmem:[%s18125_s0 + $0x68] sm:$0xff]   ;;  %v15532_v43 = vld [vmem:[%s18125_s0 + $0x158] sm:$0xff]  }
 0x1e4   :  { %v15535_v44 = vld [vmem:[%s18125_s0 + $0x70] sm:$0xff]   ;;  %v15536_v45 = vld [vmem:[%s18125_s0 + $0x160] sm:$0xff]   ;;  %v15537_v46 = vld [vmem:[%s18125_s0 + $0x78] sm:$0xff]  }
 0x1e5   :  { %v15538_v47 = vld [vmem:[%s18125_s0 + $0x168] sm:$0xff]   ;;  %v15539_v48 = vld [vmem:[%s18125_s0 + $0x80] sm:$0xff]   ;;  %v15540_v49 = vld [vmem:[%s18125_s0 + $0x170] sm:$0xff]  }
 0x1e6   :  { %13485 = vmatmul.mubr.msk.bf16.gmra.mrb[12].mxu0 %vm158_vm0, %v15499_v8  ;;  %v15541_v50 = vld [vmem:[%s18125_s0 + $0x88] sm:$0xff]   ;;  %v15542_v51 = vld [vmem:[%s18125_s0 + $0x178] sm:$0xff]   ;;  %v15543_v52 = vld [vmem:[%s18125_s0 + $0x90] sm:$0xff]  }
 0x1e7   :  { %14055 = vmatmul.mubr.msk.bf16.gmra.mrb[12].mxu1 %vm158_vm0, %v15500_v9  ;;  %13488 = vmatprep.mubr.msk.bf16.mxu0 %vm158_vm0, %v15501_v10  ;;  %v15544_v53 = vld [vmem:[%s18125_s0 + $0x180] sm:$0xff]   ;;  %v15545_v54 = vld [vmem:[%s18125_s0 + $0x98] sm:$0xff]   ;;  %v15546_v55 = vld [vmem:[%s18125_s0 + $0x188] sm:$0xff]  }
 0x1e8   :  { %14058 = vmatprep.mubr.msk.bf16.mxu1 %vm158_vm0, %v15502_v11  ;;  %v15549_v56 = vld [vmem:[%s18125_s0 + $0xa0] sm:$0xff]   ;;  %v15550_v57 = vld [vmem:[%s18125_s0 + $0x190] sm:$0xff]   ;;  %v15551_v58 = vld [vmem:[%s18125_s0 + $0xa8] sm:$0xff]  }
 0x1e9   :  { %v15552_v59 = vld [vmem:[%s18125_s0 + $0x198] sm:$0xff]   ;;  %v15553_v60 = vld [vmem:[%s18125_s0 + $0xb0] sm:$0xff]   ;;  %v15554_v61 = vld [vmem:[%s18125_s0 + $0x1a0] sm:$0xff]  }
 0x1ea   :  { %v15555_v62 = vld [vmem:[%s18125_s0 + $0xb8] sm:$0xff]   ;;  %v15556_v63 = vld [vmem:[%s18125_s0 + $0x1a8] sm:$0xff]   ;;  %v15585_v8 = vld [vmem:[%s18126_s1 + $0x100] sm:$0xff]  }
 0x1eb   :  { %v15557_v0 = vld [vmem:[%s18125_s0 + $0x48] sm:$0xff]   ;;  %v15558_v1 = vld [vmem:[%s18125_s0 + $0x138] sm:$0xff]   ;;  %v15586_v9 = vld [vmem:[%s18126_s1 + $0x100] sm:$0xff]  }
 0x1ec   :  { %v15563_v4 = vld [vmem:[%s18125_s0 + $0x58] sm:$0xff]   ;;  %v15564_v5 = vld [vmem:[%s18125_s0 + $0x148] sm:$0xff]   ;;  %v15565_v10 = vld [vmem:[%s18125_s0 + $0x60] sm:$0xff]  }
 0x1ed   :  { %v15571_v6 = vld [vmem:[%s18126_s1 + $0xf8] sm:$0xff]   ;;  %v15566_v11 = vld [vmem:[%s18125_s0 + $0x150] sm:$0xff]  }
 0x1ee   :  { %13489 = vmatmul.mubr.msk.bf16.gmra.mrb[16].mxu0 %vm158_vm0, %v15503_v12  ;;  %v15572_v7 = vld [vmem:[%s18126_s1 + $0xf8] sm:$0xff]   ;;  %v15567_v12 = vld [vmem:[%s18125_s0 + $0x68] sm:$0xff]  }
 0x1ef   :  { %14059 = vmatmul.mubr.msk.bf16.gmra.mrb[16].mxu1 %vm158_vm0, %v15504_v13  ;;  %13492 = vmatprep.mubr.msk.bf16.mxu0 %vm158_vm0, %v15505_v14  ;;  %v15568_v13 = vld [vmem:[%s18125_s0 + $0x158] sm:$0xff]   ;;  %v17280_v14 = vld [vmem:[%s18126_s1 + $0x108] sm:$0xff]  }
 0x1f0   :  { %14062 = vmatprep.mubr.msk.bf16.mxu1 %vm158_vm0, %v15506_v15  ;;  %v17286_v15 = vld [vmem:[%s18126_s1 + $0x108] sm:$0xff]  }
 0x1f6   :  { %13493 = vmatmul.mubr.msk.bf16.gmra.mrb[20].mxu0 %vm158_vm0, %v15507_v16  ;;  %v15569_v16 = vld [vmem:[%s18125_s0 + $0x70] sm:$0xff]  }
 0x1f7   :  { %14063 = vmatmul.mubr.msk.bf16.gmra.mrb[20].mxu1 %vm158_vm0, %v15508_v17  ;;  %13496 = vmatprep.mubr.msk.bf16.mxu0 %vm158_vm0, %v15511_v18  ;;  %v15570_v17 = vld [vmem:[%s18125_s0 + $0x160] sm:$0xff]   ;;  %v15573_v18 = vld [vmem:[%s18125_s0 + $0x78] sm:$0xff]  }
 0x1f8   :  { %14066 = vmatprep.mubr.msk.bf16.mxu1 %vm158_vm0, %v15512_v19  ;;  %v15574_v19 = vld [vmem:[%s18125_s0 + $0x168] sm:$0xff]  }
 0x1fe   :  { %13497 = vmatmul.mubr.msk.bf16.gmra.mrb[24].mxu0 %vm158_vm0, %v15513_v20  ;;  %v15575_v20 = vld [vmem:[%s18125_s0 + $0x80] sm:$0xff]  }
 0x1ff   :  { %14067 = vmatmul.mubr.msk.bf16.gmra.mrb[24].mxu1 %vm158_vm0, %v15514_v21  ;;  %13500 = vmatprep.mubr.msk.bf16.mxu0 %vm158_vm0, %v15515_v22  ;;  %v15576_v21 = vld [vmem:[%s18125_s0 + $0x170] sm:$0xff]   ;;  %v15577_v22 = vld [vmem:[%s18125_s0 + $0x88] sm:$0xff]  }
 0x200   :  { %14070 = vmatprep.mubr.msk.bf16.mxu1 %vm158_vm0, %v15516_v23  ;;  %v15578_v23 = vld [vmem:[%s18125_s0 + $0x178] sm:$0xff]  }
 0x206   :  { %13501 = vmatmul.mubr.msk.bf16.gmra.mrb[28].mxu0 %vm158_vm0, %v15517_v24  ;;  %v15579_v24 = vld [vmem:[%s18125_s0 + $0x90] sm:$0xff]  }
 0x207   :  { %14071 = vmatmul.mubr.msk.bf16.gmra.mrb[28].mxu1 %vm158_vm0, %v15518_v25  ;;  %13510 = vmatprep.mubr.msk.bf16.mxu0 %vm158_vm0, %v15519_v26  ;;  %v15580_v25 = vld [vmem:[%s18125_s0 + $0x180] sm:$0xff]   ;;  %v15581_v26 = vld [vmem:[%s18125_s0 + $0x98] sm:$0xff]  }
 0x208   :  { %14080 = vmatprep.mubr.msk.bf16.mxu1 %vm158_vm0, %v15520_v27  ;;  %v15582_v27 = vld [vmem:[%s18125_s0 + $0x188] sm:$0xff]  }
 0x20e   :  { %13511 = vmatmul.mubr.msk.bf16.vlgmr.msra.gmra.mrb[0].mxu0 %vm158_vm0, %v15521_v28  ;;  %v15583_v28 = vld [vmem:[%s18125_s0 + $0xa0] sm:$0xff]  }
 0x20f   :  { %14081 = vmatmul.mubr.msk.bf16.vlgmr.msra.gmra.mrb[0].mxu1 %vm158_vm0, %v15523_v29  ;;  %13543 = vmatpush3.bf16.msra.mxu0 %v16972_v2  ;;  %v15559_v2 = vld [vmem:[%s18125_s0 + $0x50] sm:$0xff]  }
 0x210   :  { %14113 = vmatpush3.bf16.msra.mxu1 %v16978_v3  ;;  %13514 = vmatprep.mubr.msk.bf16.mxu0 %vm158_vm0, %v15525_v30  ;;  %v15561_v3 = vld [vmem:[%s18125_s0 + $0x140] sm:$0xff]   ;;  %v15584_v29 = vld [vmem:[%s18125_s0 + $0x190] sm:$0xff]   ;;  %v15587_v30 = vld [vmem:[%s18125_s0 + $0xa8] sm:$0xff]  }
 0x211   :  { %14084 = vmatprep.mubr.msk.bf16.mxu1 %vm158_vm0, %v15526_v31  ;;  %13544 = vmatprep.subr.bf16.mxu0 %v15533_v32  ;;  %v15588_v31 = vld [vmem:[%s18125_s0 + $0x198] sm:$0xff]  }
 0x212   :  { %14114 = vmatprep.subr.bf16.mxu1 %v15534_v33 }
 0x213   :  { %13545 = vmatpush3.bf16.msra.mxu0 %v15533_v32  ;;  %v15589_v32 = vld [vmem:[%s18125_s0 + $0xb0] sm:$0xff]  }
 0x214   :  { %14115 = vmatpush3.bf16.msra.mxu1 %v15534_v33  ;;  %13546 = vmatprep.subr.bf16.mxu0 %v15547_v34  ;;  %v15590_v33 = vld [vmem:[%s18125_s0 + $0x1a0] sm:$0xff]  }
 0x215   :  { %14116 = vmatprep.subr.bf16.mxu1 %v15548_v35 }
 0x216   :  { %13515 = vmatmul.mubr.msk.bf16.gmra.mrb[4].mxu0 %vm158_vm0, %v15527_v36  ;;  %v15593_v36 = vld [vmem:[%s18125_s0 + $0xc0] sm:$0xff]  }
 0x217   :  { %14085 = vmatmul.mubr.msk.bf16.gmra.mrb[4].mxu1 %vm158_vm0, %v15528_v37  ;;  %13518 = vmatprep.mubr.msk.bf16.mxu0 %vm158_vm0, %v15529_v38  ;;  %v15594_v37 = vld [vmem:[%s18125_s0 + $0x1b0] sm:$0xff]  }
 0x218   :  { %14088 = vmatprep.mubr.msk.bf16.mxu1 %vm158_vm0, %v15530_v39  ;;  %13547 = vmatpush3.bf16.msra.mxu0 %v15547_v34  ;;  %v15591_v34 = vld [vmem:[%s18125_s0 + $0xb8] sm:$0xff]   ;;  %v15595_v38 = vld [vmem:[%s18125_s0 + $0x50] sm:$0xff]   ;;  %v15596_v39 = vld [vmem:[%s18125_s0 + $0x140] sm:$0xff]  }
 0x219   :  { %14117 = vmatpush3.bf16.msra.mxu1 %v15548_v35  ;;  %13580 = vmatprep.subr.bf16.mxu0 %v17126_v40  ;;  %v15592_v35 = vld [vmem:[%s18125_s0 + $0x1a8] sm:$0xff]  }
 0x21a   :  { %14150 = vmatprep.subr.bf16.mxu1 %v17132_v41 }
 0x21e   :  { %13519 = vmatmul.mubr.msk.bf16.gmra.mrb[8].mxu0 %vm158_vm0, %v15531_v42  ;;  %v15601_v42 = vld [vmem:[%s18125_s0 + $0x60] sm:$0xff]  }
 0x21f   :  { %14089 = vmatmul.mubr.msk.bf16.gmra.mrb[8].mxu1 %vm158_vm0, %v15532_v43  ;;  %13522 = vmatprep.mubr.msk.bf16.mxu0 %vm158_vm0, %v15535_v44  ;;  %v15602_v43 = vld [vmem:[%s18125_s0 + $0x150] sm:$0xff]  }
 0x220   :  { %14092 = vmatprep.mubr.msk.bf16.mxu1 %vm158_vm0, %v15536_v45  ;;  %v15609_v44 = vld [vmem:[%s18126_s1 + $0x110] sm:$0xff]  }
 0x221   :  { %v15610_v45 = vld [vmem:[%s18126_s1 + $0x110] sm:$0xff]  }
 0x226   :  { %13523 = vmatmul.mubr.msk.bf16.gmra.mrb[12].mxu0 %vm158_vm0, %v15537_v46  ;;  %v15623_v46 = vld [vmem:[%s18126_s1 + $0x118] sm:$0xff]  }
 0x227   :  { %14093 = vmatmul.mubr.msk.bf16.gmra.mrb[12].mxu1 %vm158_vm0, %v15538_v47  ;;  %13526 = vmatprep.mubr.msk.bf16.mxu0 %vm158_vm0, %v15539_v48  ;;  %v15624_v47 = vld [vmem:[%s18126_s1 + $0x118] sm:$0xff]   ;;  %v15603_v48 = vld [vmem:[%s18125_s0 + $0x68] sm:$0xff]  }
 0x228   :  { %14096 = vmatprep.mubr.msk.bf16.mxu1 %vm158_vm0, %v15540_v49  ;;  %v15604_v49 = vld [vmem:[%s18125_s0 + $0x158] sm:$0xff]  }
 0x22e   :  { %13527 = vmatmul.mubr.msk.bf16.gmra.mrb[16].mxu0 %vm158_vm0, %v15541_v50  ;;  %v15605_v50 = vld [vmem:[%s18125_s0 + $0x70] sm:$0xff]  }
 0x22f   :  { %14097 = vmatmul.mubr.msk.bf16.gmra.mrb[16].mxu1 %vm158_vm0, %v15542_v51  ;;  %13530 = vmatprep.mubr.msk.bf16.mxu0 %vm158_vm0, %v15543_v52  ;;  %v15606_v51 = vld [vmem:[%s18125_s0 + $0x160] sm:$0xff]  }
 0x230   :  { %14100 = vmatprep.mubr.msk.bf16.mxu1 %vm158_vm0, %v15544_v53  ;;  %v17434_v52 = vld [vmem:[%s18126_s1 + $0x120] sm:$0xff]  }
 0x231   :  { %v17440_v53 = vld [vmem:[%s18126_s1 + $0x120] sm:$0xff]  }
 0x236   :  { %13531 = vmatmul.mubr.msk.bf16.gmra.mrb[20].mxu0 %vm158_vm0, %v15545_v54  ;;  %v15607_v54 = vld [vmem:[%s18125_s0 + $0x78] sm:$0xff]  }
 0x237   :  { %14101 = vmatmul.mubr.msk.bf16.gmra.mrb[20].mxu1 %vm158_vm0, %v15546_v55  ;;  %13534 = vmatprep.mubr.msk.bf16.mxu0 %vm158_vm0, %v15549_v56  ;;  %v15608_v55 = vld [vmem:[%s18125_s0 + $0x168] sm:$0xff]   ;;  %v15611_v56 = vld [vmem:[%s18125_s0 + $0x80] sm:$0xff]  }
 0x238   :  { %14104 = vmatprep.mubr.msk.bf16.mxu1 %vm158_vm0, %v15550_v57  ;;  %v15612_v57 = vld [vmem:[%s18125_s0 + $0x170] sm:$0xff]  }
 0x23e   :  { %13535 = vmatmul.mubr.msk.bf16.gmra.mrb[24].mxu0 %vm158_vm0, %v15551_v58  ;;  %v15613_v58 = vld [vmem:[%s18125_s0 + $0x88] sm:$0xff]  }
 0x23f   :  { %14105 = vmatmul.mubr.msk.bf16.gmra.mrb[24].mxu1 %vm158_vm0, %v15552_v59  ;;  %13538 = vmatprep.mubr.msk.bf16.mxu0 %vm158_vm0, %v15553_v60  ;;  %v15614_v59 = vld [vmem:[%s18125_s0 + $0x178] sm:$0xff]   ;;  %v15615_v60 = vld [vmem:[%s18125_s0 + $0x90] sm:$0xff]  }
 0x240   :  { %14108 = vmatprep.mubr.msk.bf16.mxu1 %vm158_vm0, %v15554_v61  ;;  %v15616_v61 = vld [vmem:[%s18125_s0 + $0x180] sm:$0xff]  }
 0x246   :  { %13539 = vmatmul.mubr.msk.bf16.gmra.mrb[28].mxu0 %vm158_vm0, %v15555_v62  ;;  %v15617_v62 = vld [vmem:[%s18125_s0 + $0x98] sm:$0xff]  }
 0x247   :  { %14109 = vmatmul.mubr.msk.bf16.gmra.mrb[28].mxu1 %vm158_vm0, %v15556_v63  ;;  %13548 = vmatprep.mubr.msk.bf16.mxu0 %vm158_vm0, %v15557_v0  ;;  %v15618_v63 = vld [vmem:[%s18125_s0 + $0x188] sm:$0xff]   ;;  %v15619_v0 = vld [vmem:[%s18125_s0 + $0xa0] sm:$0xff]  }
 0x248   :  { %14118 = vmatprep.mubr.msk.bf16.mxu1 %vm158_vm0, %v15558_v1  ;;  %v15620_v1 = vld [vmem:[%s18125_s0 + $0x190] sm:$0xff]  }
 0x24e   :  { %13549 = vmatmul.mubr.msk.bf16.vlgmr.msra.gmra.mrb[0].mxu0 %vm158_vm0, %v15559_v2  ;;  %v15621_v2 = vld [vmem:[%s18125_s0 + $0xa8] sm:$0xff]  }
 0x24f   :  { %14119 = vmatmul.mubr.msk.bf16.vlgmr.msra.gmra.mrb[0].mxu1 %vm158_vm0, %v15561_v3  ;;  %13581 = vmatpush3.bf16.msra.mxu0 %v17126_v40  ;;  %v15597_v40 = vld [vmem:[%s18125_s0 + $0x58] sm:$0xff]  }
 0x250   :  { %14151 = vmatpush3.bf16.msra.mxu1 %v17132_v41  ;;  %13552 = vmatprep.mubr.msk.bf16.mxu0 %vm158_vm0, %v15563_v4  ;;  %v15599_v41 = vld [vmem:[%s18125_s0 + $0x148] sm:$0xff]   ;;  %v15622_v3 = vld [vmem:[%s18125_s0 + $0x198] sm:$0xff]   ;;  %v15625_v4 = vld [vmem:[%s18125_s0 + $0xb0] sm:$0xff]  }
 0x251   :  { %14122 = vmatprep.mubr.msk.bf16.mxu1 %vm158_vm0, %v15564_v5  ;;  %13582 = vmatprep.subr.bf16.mxu0 %v15571_v6  ;;  %v15626_v5 = vld [vmem:[%s18125_s0 + $0x1a0] sm:$0xff]  }
 0x252   :  { %14152 = vmatprep.subr.bf16.mxu1 %v15572_v7 }
 0x253   :  { %13583 = vmatpush3.bf16.msra.mxu0 %v15571_v6  ;;  %v15627_v6 = vld [vmem:[%s18125_s0 + $0xb8] sm:$0xff]  }
 0x254   :  { %14153 = vmatpush3.bf16.msra.mxu1 %v15572_v7  ;;  %13584 = vmatprep.subr.bf16.mxu0 %v15585_v8  ;;  %v15628_v7 = vld [vmem:[%s18125_s0 + $0x1a8] sm:$0xff]  }
 0x255   :  { %14154 = vmatprep.subr.bf16.mxu1 %v15586_v9 }
 0x256   :  { %13553 = vmatmul.mubr.msk.bf16.gmra.mrb[4].mxu0 %vm158_vm0, %v15565_v10  ;;  %v15631_v10 = vld [vmem:[%s18125_s0 + $0xc8] sm:$0xff]  }
 0x257   :  { %14123 = vmatmul.mubr.msk.bf16.gmra.mrb[4].mxu1 %vm158_vm0, %v15566_v11  ;;  %13556 = vmatprep.mubr.msk.bf16.mxu0 %vm158_vm0, %v15567_v12  ;;  %v15632_v11 = vld [vmem:[%s18125_s0 + $0x1b8] sm:$0xff]  }
 0x258   :  { %14126 = vmatprep.mubr.msk.bf16.mxu1 %vm158_vm0, %v15568_v13  ;;  %13585 = vmatpush3.bf16.msra.mxu0 %v15585_v8  ;;  %v15629_v8 = vld [vmem:[%s18125_s0 + $0xc0] sm:$0xff]   ;;  %v15633_v12 = vld [vmem:[%s18125_s0 + $0x58] sm:$0xff]   ;;  %v15634_v13 = vld [vmem:[%s18125_s0 + $0x148] sm:$0xff]  }
 0x259   :  { %14155 = vmatpush3.bf16.msra.mxu1 %v15586_v9  ;;  %13618 = vmatprep.subr.bf16.mxu0 %v17280_v14  ;;  %v15630_v9 = vld [vmem:[%s18125_s0 + $0x1b0] sm:$0xff]  }
 0x25a   :  { %14188 = vmatprep.subr.bf16.mxu1 %v17286_v15 }
 0x25e   :  { %13557 = vmatmul.mubr.msk.bf16.gmra.mrb[8].mxu0 %vm158_vm0, %v15569_v16  ;;  %v15639_v16 = vld [vmem:[%s18125_s0 + $0x68] sm:$0xff]  }
 0x25f   :  { %14127 = vmatmul.mubr.msk.bf16.gmra.mrb[8].mxu1 %vm158_vm0, %v15570_v17  ;;  %13560 = vmatprep.mubr.msk.bf16.mxu0 %vm158_vm0, %v15573_v18  ;;  %v15640_v17 = vld [vmem:[%s18125_s0 + $0x158] sm:$0xff]   ;;  %v15647_v18 = vld [vmem:[%s18126_s1 + $0x128] sm:$0xff]  }
 0x260   :  { %14130 = vmatprep.mubr.msk.bf16.mxu1 %vm158_vm0, %v15574_v19  ;;  %v15648_v19 = vld [vmem:[%s18126_s1 + $0x128] sm:$0xff]  }
 0x266   :  { %13561 = vmatmul.mubr.msk.bf16.gmra.mrb[12].mxu0 %vm158_vm0, %v15575_v20  ;;  %v15661_v20 = vld [vmem:[%s18126_s1 + $0x130] sm:$0xff]  }
 0x267   :  { %14131 = vmatmul.mubr.msk.bf16.gmra.mrb[12].mxu1 %vm158_vm0, %v15576_v21  ;;  %13564 = vmatprep.mubr.msk.bf16.mxu0 %vm158_vm0, %v15577_v22  ;;  %v15662_v21 = vld [vmem:[%s18126_s1 + $0x130] sm:$0xff]  }
 0x268   :  { %14134 = vmatprep.mubr.msk.bf16.mxu1 %vm158_vm0, %v15578_v23  ;;  %v15641_v22 = vld [vmem:[%s18125_s0 + $0x70] sm:$0xff]   ;;  %v15642_v23 = vld [vmem:[%s18125_s0 + $0x160] sm:$0xff]  }
 0x26e   :  { %13565 = vmatmul.mubr.msk.bf16.gmra.mrb[16].mxu0 %vm158_vm0, %v15579_v24  ;;  %v15643_v24 = vld [vmem:[%s18125_s0 + $0x78] sm:$0xff]  }
 0x26f   :  { %14135 = vmatmul.mubr.msk.bf16.gmra.mrb[16].mxu1 %vm158_vm0, %v15580_v25  ;;  %13568 = vmatprep.mubr.msk.bf16.mxu0 %vm158_vm0, %v15581_v26  ;;  %v15644_v25 = vld [vmem:[%s18125_s0 + $0x168] sm:$0xff]   ;;  %v17588_v26 = vld [vmem:[%s18126_s1 + $0x138] sm:$0xff]  }
 0x270   :  { %14138 = vmatprep.mubr.msk.bf16.mxu1 %vm158_vm0, %v15582_v27  ;;  %v17594_v27 = vld [vmem:[%s18126_s1 + $0x138] sm:$0xff]  }
 0x276   :  { %13569 = vmatmul.mubr.msk.bf16.gmra.mrb[20].mxu0 %vm158_vm0, %v15583_v28  ;;  %v15645_v28 = vld [vmem:[%s18125_s0 + $0x80] sm:$0xff]  }
 0x277   :  { %14139 = vmatmul.mubr.msk.bf16.gmra.mrb[20].mxu1 %vm158_vm0, %v15584_v29  ;;  %13572 = vmatprep.mubr.msk.bf16.mxu0 %vm158_vm0, %v15587_v30  ;;  %v15646_v29 = vld [vmem:[%s18125_s0 + $0x170] sm:$0xff]   ;;  %v15649_v30 = vld [vmem:[%s18125_s0 + $0x88] sm:$0xff]  }
 0x278   :  { %14142 = vmatprep.mubr.msk.bf16.mxu1 %vm158_vm0, %v15588_v31  ;;  %v15650_v31 = vld [vmem:[%s18125_s0 + $0x178] sm:$0xff]  }
 0x27e   :  { %13573 = vmatmul.mubr.msk.bf16.gmra.mrb[24].mxu0 %vm158_vm0, %v15589_v32  ;;  %v15651_v32 = vld [vmem:[%s18125_s0 + $0x90] sm:$0xff]  }
 0x27f   :  { %14143 = vmatmul.mubr.msk.bf16.gmra.mrb[24].mxu1 %vm158_vm0, %v15590_v33  ;;  %13576 = vmatprep.mubr.msk.bf16.mxu0 %vm158_vm0, %v15591_v34  ;;  %v15652_v33 = vld [vmem:[%s18125_s0 + $0x180] sm:$0xff]   ;;  %v15653_v34 = vld [vmem:[%s18125_s0 + $0x98] sm:$0xff]  }
 0x280   :  { %14146 = vmatprep.mubr.msk.bf16.mxu1 %vm158_vm0, %v15592_v35  ;;  %v15654_v35 = vld [vmem:[%s18125_s0 + $0x188] sm:$0xff]  }
 0x286   :  { %13577 = vmatmul.mubr.msk.bf16.gmra.mrb[28].mxu0 %vm158_vm0, %v15593_v36  ;;  %v15655_v36 = vld [vmem:[%s18125_s0 + $0xa0] sm:$0xff]  }
 0x287   :  { %14147 = vmatmul.mubr.msk.bf16.gmra.mrb[28].mxu1 %vm158_vm0, %v15594_v37  ;;  %13586 = vmatprep.mubr.msk.bf16.mxu0 %vm158_vm0, %v15595_v38  ;;  %v15656_v37 = vld [vmem:[%s18125_s0 + $0x190] sm:$0xff]   ;;  %v15657_v38 = vld [vmem:[%s18125_s0 + $0xa8] sm:$0xff]  }
 0x288   :  { %14156 = vmatprep.mubr.msk.bf16.mxu1 %vm158_vm0, %v15596_v39  ;;  %v15658_v39 = vld [vmem:[%s18125_s0 + $0x198] sm:$0xff]  }
 0x28e   :  { %13587 = vmatmul.mubr.msk.bf16.vlgmr.msra.gmra.mrb[0].mxu0 %vm158_vm0, %v15597_v40  ;;  %v15659_v40 = vld [vmem:[%s18125_s0 + $0xb0] sm:$0xff]  }
 0x28f   :  { %14157 = vmatmul.mubr.msk.bf16.vlgmr.msra.gmra.mrb[0].mxu1 %vm158_vm0, %v15599_v41  ;;  %13619 = vmatpush3.bf16.msra.mxu0 %v17280_v14  ;;  %v15635_v14 = vld [vmem:[%s18125_s0 + $0x60] sm:$0xff]  }
 0x290   :  { %14189 = vmatpush3.bf16.msra.mxu1 %v17286_v15  ;;  %13590 = vmatprep.mubr.msk.bf16.mxu0 %vm158_vm0, %v15601_v42  ;;  %v15637_v15 = vld [vmem:[%s18125_s0 + $0x150] sm:$0xff]   ;;  %v15660_v41 = vld [vmem:[%s18125_s0 + $0x1a0] sm:$0xff]   ;;  %v15663_v42 = vld [vmem:[%s18125_s0 + $0xb8] sm:$0xff]  }
 0x291   :  { %14160 = vmatprep.mubr.msk.bf16.mxu1 %vm158_vm0, %v15602_v43  ;;  %13620 = vmatprep.subr.bf16.mxu0 %v15609_v44  ;;  %v15664_v43 = vld [vmem:[%s18125_s0 + $0x1a8] sm:$0xff]  }
 0x292   :  { %14190 = vmatprep.subr.bf16.mxu1 %v15610_v45 }
 0x293   :  { %13621 = vmatpush3.bf16.msra.mxu0 %v15609_v44  ;;  %v15665_v44 = vld [vmem:[%s18125_s0 + $0xc0] sm:$0xff]  }
 0x294   :  { %14191 = vmatpush3.bf16.msra.mxu1 %v15610_v45  ;;  %13622 = vmatprep.subr.bf16.mxu0 %v15623_v46  ;;  %v15666_v45 = vld [vmem:[%s18125_s0 + $0x1b0] sm:$0xff]  }
 0x295   :  { %14192 = vmatprep.subr.bf16.mxu1 %v15624_v47 }
 0x296   :  { %13591 = vmatmul.mubr.msk.bf16.gmra.mrb[4].mxu0 %vm158_vm0, %v15603_v48  ;;  %v15669_v48 = vld [vmem:[%s18125_s0 + $0xd0] sm:$0xff]  }
 0x297   :  { %14161 = vmatmul.mubr.msk.bf16.gmra.mrb[4].mxu1 %vm158_vm0, %v15604_v49  ;;  %13594 = vmatprep.mubr.msk.bf16.mxu0 %vm158_vm0, %v15605_v50  ;;  %v15670_v49 = vld [vmem:[%s18125_s0 + $0x1c0] sm:$0xff]  }
 0x298   :  { %14164 = vmatprep.mubr.msk.bf16.mxu1 %vm158_vm0, %v15606_v51  ;;  %13623 = vmatpush3.bf16.msra.mxu0 %v15623_v46  ;;  %v15667_v46 = vld [vmem:[%s18125_s0 + $0xc8] sm:$0xff]   ;;  %v15671_v50 = vld [vmem:[%s18125_s0 + $0x60] sm:$0xff]   ;;  %v15672_v51 = vld [vmem:[%s18125_s0 + $0x150] sm:$0xff]  }
 0x299   :  { %14193 = vmatpush3.bf16.msra.mxu1 %v15624_v47  ;;  %13656 = vmatprep.subr.bf16.mxu0 %v17434_v52  ;;  %v15668_v47 = vld [vmem:[%s18125_s0 + $0x1b8] sm:$0xff]  }
 0x29a   :  { %14226 = vmatprep.subr.bf16.mxu1 %v17440_v53 }
 0x29e   :  { %13595 = vmatmul.mubr.msk.bf16.gmra.mrb[8].mxu0 %vm158_vm0, %v15607_v54  ;;  %v15677_v54 = vld [vmem:[%s18125_s0 + $0x70] sm:$0xff]  }
 0x29f   :  { %14165 = vmatmul.mubr.msk.bf16.gmra.mrb[8].mxu1 %vm158_vm0, %v15608_v55  ;;  %13598 = vmatprep.mubr.msk.bf16.mxu0 %vm158_vm0, %v15611_v56  ;;  %v15678_v55 = vld [vmem:[%s18125_s0 + $0x160] sm:$0xff]  }
 0x2a0   :  { %14168 = vmatprep.mubr.msk.bf16.mxu1 %vm158_vm0, %v15612_v57  ;;  %v15685_v56 = vld [vmem:[%s18126_s1 + $0x140] sm:$0xff]  }
 0x2a1   :  { %v15686_v57 = vld [vmem:[%s18126_s1 + $0x140] sm:$0xff]  }
 0x2a6   :  { %13599 = vmatmul.mubr.msk.bf16.gmra.mrb[12].mxu0 %vm158_vm0, %v15613_v58  ;;  %v15699_v58 = vld [vmem:[%s18126_s1 + $0x148] sm:$0xff]  }
 0x2a7   :  { %14169 = vmatmul.mubr.msk.bf16.gmra.mrb[12].mxu1 %vm158_vm0, %v15614_v59  ;;  %13602 = vmatprep.mubr.msk.bf16.mxu0 %vm158_vm0, %v15615_v60  ;;  %v15700_v59 = vld [vmem:[%s18126_s1 + $0x148] sm:$0xff]   ;;  %v15679_v60 = vld [vmem:[%s18125_s0 + $0x78] sm:$0xff]  }
 0x2a8   :  { %14172 = vmatprep.mubr.msk.bf16.mxu1 %vm158_vm0, %v15616_v61  ;;  %v15680_v61 = vld [vmem:[%s18125_s0 + $0x168] sm:$0xff]  }
 0x2ae   :  { %13603 = vmatmul.mubr.msk.bf16.gmra.mrb[16].mxu0 %vm158_vm0, %v15617_v62  ;;  %v15681_v62 = vld [vmem:[%s18125_s0 + $0x80] sm:$0xff]  }
 0x2af   :  { %14173 = vmatmul.mubr.msk.bf16.gmra.mrb[16].mxu1 %vm158_vm0, %v15618_v63  ;;  %13606 = vmatprep.mubr.msk.bf16.mxu0 %vm158_vm0, %v15619_v0  ;;  %v15682_v63 = vld [vmem:[%s18125_s0 + $0x170] sm:$0xff]  }
 0x2b0   :  { %14176 = vmatprep.mubr.msk.bf16.mxu1 %vm158_vm0, %v15620_v1  ;;  %v17742_v0 = vld [vmem:[%s18126_s1 + $0x150] sm:$0xff]  }
 0x2b1   :  { %v17748_v1 = vld [vmem:[%s18126_s1 + $0x150] sm:$0xff]  }
 0x2b6   :  { %13607 = vmatmul.mubr.msk.bf16.gmra.mrb[20].mxu0 %vm158_vm0, %v15621_v2  ;;  %v15683_v2 = vld [vmem:[%s18125_s0 + $0x88] sm:$0xff]  }
 0x2b7   :  { %14177 = vmatmul.mubr.msk.bf16.gmra.mrb[20].mxu1 %vm158_vm0, %v15622_v3  ;;  %13610 = vmatprep.mubr.msk.bf16.mxu0 %vm158_vm0, %v15625_v4  ;;  %v15684_v3 = vld [vmem:[%s18125_s0 + $0x178] sm:$0xff]   ;;  %v15687_v4 = vld [vmem:[%s18125_s0 + $0x90] sm:$0xff]  }
 0x2b8   :  { %14180 = vmatprep.mubr.msk.bf16.mxu1 %vm158_vm0, %v15626_v5  ;;  %v15688_v5 = vld [vmem:[%s18125_s0 + $0x180] sm:$0xff]  }
 0x2be   :  { %13611 = vmatmul.mubr.msk.bf16.gmra.mrb[24].mxu0 %vm158_vm0, %v15627_v6  ;;  %v15689_v6 = vld [vmem:[%s18125_s0 + $0x98] sm:$0xff]  }
 0x2bf   :  { %14181 = vmatmul.mubr.msk.bf16.gmra.mrb[24].mxu1 %vm158_vm0, %v15628_v7  ;;  %13614 = vmatprep.mubr.msk.bf16.mxu0 %vm158_vm0, %v15629_v8  ;;  %v15690_v7 = vld [vmem:[%s18125_s0 + $0x188] sm:$0xff]   ;;  %v15691_v8 = vld [vmem:[%s18125_s0 + $0xa0] sm:$0xff]  }
 0x2c0   :  { %14184 = vmatprep.mubr.msk.bf16.mxu1 %vm158_vm0, %v15630_v9  ;;  %v15692_v9 = vld [vmem:[%s18125_s0 + $0x190] sm:$0xff]  }
 0x2c6   :  { %13615 = vmatmul.mubr.msk.bf16.gmra.mrb[28].mxu0 %vm158_vm0, %v15631_v10  ;;  %v15693_v10 = vld [vmem:[%s18125_s0 + $0xa8] sm:$0xff]  }
 0x2c7   :  { %14185 = vmatmul.mubr.msk.bf16.gmra.mrb[28].mxu1 %vm158_vm0, %v15632_v11  ;;  %13624 = vmatprep.mubr.msk.bf16.mxu0 %vm158_vm0, %v15633_v12  ;;  %v15694_v11 = vld [vmem:[%s18125_s0 + $0x198] sm:$0xff]   ;;  %v15695_v12 = vld [vmem:[%s18125_s0 + $0xb0] sm:$0xff]  }
 0x2c8   :  { %14194 = vmatprep.mubr.msk.bf16.mxu1 %vm158_vm0, %v15634_v13  ;;  %v15696_v13 = vld [vmem:[%s18125_s0 + $0x1a0] sm:$0xff]  }
 0x2ce   :  { %13625 = vmatmul.mubr.msk.bf16.vlgmr.msra.gmra.mrb[0].mxu0 %vm158_vm0, %v15635_v14  ;;  %v15697_v14 = vld [vmem:[%s18125_s0 + $0xb8] sm:$0xff]  }
 0x2cf   :  { %14195 = vmatmul.mubr.msk.bf16.vlgmr.msra.gmra.mrb[0].mxu1 %vm158_vm0, %v15637_v15  ;;  %13657 = vmatpush3.bf16.msra.mxu0 %v17434_v52  ;;  %v15673_v52 = vld [vmem:[%s18125_s0 + $0x68] sm:$0xff]  }
 0x2d0   :  { %14227 = vmatpush3.bf16.msra.mxu1 %v17440_v53  ;;  %13628 = vmatprep.mubr.msk.bf16.mxu0 %vm158_vm0, %v15639_v16  ;;  %v15675_v53 = vld [vmem:[%s18125_s0 + $0x158] sm:$0xff]   ;;  %v15698_v15 = vld [vmem:[%s18125_s0 + $0x1a8] sm:$0xff]   ;;  %v15701_v16 = vld [vmem:[%s18125_s0 + $0xc0] sm:$0xff]  }
 0x2d1   :  { %14198 = vmatprep.mubr.msk.bf16.mxu1 %vm158_vm0, %v15640_v17  ;;  %13658 = vmatprep.subr.bf16.mxu0 %v15647_v18  ;;  %v15702_v17 = vld [vmem:[%s18125_s0 + $0x1b0] sm:$0xff]  }
 0x2d2   :  { %14228 = vmatprep.subr.bf16.mxu1 %v15648_v19 }
 0x2d3   :  { %13659 = vmatpush3.bf16.msra.mxu0 %v15647_v18  ;;  %v15703_v18 = vld [vmem:[%s18125_s0 + $0xc8] sm:$0xff]  }
 0x2d4   :  { %14229 = vmatpush3.bf16.msra.mxu1 %v15648_v19  ;;  %13660 = vmatprep.subr.bf16.mxu0 %v15661_v20  ;;  %v15704_v19 = vld [vmem:[%s18125_s0 + $0x1b8] sm:$0xff]  }
 0x2d5   :  { %14230 = vmatprep.subr.bf16.mxu1 %v15662_v21 }
 0x2d6   :  { %13629 = vmatmul.mubr.msk.bf16.gmra.mrb[4].mxu0 %vm158_vm0, %v15641_v22  ;;  %v15707_v22 = vld [vmem:[%s18125_s0 + $0xd8] sm:$0xff]  }
 0x2d7   :  { %14199 = vmatmul.mubr.msk.bf16.gmra.mrb[4].mxu1 %vm158_vm0, %v15642_v23  ;;  %13632 = vmatprep.mubr.msk.bf16.mxu0 %vm158_vm0, %v15643_v24  ;;  %v15708_v23 = vld [vmem:[%s18125_s0 + $0x1c8] sm:$0xff]  }
 0x2d8   :  { %14202 = vmatprep.mubr.msk.bf16.mxu1 %vm158_vm0, %v15644_v25  ;;  %13661 = vmatpush3.bf16.msra.mxu0 %v15661_v20  ;;  %v15705_v20 = vld [vmem:[%s18125_s0 + $0xd0] sm:$0xff]   ;;  %v15709_v24 = vld [vmem:[%s18125_s0 + $0x68] sm:$0xff]   ;;  %v15710_v25 = vld [vmem:[%s18125_s0 + $0x158] sm:$0xff]  }
 0x2d9   :  { %14231 = vmatpush3.bf16.msra.mxu1 %v15662_v21  ;;  %13694 = vmatprep.subr.bf16.mxu0 %v17588_v26  ;;  %v15706_v21 = vld [vmem:[%s18125_s0 + $0x1c0] sm:$0xff]  }
 0x2da   :  { %14264 = vmatprep.subr.bf16.mxu1 %v17594_v27 }
 0x2de   :  { %13633 = vmatmul.mubr.msk.bf16.gmra.mrb[8].mxu0 %vm158_vm0, %v15645_v28  ;;  %v15715_v28 = vld [vmem:[%s18125_s0 + $0x78] sm:$0xff]  }
 0x2df   :  { %14203 = vmatmul.mubr.msk.bf16.gmra.mrb[8].mxu1 %vm158_vm0, %v15646_v29  ;;  %13636 = vmatprep.mubr.msk.bf16.mxu0 %vm158_vm0, %v15649_v30  ;;  %v15716_v29 = vld [vmem:[%s18125_s0 + $0x168] sm:$0xff]   ;;  %v15723_v30 = vld [vmem:[%s18126_s1 + $0x158] sm:$0xff]  }
 0x2e0   :  { %14206 = vmatprep.mubr.msk.bf16.mxu1 %vm158_vm0, %v15650_v31  ;;  %v15724_v31 = vld [vmem:[%s18126_s1 + $0x158] sm:$0xff]  }
 0x2e6   :  { %13637 = vmatmul.mubr.msk.bf16.gmra.mrb[12].mxu0 %vm158_vm0, %v15651_v32  ;;  %v15737_v32 = vld [vmem:[%s18126_s1 + $0x160] sm:$0xff]  }
 0x2e7   :  { %14207 = vmatmul.mubr.msk.bf16.gmra.mrb[12].mxu1 %vm158_vm0, %v15652_v33  ;;  %13640 = vmatprep.mubr.msk.bf16.mxu0 %vm158_vm0, %v15653_v34  ;;  %v15738_v33 = vld [vmem:[%s18126_s1 + $0x160] sm:$0xff]  }
 0x2e8   :  { %14210 = vmatprep.mubr.msk.bf16.mxu1 %vm158_vm0, %v15654_v35  ;;  %v15717_v34 = vld [vmem:[%s18125_s0 + $0x80] sm:$0xff]   ;;  %v15718_v35 = vld [vmem:[%s18125_s0 + $0x170] sm:$0xff]  }
 0x2ee   :  { %13641 = vmatmul.mubr.msk.bf16.gmra.mrb[16].mxu0 %vm158_vm0, %v15655_v36  ;;  %v15719_v36 = vld [vmem:[%s18125_s0 + $0x88] sm:$0xff]  }
 0x2ef   :  { %14211 = vmatmul.mubr.msk.bf16.gmra.mrb[16].mxu1 %vm158_vm0, %v15656_v37  ;;  %13644 = vmatprep.mubr.msk.bf16.mxu0 %vm158_vm0, %v15657_v38  ;;  %v15720_v37 = vld [vmem:[%s18125_s0 + $0x178] sm:$0xff]   ;;  %v15721_v38 = vld [vmem:[%s18125_s0 + $0x90] sm:$0xff]  }
 0x2f0   :  { %14214 = vmatprep.mubr.msk.bf16.mxu1 %vm158_vm0, %v15658_v39  ;;  %v15722_v39 = vld [vmem:[%s18125_s0 + $0x180] sm:$0xff]  }
 0x2f6   :  { %13645 = vmatmul.mubr.msk.bf16.gmra.mrb[20].mxu0 %vm158_vm0, %v15659_v40  ;;  %v15725_v40 = vld [vmem:[%s18125_s0 + $0x98] sm:$0xff]  }
 0x2f7   :  { %14215 = vmatmul.mubr.msk.bf16.gmra.mrb[20].mxu1 %vm158_vm0, %v15660_v41  ;;  %13648 = vmatprep.mubr.msk.bf16.mxu0 %vm158_vm0, %v15663_v42  ;;  %v15726_v41 = vld [vmem:[%s18125_s0 + $0x188] sm:$0xff]   ;;  %v15727_v42 = vld [vmem:[%s18125_s0 + $0xa0] sm:$0xff]  }
 0x2f8   :  { %14218 = vmatprep.mubr.msk.bf16.mxu1 %vm158_vm0, %v15664_v43  ;;  %v15728_v43 = vld [vmem:[%s18125_s0 + $0x190] sm:$0xff]  }
 0x2fe   :  { %13649 = vmatmul.mubr.msk.bf16.gmra.mrb[24].mxu0 %vm158_vm0, %v15665_v44  ;;  %v15729_v44 = vld [vmem:[%s18125_s0 + $0xa8] sm:$0xff]  }
 0x2ff   :  { %14219 = vmatmul.mubr.msk.bf16.gmra.mrb[24].mxu1 %vm158_vm0, %v15666_v45  ;;  %13652 = vmatprep.mubr.msk.bf16.mxu0 %vm158_vm0, %v15667_v46  ;;  %v15730_v45 = vld [vmem:[%s18125_s0 + $0x198] sm:$0xff]   ;;  %v15731_v46 = vld [vmem:[%s18125_s0 + $0xb0] sm:$0xff]  }
 0x300   :  { %14222 = vmatprep.mubr.msk.bf16.mxu1 %vm158_vm0, %v15668_v47  ;;  %v15732_v47 = vld [vmem:[%s18125_s0 + $0x1a0] sm:$0xff]  }
 0x306   :  { %13653 = vmatmul.mubr.msk.bf16.gmra.mrb[28].mxu0 %vm158_vm0, %v15669_v48  ;;  %v15733_v48 = vld [vmem:[%s18125_s0 + $0xb8] sm:$0xff]  }
 0x307   :  { %14223 = vmatmul.mubr.msk.bf16.gmra.mrb[28].mxu1 %vm158_vm0, %v15670_v49  ;;  %13662 = vmatprep.mubr.msk.bf16.mxu0 %vm158_vm0, %v15671_v50  ;;  %v15734_v49 = vld [vmem:[%s18125_s0 + $0x1a8] sm:$0xff]   ;;  %v15735_v50 = vld [vmem:[%s18125_s0 + $0xc0] sm:$0xff]  }
 0x308   :  { %14232 = vmatprep.mubr.msk.bf16.mxu1 %vm158_vm0, %v15672_v51  ;;  %v15736_v51 = vld [vmem:[%s18125_s0 + $0x1b0] sm:$0xff]  }
 0x30e   :  { %13663 = vmatmul.mubr.msk.bf16.vlgmr.msra.gmra.mrb[0].mxu0 %vm158_vm0, %v15673_v52  ;;  %v15739_v52 = vld [vmem:[%s18125_s0 + $0xc8] sm:$0xff]  }
 0x30f   :  { %14233 = vmatmul.mubr.msk.bf16.vlgmr.msra.gmra.mrb[0].mxu1 %vm158_vm0, %v15675_v53  ;;  %13695 = vmatpush3.bf16.msra.mxu0 %v17588_v26  ;;  %v15711_v26 = vld [vmem:[%s18125_s0 + $0x70] sm:$0xff]   ;;  %v15740_v53 = vld [vmem:[%s18125_s0 + $0x1b8] sm:$0xff]  }
 0x310   :  { %14265 = vmatpush3.bf16.msra.mxu1 %v17594_v27  ;;  %13666 = vmatprep.mubr.msk.bf16.mxu0 %vm158_vm0, %v15677_v54  ;;  %v15713_v27 = vld [vmem:[%s18125_s0 + $0x160] sm:$0xff]   ;;  %v15741_v54 = vld [vmem:[%s18125_s0 + $0xd0] sm:$0xff]  }
 0x311   :  { %14236 = vmatprep.mubr.msk.bf16.mxu1 %vm158_vm0, %v15678_v55  ;;  %13696 = vmatprep.subr.bf16.mxu0 %v15685_v56  ;;  %v15742_v55 = vld [vmem:[%s18125_s0 + $0x1c0] sm:$0xff]  }
 0x312   :  { %14266 = vmatprep.subr.bf16.mxu1 %v15686_v57 }
 0x313   :  { %13697 = vmatpush3.bf16.msra.mxu0 %v15685_v56  ;;  %v15743_v56 = vld [vmem:[%s18125_s0 + $0xd8] sm:$0xff]  }
 0x314   :  { %14267 = vmatpush3.bf16.msra.mxu1 %v15686_v57  ;;  %13698 = vmatprep.subr.bf16.mxu0 %v15699_v58  ;;  %v15744_v57 = vld [vmem:[%s18125_s0 + $0x1c8] sm:$0xff]  }
 0x315   :  { %14268 = vmatprep.subr.bf16.mxu1 %v15700_v59 }
 0x316   :  { %13667 = vmatmul.mubr.msk.bf16.gmra.mrb[4].mxu0 %vm158_vm0, %v15679_v60  ;;  %v15747_v60 = vld [vmem:[%s18125_s0 + $0x70] sm:$0xff]  }
 0x317   :  { %14237 = vmatmul.mubr.msk.bf16.gmra.mrb[4].mxu1 %vm158_vm0, %v15680_v61  ;;  %13670 = vmatprep.mubr.msk.bf16.mxu0 %vm158_vm0, %v15681_v62  ;;  %v15748_v61 = vld [vmem:[%s18125_s0 + $0x160] sm:$0xff]   ;;  %v15749_v62 = vld [vmem:[%s18125_s0 + $0x78] sm:$0xff]  }
 0x318   :  { %14240 = vmatprep.mubr.msk.bf16.mxu1 %vm158_vm0, %v15682_v63  ;;  %13699 = vmatpush3.bf16.msra.mxu0 %v15699_v58  ;;  %v15745_v58 = vld [vmem:[%s18125_s0 + $0xe0] sm:$0xff]   ;;  %v15750_v63 = vld [vmem:[%s18125_s0 + $0x168] sm:$0xff]  }
 0x319   :  { %14269 = vmatpush3.bf16.msra.mxu1 %v15700_v59  ;;  %13732 = vmatprep.subr.bf16.mxu0 %v17742_v0  ;;  %v15746_v59 = vld [vmem:[%s18125_s0 + $0x1d0] sm:$0xff]  }
 0x31a   :  { %14302 = vmatprep.subr.bf16.mxu1 %v17748_v1 }
 0x31e   :  { %13671 = vmatmul.mubr.msk.bf16.gmra.mrb[8].mxu0 %vm158_vm0, %v15683_v2  ;;  %v15753_v2 = vld [vmem:[%s18125_s0 + $0x88] sm:$0xff]  }
 0x31f   :  { %14241 = vmatmul.mubr.msk.bf16.gmra.mrb[8].mxu1 %vm158_vm0, %v15684_v3  ;;  %13674 = vmatprep.mubr.msk.bf16.mxu0 %vm158_vm0, %v15687_v4  ;;  %v15754_v3 = vld [vmem:[%s18125_s0 + $0x178] sm:$0xff]   ;;  %v15755_v4 = vld [vmem:[%s18125_s0 + $0x90] sm:$0xff]  }
 0x320   :  { %14244 = vmatprep.mubr.msk.bf16.mxu1 %vm158_vm0, %v15688_v5  ;;  %v15756_v5 = vld [vmem:[%s18125_s0 + $0x180] sm:$0xff]  }
 0x326   :  { %13675 = vmatmul.mubr.msk.bf16.gmra.mrb[12].mxu0 %vm158_vm0, %v15689_v6  ;;  %v15757_v6 = vld [vmem:[%s18125_s0 + $0x98] sm:$0xff]  }
 0x327   :  { %14245 = vmatmul.mubr.msk.bf16.gmra.mrb[12].mxu1 %vm158_vm0, %v15690_v7  ;;  %13678 = vmatprep.mubr.msk.bf16.mxu0 %vm158_vm0, %v15691_v8  ;;  %v15758_v7 = vld [vmem:[%s18125_s0 + $0x188] sm:$0xff]   ;;  %v15759_v8 = vld [vmem:[%s18125_s0 + $0xa0] sm:$0xff]  }
 0x328   :  { %14248 = vmatprep.mubr.msk.bf16.mxu1 %vm158_vm0, %v15692_v9  ;;  %v15760_v9 = vld [vmem:[%s18125_s0 + $0x190] sm:$0xff]  }
 0x32e   :  { %13679 = vmatmul.mubr.msk.bf16.gmra.mrb[16].mxu0 %vm158_vm0, %v15693_v10  ;;  %v15761_v10 = vld [vmem:[%s18125_s0 + $0xa8] sm:$0xff]  }
 0x32f   :  { %14249 = vmatmul.mubr.msk.bf16.gmra.mrb[16].mxu1 %vm158_vm0, %v15694_v11  ;;  %13682 = vmatprep.mubr.msk.bf16.mxu0 %vm158_vm0, %v15695_v12  ;;  %v15762_v11 = vld [vmem:[%s18125_s0 + $0x198] sm:$0xff]   ;;  %v15763_v12 = vld [vmem:[%s18125_s0 + $0xb0] sm:$0xff]  }
 0x330   :  { %14252 = vmatprep.mubr.msk.bf16.mxu1 %vm158_vm0, %v15696_v13  ;;  %v15764_v13 = vld [vmem:[%s18125_s0 + $0x1a0] sm:$0xff]  }
 0x336   :  { %13683 = vmatmul.mubr.msk.bf16.gmra.mrb[20].mxu0 %vm158_vm0, %v15697_v14  ;;  %v15765_v14 = vld [vmem:[%s18125_s0 + $0xb8] sm:$0xff]  }
 0x337   :  { %14253 = vmatmul.mubr.msk.bf16.gmra.mrb[20].mxu1 %vm158_vm0, %v15698_v15  ;;  %13686 = vmatprep.mubr.msk.bf16.mxu0 %vm158_vm0, %v15701_v16  ;;  %v15766_v15 = vld [vmem:[%s18125_s0 + $0x1a8] sm:$0xff]   ;;  %v15767_v16 = vld [vmem:[%s18125_s0 + $0xc0] sm:$0xff]  }
 0x338   :  { %14256 = vmatprep.mubr.msk.bf16.mxu1 %vm158_vm0, %v15702_v17  ;;  %v15768_v17 = vld [vmem:[%s18125_s0 + $0x1b0] sm:$0xff]  }
 0x33e   :  { %13687 = vmatmul.mubr.msk.bf16.gmra.mrb[24].mxu0 %vm158_vm0, %v15703_v18  ;;  %v15769_v18 = vld [vmem:[%s18125_s0 + $0xc8] sm:$0xff]  }
 0x33f   :  { %14257 = vmatmul.mubr.msk.bf16.gmra.mrb[24].mxu1 %vm158_vm0, %v15704_v19  ;;  %13690 = vmatprep.mubr.msk.bf16.mxu0 %vm158_vm0, %v15705_v20  ;;  %v15770_v19 = vld [vmem:[%s18125_s0 + $0x1b8] sm:$0xff]   ;;  %v15771_v20 = vld [vmem:[%s18125_s0 + $0xd0] sm:$0xff]  }
 0x340   :  { %14260 = vmatprep.mubr.msk.bf16.mxu1 %vm158_vm0, %v15706_v21  ;;  %v15772_v21 = vld [vmem:[%s18125_s0 + $0x1c0] sm:$0xff]  }
 0x346   :  { %13691 = vmatmul.mubr.msk.bf16.gmra.mrb[28].mxu0 %vm158_vm0, %v15707_v22  ;;  %v15773_v22 = vld [vmem:[%s18125_s0 + $0xd8] sm:$0xff]  }
 0x347   :  { %14261 = vmatmul.mubr.msk.bf16.gmra.mrb[28].mxu1 %vm158_vm0, %v15708_v23  ;;  %13700 = vmatprep.mubr.msk.bf16.mxu0 %vm158_vm0, %v15709_v24  ;;  %v15774_v23 = vld [vmem:[%s18125_s0 + $0x1c8] sm:$0xff]   ;;  %v15775_v24 = vld [vmem:[%s18125_s0 + $0xe0] sm:$0xff]  }
 0x348   :  { %14270 = vmatprep.mubr.msk.bf16.mxu1 %vm158_vm0, %v15710_v25  ;;  %v15776_v25 = vld [vmem:[%s18125_s0 + $0x1d0] sm:$0xff]  }
 0x34e   :  { %13701 = vmatmul.mubr.msk.bf16.vlgmr.msra.gmra.mrb[0].mxu0 %vm158_vm0, %v15711_v26  ;;  %v15777_v26 = vld [vmem:[%s18125_s0 + $0xe8] sm:$0xff]  }
 0x34f   :  { %14271 = vmatmul.mubr.msk.bf16.vlgmr.msra.gmra.mrb[0].mxu1 %vm158_vm0, %v15713_v27  ;;  %13733 = vmatpush3.bf16.msra.mxu0 %v17742_v0  ;;  %v15751_v0 = vld [vmem:[%s18125_s0 + $0x80] sm:$0xff]   ;;  %v15778_v27 = vld [vmem:[%s18125_s0 + $0x1d8] sm:$0xff]  }
 0x350   :  { %14303 = vmatpush3.bf16.msra.mxu1 %v17748_v1  ;;  %13704 = vmatprep.mubr.msk.bf16.mxu0 %vm158_vm0, %v15715_v28  ;;  %v15752_v1 = vld [vmem:[%s18125_s0 + $0x170] sm:$0xff]   ;;  %s15803_s0 = smov [#allocation2]  }
 0x351   :  { %14274 = vmatprep.mubr.msk.bf16.mxu1 %vm158_vm0, %v15716_v29  ;;  %13734 = vmatprep.subr.bf16.mxu0 %v15723_v30  ;;  %s10981_s21 = sshll.u32 %s15803_s0, 4  ;;  %s10982_s21 = int_to_ptr.vmem [resolvable:$true] %s10981_s21 }
 0x352   :  { %14304 = vmatprep.subr.bf16.mxu1 %v15724_v31  ;;  %s15779_s22 = scalar_lea.vmem %s10982_s21, 8192  ;;  %p15784_p1 = scmp.lt.s32.totalorder %s10982_s21, %s10982_s21 }
 0x353   :  { %13735 = vmatpush3.bf16.msra.mxu0 %v15723_v30  ;;  %p15780_p0 = scmp.ne.s32.totalorder %s10982_s21, %s15779_s22  ;;  %p15785_p2 = scmp.lt.s32.totalorder %s15779_s22, %s15779_s22 }
 0x354   :  { %14305 = vmatpush3.bf16.msra.mxu1 %v15724_v31  ;;  %13736 = vmatprep.subr.bf16.mxu0 %v15737_v32 }
 0x355   :  { %14306 = vmatprep.subr.bf16.mxu1 %v15738_v33  ;;  %p15786_p3 = por %p15785_p2, %p15784_p1 }
 0x356   :  { %13705 = vmatmul.mubr.msk.bf16.gmra.mrb[4].mxu0 %vm158_vm0, %v15717_v34 }
 0x357   :  { %14275 = vmatmul.mubr.msk.bf16.gmra.mrb[4].mxu1 %vm158_vm0, %v15718_v35  ;;  %13708 = vmatprep.mubr.msk.bf16.mxu0 %vm158_vm0, %v15719_v36  ;;  %p15787_p4 = pnand %p15786_p3, %p15780_p0 }
 0x358   :  { %14278 = vmatprep.mubr.msk.bf16.mxu1 %vm158_vm0, %v15720_v37  ;;  %13737 = vmatpush3.bf16.msra.mxu0 %v15737_v32 }
 0x359   :  { %14307 = vmatpush3.bf16.msra.mxu1 %v15738_v33 }
 0x35e   :  { %13709 = vmatmul.mubr.msk.bf16.gmra.mrb[8].mxu0 %vm158_vm0, %v15721_v38 }
 0x35f   :  { %14279 = vmatmul.mubr.msk.bf16.gmra.mrb[8].mxu1 %vm158_vm0, %v15722_v39  ;;  %13712 = vmatprep.mubr.msk.bf16.mxu0 %vm158_vm0, %v15725_v40 }
 0x360   :  { %14282 = vmatprep.mubr.msk.bf16.mxu1 %vm158_vm0, %v15726_v41 }
 0x366   :  { %13713 = vmatmul.mubr.msk.bf16.gmra.mrb[12].mxu0 %vm158_vm0, %v15727_v42 }
 0x367   :  { %14283 = vmatmul.mubr.msk.bf16.gmra.mrb[12].mxu1 %vm158_vm0, %v15728_v43  ;;  %13716 = vmatprep.mubr.msk.bf16.mxu0 %vm158_vm0, %v15729_v44 }
 0x368   :  { %14286 = vmatprep.mubr.msk.bf16.mxu1 %vm158_vm0, %v15730_v45 }
 0x36e   :  { %13717 = vmatmul.mubr.msk.bf16.gmra.mrb[16].mxu0 %vm158_vm0, %v15731_v46 }
 0x36f   :  { %14287 = vmatmul.mubr.msk.bf16.gmra.mrb[16].mxu1 %vm158_vm0, %v15732_v47  ;;  %13720 = vmatprep.mubr.msk.bf16.mxu0 %vm158_vm0, %v15733_v48 }
 0x370   :  { %14290 = vmatprep.mubr.msk.bf16.mxu1 %vm158_vm0, %v15734_v49 }
 0x376   :  { %13721 = vmatmul.mubr.msk.bf16.gmra.mrb[20].mxu0 %vm158_vm0, %v15735_v50 }
 0x377   :  { %14291 = vmatmul.mubr.msk.bf16.gmra.mrb[20].mxu1 %vm158_vm0, %v15736_v51  ;;  %13724 = vmatprep.mubr.msk.bf16.mxu0 %vm158_vm0, %v15739_v52 }
 0x378   :  { %14294 = vmatprep.mubr.msk.bf16.mxu1 %vm158_vm0, %v15740_v53 }
 0x37e   :  { %13725 = vmatmul.mubr.msk.bf16.gmra.mrb[24].mxu0 %vm158_vm0, %v15741_v54 }
 0x37f   :  { %14295 = vmatmul.mubr.msk.bf16.gmra.mrb[24].mxu1 %vm158_vm0, %v15742_v55  ;;  %13728 = vmatprep.mubr.msk.bf16.mxu0 %vm158_vm0, %v15743_v56 }
 0x380   :  { %14298 = vmatprep.mubr.msk.bf16.mxu1 %vm158_vm0, %v15744_v57 }
 0x386   :  { %13729 = vmatmul.mubr.msk.bf16.gmra.mrb[28].mxu0 %vm158_vm0, %v15745_v58 }
 0x387   :  { %14299 = vmatmul.mubr.msk.bf16.gmra.mrb[28].mxu1 %vm158_vm0, %v15746_v59  ;;  %13738 = vmatprep.mubr.msk.bf16.mxu0 %vm158_vm0, %v15747_v60 }
 0x388   :  { %14308 = vmatprep.mubr.msk.bf16.mxu1 %vm158_vm0, %v15748_v61 }
 0x38e   :  { %13739 = vmatmul.mubr.msk.bf16.vlgmr.msra.gmra.mrb[0].mxu0 %vm158_vm0, %v15749_v62 }
 0x38f   :  { %14309 = vmatmul.mubr.msk.bf16.vlgmr.msra.gmra.mrb[0].mxu1 %vm158_vm0, %v15750_v63  ;;  %13742 = vmatprep.mubr.msk.bf16.mxu0 %vm158_vm0, %v15751_v0 }
 0x390   :  { %14312 = vmatprep.mubr.msk.bf16.mxu1 %vm158_vm0, %v15752_v1 }
 0x396   :  { %13743 = vmatmul.mubr.msk.bf16.gmra.mrb[4].mxu0 %vm158_vm0, %v15753_v2 }
 0x397   :  { %14313 = vmatmul.mubr.msk.bf16.gmra.mrb[4].mxu1 %vm158_vm0, %v15754_v3  ;;  %13746 = vmatprep.mubr.msk.bf16.mxu0 %vm158_vm0, %v15755_v4 }
 0x398   :  { %14316 = vmatprep.mubr.msk.bf16.mxu1 %vm158_vm0, %v15756_v5 }
 0x39e   :  { %13747 = vmatmul.mubr.msk.bf16.gmra.mrb[8].mxu0 %vm158_vm0, %v15757_v6 }
 0x39f   :  { %14317 = vmatmul.mubr.msk.bf16.gmra.mrb[8].mxu1 %vm158_vm0, %v15758_v7  ;;  %13750 = vmatprep.mubr.msk.bf16.mxu0 %vm158_vm0, %v15759_v8 }
 0x3a0   :  { %14320 = vmatprep.mubr.msk.bf16.mxu1 %vm158_vm0, %v15760_v9 }
 0x3a6   :  { %13751 = vmatmul.mubr.msk.bf16.gmra.mrb[12].mxu0 %vm158_vm0, %v15761_v10 }
 0x3a7   :  { %14321 = vmatmul.mubr.msk.bf16.gmra.mrb[12].mxu1 %vm158_vm0, %v15762_v11  ;;  %13754 = vmatprep.mubr.msk.bf16.mxu0 %vm158_vm0, %v15763_v12 }
 0x3a8   :  { %14324 = vmatprep.mubr.msk.bf16.mxu1 %vm158_vm0, %v15764_v13 }
 0x3ae   :  { %13755 = vmatmul.mubr.msk.bf16.gmra.mrb[16].mxu0 %vm158_vm0, %v15765_v14 }
 0x3af   :  { %14325 = vmatmul.mubr.msk.bf16.gmra.mrb[16].mxu1 %vm158_vm0, %v15766_v15  ;;  %13758 = vmatprep.mubr.msk.bf16.mxu0 %vm158_vm0, %v15767_v16 }
 0x3b0   :  { %14328 = vmatprep.mubr.msk.bf16.mxu1 %vm158_vm0, %v15768_v17 }
 0x3b6   :  { %13759 = vmatmul.mubr.msk.bf16.gmra.mrb[20].mxu0 %vm158_vm0, %v15769_v18 }
 0x3b7   :  { %14329 = vmatmul.mubr.msk.bf16.gmra.mrb[20].mxu1 %vm158_vm0, %v15770_v19  ;;  %13762 = vmatprep.mubr.msk.bf16.mxu0 %vm158_vm0, %v15771_v20 }
 0x3b8   :  { %14332 = vmatprep.mubr.msk.bf16.mxu1 %vm158_vm0, %v15772_v21 }
 0x3be   :  { %13763 = vmatmul.mubr.msk.bf16.gmra.mrb[24].mxu0 %vm158_vm0, %v15773_v22 }
 0x3bf   :  { %14333 = vmatmul.mubr.msk.bf16.gmra.mrb[24].mxu1 %vm158_vm0, %v15774_v23  ;;  %13766 = vmatprep.mubr.msk.bf16.mxu0 %vm158_vm0, %v15775_v24 }
 0x3c0   :  { %14336 = vmatprep.mubr.msk.bf16.mxu1 %vm158_vm0, %v15776_v25 }
 0x3c6   :  { %13767 = vmatmul.mubr.msk.bf16.gmra.mrb[28].mxu0 %vm158_vm0, %v15777_v26 }
 0x3c7   :  { %14337 = vmatmul.mubr.msk.bf16.gmra.mrb[28].mxu1 %vm158_vm0, %v15778_v27 }
 0x461   :  { %v13740_v28 = vpop.f32.mrb[0].mxu0 }
 0x462   :  { %5471 = vst [vmem:[#allocation2 + $0x10] sm:$0xff] %v13740_v28  ;;  %v14310_v29 = vpop.f32.mrb[0].mxu1  ;;  %v5310_v30 = vpop.f32.mrb[1].mxu0 }
 0x463   :  { %10946 = vst [vmem:[#allocation2 + $0x110] sm:$0xff] %v14310_v29  ;;  %5469 = vst [vmem:[#allocation2] sm:$0xff] %v5310_v30  ;;  %v10784_v31 = vpop.f32.mrb[1].mxu1  ;;  %v13741_v32 = vpop.f32.mrb[2].mxu0 }
 0x464   :  { %10944 = vst [vmem:[#allocation2 + $0x100] sm:$0xff] %v10784_v31  ;;  %5472 = vst [vmem:[#allocation2 + $0x18] sm:$0xff] %v13741_v32  ;;  %v14311_v33 = vpop.f32.mrb[2].mxu1  ;;  %v5313_v34 = vpop.f32.mrb[3].mxu0 }
 0x465   :  { %10947 = vst [vmem:[#allocation2 + $0x118] sm:$0xff] %v14311_v33  ;;  %5470 = vst [vmem:[#allocation2 + $0x8] sm:$0xff] %v5313_v34  ;;  %v10787_v35 = vpop.f32.mrb[3].mxu1 }
 0x466   :  { %10945 = vst [vmem:[#allocation2 + $0x108] sm:$0xff] %v10787_v35 }
 0x469   :  { %v13744_v36 = vpop.f32.mrb[4].mxu0 }
 0x46a   :  { %5475 = vst [vmem:[#allocation2 + $0x30] sm:$0xff] %v13744_v36  ;;  %v14314_v37 = vpop.f32.mrb[4].mxu1  ;;  %v5326_v38 = vpop.f32.mrb[5].mxu0 }
 0x46b   :  { %10950 = vst [vmem:[#allocation2 + $0x130] sm:$0xff] %v14314_v37  ;;  %5473 = vst [vmem:[#allocation2 + $0x20] sm:$0xff] %v5326_v38  ;;  %v10800_v39 = vpop.f32.mrb[5].mxu1  ;;  %v13745_v40 = vpop.f32.mrb[6].mxu0 }
 0x46c   :  { %10948 = vst [vmem:[#allocation2 + $0x120] sm:$0xff] %v10800_v39  ;;  %5476 = vst [vmem:[#allocation2 + $0x38] sm:$0xff] %v13745_v40  ;;  %v14315_v41 = vpop.f32.mrb[6].mxu1  ;;  %v5329_v42 = vpop.f32.mrb[7].mxu0 }
 0x46d   :  { %10951 = vst [vmem:[#allocation2 + $0x138] sm:$0xff] %v14315_v41  ;;  %5474 = vst [vmem:[#allocation2 + $0x28] sm:$0xff] %v5329_v42  ;;  %v10803_v43 = vpop.f32.mrb[7].mxu1 }
 0x46e   :  { %10949 = vst [vmem:[#allocation2 + $0x128] sm:$0xff] %v10803_v43 }
 0x471   :  { %v13748_v44 = vpop.f32.mrb[8].mxu0 }
 0x472   :  { %5479 = vst [vmem:[#allocation2 + $0x50] sm:$0xff] %v13748_v44  ;;  %v14318_v45 = vpop.f32.mrb[8].mxu1  ;;  %v5342_v46 = vpop.f32.mrb[9].mxu0 }
 0x473   :  { %10954 = vst [vmem:[#allocation2 + $0x150] sm:$0xff] %v14318_v45  ;;  %5477 = vst [vmem:[#allocation2 + $0x40] sm:$0xff] %v5342_v46  ;;  %v10816_v47 = vpop.f32.mrb[9].mxu1  ;;  %v13749_v48 = vpop.f32.mrb[10].mxu0 }
 0x474   :  { %10952 = vst [vmem:[#allocation2 + $0x140] sm:$0xff] %v10816_v47  ;;  %5480 = vst [vmem:[#allocation2 + $0x58] sm:$0xff] %v13749_v48  ;;  %v14319_v49 = vpop.f32.mrb[10].mxu1  ;;  %v5345_v50 = vpop.f32.mrb[11].mxu0 }
 0x475   :  { %10955 = vst [vmem:[#allocation2 + $0x158] sm:$0xff] %v14319_v49  ;;  %5478 = vst [vmem:[#allocation2 + $0x48] sm:$0xff] %v5345_v50  ;;  %v10819_v51 = vpop.f32.mrb[11].mxu1 }
 0x476   :  { %10953 = vst [vmem:[#allocation2 + $0x148] sm:$0xff] %v10819_v51 }
 0x479   :  { %v13752_v52 = vpop.f32.mrb[12].mxu0 }
 0x47a   :  { %5483 = vst [vmem:[#allocation2 + $0x70] sm:$0xff] %v13752_v52  ;;  %v14322_v53 = vpop.f32.mrb[12].mxu1  ;;  %v5358_v54 = vpop.f32.mrb[13].mxu0 }
 0x47b   :  { %10958 = vst [vmem:[#allocation2 + $0x170] sm:$0xff] %v14322_v53  ;;  %5481 = vst [vmem:[#allocation2 + $0x60] sm:$0xff] %v5358_v54  ;;  %v10832_v55 = vpop.f32.mrb[13].mxu1  ;;  %v13753_v56 = vpop.f32.mrb[14].mxu0 }
 0x47c   :  { %10956 = vst [vmem:[#allocation2 + $0x160] sm:$0xff] %v10832_v55  ;;  %5484 = vst [vmem:[#allocation2 + $0x78] sm:$0xff] %v13753_v56  ;;  %v14323_v57 = vpop.f32.mrb[14].mxu1  ;;  %v5361_v58 = vpop.f32.mrb[15].mxu0 }
 0x47d   :  { %10959 = vst [vmem:[#allocation2 + $0x178] sm:$0xff] %v14323_v57  ;;  %5482 = vst [vmem:[#allocation2 + $0x68] sm:$0xff] %v5361_v58  ;;  %v10835_v59 = vpop.f32.mrb[15].mxu1 }
 0x47e   :  { %10957 = vst [vmem:[#allocation2 + $0x168] sm:$0xff] %v10835_v59 }
 0x481   :  { %v13756_v60 = vpop.f32.mrb[16].mxu0 }
 0x482   :  { %5487 = vst [vmem:[#allocation2 + $0x90] sm:$0xff] %v13756_v60  ;;  %v14326_v61 = vpop.f32.mrb[16].mxu1  ;;  %v5374_v62 = vpop.f32.mrb[17].mxu0 }
 0x483   :  { %10962 = vst [vmem:[#allocation2 + $0x190] sm:$0xff] %v14326_v61  ;;  %5485 = vst [vmem:[#allocation2 + $0x80] sm:$0xff] %v5374_v62  ;;  %v10848_v63 = vpop.f32.mrb[17].mxu1  ;;  %v13757_v0 = vpop.f32.mrb[18].mxu0 }
 0x484   :  { %10960 = vst [vmem:[#allocation2 + $0x180] sm:$0xff] %v10848_v63  ;;  %5488 = vst [vmem:[#allocation2 + $0x98] sm:$0xff] %v13757_v0  ;;  %v14327_v1 = vpop.f32.mrb[18].mxu1  ;;  %v5377_v2 = vpop.f32.mrb[19].mxu0 }
 0x485   :  { %10963 = vst [vmem:[#allocation2 + $0x198] sm:$0xff] %v14327_v1  ;;  %5486 = vst [vmem:[#allocation2 + $0x88] sm:$0xff] %v5377_v2  ;;  %v10851_v3 = vpop.f32.mrb[19].mxu1 }
 0x486   :  { %10961 = vst [vmem:[#allocation2 + $0x188] sm:$0xff] %v10851_v3 }
 0x489   :  { %v13760_v4 = vpop.f32.mrb[20].mxu0 }
 0x48a   :  { %5491 = vst [vmem:[#allocation2 + $0xb0] sm:$0xff] %v13760_v4  ;;  %v14330_v5 = vpop.f32.mrb[20].mxu1  ;;  %v5390_v6 = vpop.f32.mrb[21].mxu0 }
 0x48b   :  { %10966 = vst [vmem:[#allocation2 + $0x1b0] sm:$0xff] %v14330_v5  ;;  %5489 = vst [vmem:[#allocation2 + $0xa0] sm:$0xff] %v5390_v6  ;;  %v10864_v7 = vpop.f32.mrb[21].mxu1  ;;  %v13761_v8 = vpop.f32.mrb[22].mxu0 }
 0x48c   :  { %10964 = vst [vmem:[#allocation2 + $0x1a0] sm:$0xff] %v10864_v7  ;;  %5492 = vst [vmem:[#allocation2 + $0xb8] sm:$0xff] %v13761_v8  ;;  %v14331_v9 = vpop.f32.mrb[22].mxu1  ;;  %v5393_v10 = vpop.f32.mrb[23].mxu0 }
 0x48d   :  { %10967 = vst [vmem:[#allocation2 + $0x1b8] sm:$0xff] %v14331_v9  ;;  %5490 = vst [vmem:[#allocation2 + $0xa8] sm:$0xff] %v5393_v10  ;;  %v10867_v11 = vpop.f32.mrb[23].mxu1 }
 0x48e   :  { %10965 = vst [vmem:[#allocation2 + $0x1a8] sm:$0xff] %v10867_v11 }
 0x491   :  { %v13764_v12 = vpop.f32.mrb[24].mxu0 }
 0x492   :  { %5495 = vst [vmem:[#allocation2 + $0xd0] sm:$0xff] %v13764_v12  ;;  %v14334_v13 = vpop.f32.mrb[24].mxu1  ;;  %v5406_v14 = vpop.f32.mrb[25].mxu0 }
 0x493   :  { %10970 = vst [vmem:[#allocation2 + $0x1d0] sm:$0xff] %v14334_v13  ;;  %5493 = vst [vmem:[#allocation2 + $0xc0] sm:$0xff] %v5406_v14  ;;  %v10880_v15 = vpop.f32.mrb[25].mxu1  ;;  %v13765_v16 = vpop.f32.mrb[26].mxu0 }
 0x494   :  { %10968 = vst [vmem:[#allocation2 + $0x1c0] sm:$0xff] %v10880_v15  ;;  %5496 = vst [vmem:[#allocation2 + $0xd8] sm:$0xff] %v13765_v16  ;;  %v14335_v17 = vpop.f32.mrb[26].mxu1  ;;  %v5409_v18 = vpop.f32.mrb[27].mxu0 }
 0x495   :  { %10971 = vst [vmem:[#allocation2 + $0x1d8] sm:$0xff] %v14335_v17  ;;  %5494 = vst [vmem:[#allocation2 + $0xc8] sm:$0xff] %v5409_v18  ;;  %v10883_v19 = vpop.f32.mrb[27].mxu1 }
 0x496   :  { %10969 = vst [vmem:[#allocation2 + $0x1c8] sm:$0xff] %v10883_v19 }
 0x499   :  { %v13768_v20 = vpop.f32.mrb[28].mxu0 }
 0x49a   :  { %5499 = vst [vmem:[#allocation2 + $0xf0] sm:$0xff] %v13768_v20  ;;  %v14338_v21 = vpop.f32.mrb[28].mxu1  ;;  %v5422_v22 = vpop.f32.mrb[29].mxu0 }
 0x49b   :  { %10974 = vst [vmem:[#allocation2 + $0x1f0] sm:$0xff] %v14338_v21  ;;  %5497 = vst [vmem:[#allocation2 + $0xe0] sm:$0xff] %v5422_v22  ;;  %v10896_v23 = vpop.f32.mrb[29].mxu1  ;;  %v13769_v24 = vpop.f32.mrb[30].mxu0 }
 0x49c   :  { %10972 = vst [vmem:[#allocation2 + $0x1e0] sm:$0xff] %v10896_v23  ;;  %5500 = vst [vmem:[#allocation2 + $0xf8] sm:$0xff] %v13769_v24  ;;  %v14339_v25 = vpop.f32.mrb[30].mxu1  ;;  %v5425_v26 = vpop.f32.mrb[31].mxu0 }
 0x49d   :  { %10975 = vst [vmem:[#allocation2 + $0x1f8] sm:$0xff] %v14339_v25  ;;  %5498 = vst [vmem:[#allocation2 + $0xe8] sm:$0xff] %v5425_v26  ;;  %v10899_v27 = vpop.f32.mrb[31].mxu1 }
 0x49e   :  { %10973 = vst [vmem:[#allocation2 + $0x1e8] sm:$0xff] %v10899_v27 }
 0x49f   :  { %15790 = shalt.err (!%p15787_p4)
}
 0x4a0   :  { %s15791_s25 = scalar_lea.hbm %s18127_s2, 8192 }
 0x4a1   :  { %p15792_p5 = scmp.ne.s32.totalorder %s18127_s2, %s15791_s25  ;;  %p15795_p6 = scmp.lt.u32.totalorder %s15791_s25, %s18127_s2 }
 0x4a3   :  { %p15797_p7 = pnand %p15795_p6, %p15792_p5 }
 0x4a5   :  { %15800 = shalt.err (!%p15797_p7)
}
 0x4a6   :  { %s15804_s29 = smov 128   ;;  %s15805_s30 = smov 8  }
 0x4a7   :  { %10987 = dma.vmem_to_hbm [thread:$0]  %s10982_s21, 8192, %s18127_s2, [#allocation3], %s15804_s29, %s15804_s29, %s15805_s30  }
 0x4a8   :  { %15801 = dma.done.wait [#allocation3], 8192  }
 0x4a9   :  { %15802 = vsyncadd [#allocation3], 4294959104 }
 0x4aa   :  { %10991 = vsyncpa [#allocation3], 1 }

</bundles_post_ra>
